<compile_context>
chip_gen: v7x
topology: tpu7x:2x2x1
jax: 0.10.0
libtpu: 0.0.40
codegen_flags: <defaults>
</compile_context>

<pallas_src>
import math
import functools

import jax
import jax.numpy as jnp
from jax.experimental import pallas as pl
from jax.experimental.pallas import tpu as pltpu

LN_EPS = 1e-5            # nn.LayerNorm default
DIM_FEEDFORWARD = 2048   # nn.TransformerEncoderLayer default
LANE = 128               # TPU lane width (output padding target)

_VMEM = pl.BlockSpec(memory_space=pltpu.MemorySpace.VMEM)


# ---------------------------------------------------------------------------
# Fused forward kernel
# ---------------------------------------------------------------------------
def fused_forward_kernel(user_ref, movie_ref,
                         wqkv_ref, bqkv_ref, wo_ref, bo_ref,
                         ln1w_ref, ln1b_ref, w1_ref, b1_ref,
                         w2_ref, b2_ref, ln2w_ref, ln2b_ref,
                         fcw_ref, fcb_ref, out_ref,
                         *, num_heads, num_layers):
    """user: (S, E), movie: (S, 5, E); out: (S, A_pad)."""
    # ----- embed combine: x = cat(user, mean(movie, axis=1)) -----
    u = user_ref[...]                                   # (S, E)
    m = jnp.mean(movie_ref[...], axis=1)                # (S, E) sublane reduce
    x = jnp.concatenate([u, m], axis=-1)                # (S, D) -- single-vreg lane concat

    S, D = x.shape
    H = num_heads
    hd = D // H

    # ----- encoder layers (post-norm nn.TransformerEncoderLayer, eval mode) -----
    for l in range(num_layers):                         # static unroll (L is tiny)
        # fused QKV projection: one MXU push instead of three.
        # (1/sqrt(hd) attention scale is pre-folded into the Q slice host-side.)
        qkv = jnp.dot(x, wqkv_ref[l],
                      preferred_element_type=jnp.float32) + bqkv_ref[l]   # (S, 3D)

        kT = qkv[:, D:2 * D].T                          # (D, S); one small transpose/layer
        wo_l = wo_ref[l]                                # (D, D) in (in, out) layout

        attn = jnp.broadcast_to(bo_ref[l], (S, D))      # start acc at the out-proj bias
        for h in range(H):                              # static unroll; all 2-D matmuls
            lo, hi = h * hd, (h + 1) * hd
            qh = qkv[:, lo:hi]                          # (S, hd)  (already scaled)
            khT = kT[lo:hi, :]                          # (hd, S)
            vh = qkv[:, 2 * D + lo:2 * D + hi]          # (S, hd)

            s = jnp.dot(qh, khT, preferred_element_type=jnp.float32)      # (S, S)
            s = s - jnp.max(s, axis=-1, keepdims=True)
            p = jnp.exp(s)
            p = p * pl.reciprocal(jnp.sum(p, axis=-1, keepdims=True), approx=True)

            ctx = jnp.dot(p, vh, preferred_element_type=jnp.float32)      # (S, hd)
            # accumulate through this head's slice of Wo -> no concat/relayout
            attn = attn + jnp.dot(ctx, wo_l[lo:hi, :],
                                  preferred_element_type=jnp.float32)

        # residual + LayerNorm1
        y = x + attn
        mu = jnp.mean(y, axis=-1, keepdims=True)
        var = jnp.mean(jnp.square(y - mu), axis=-1, keepdims=True)
        y = (y - mu) * jax.lax.rsqrt(var + LN_EPS) * ln1w_ref[l] + ln1b_ref[l]

        # feed-forward: Linear -> ReLU -> Linear (weights already (in, out))
        h1 = jnp.dot(y, w1_ref[l], preferred_element_type=jnp.float32) + b1_ref[l]
        h1 = jnp.maximum(h1, 0.0)
        h2 = jnp.dot(h1, w2_ref[l], preferred_element_type=jnp.float32) + b2_ref[l]

        # residual + LayerNorm2
        z = y + h2
        mu2 = jnp.mean(z, axis=-1, keepdims=True)
        var2 = jnp.mean(jnp.square(z - mu2), axis=-1, keepdims=True)
        x = (z - mu2) * jax.lax.rsqrt(var2 + LN_EPS) * ln2w_ref[l] + ln2b_ref[l]

    # ----- fc_out into a lane-dense padded block (A padded to 128) -----
    out_ref[...] = (jnp.dot(x, fcw_ref[...], preferred_element_type=jnp.float32)
                    + fcb_ref[...])


# ---------------------------------------------------------------------------
# Wrapper
# ---------------------------------------------------------------------------
def transformer_net_v2_forward(params, state, num_heads, num_layers, num_actions):
    """state: (B, 6) int32 — [user_id, movie_id x 5]. Returns (B, num_actions)."""
    user_ids = state[:, 0]                                      # (B,)
    movie_ids = state[:, 1:6]                                   # (B, 5)
    # TODO(synk): optionally fold these data-dependent gathers into the kernel via
    # PrefetchScalarGridSpec scalar-prefetched ids; kept as XLA glue for clarity.
    user_emb = jnp.take(params["user_embed"], user_ids, axis=0)     # (B, E)
    movie_emb = jnp.take(params["movie_embed"], movie_ids, axis=0)  # (B, 5, E)

    B = user_emb.shape[0]
    a_pad = params["fc_w"].shape[1]

    kernel_args = (
        user_emb, movie_emb,
        params["wqkv"], params["bqkv"], params["wo"], params["bo"],
        params["ln1w"], params["ln1b"], params["w1"], params["b1"],
        params["w2"], params["b2"], params["ln2w"], params["ln2b"],
        params["fc_w"], params["fc_b"],
    )
    # Single fused call: no grid needed (everything fits VMEM with large margin on
    # v5e/v6e/v7x). If batch ever grows large, add a parallel grid over row tiles
    # and mark it "parallel" (megacore) + block the FFN weights.
    out = pl.pallas_call(
        functools.partial(fused_forward_kernel,
                          num_heads=num_heads, num_layers=num_layers),
        out_shape=jax.ShapeDtypeStruct((B, a_pad), jnp.float32),
        in_specs=[_VMEM] * len(kernel_args),
        out_specs=_VMEM,
    )(*kernel_args)
    return out[:, :num_actions]


# ---------------------------------------------------------------------------
# Parameter init (PyTorch conventions) + one-time host-side packing
# ---------------------------------------------------------------------------
def init_torch_style_params(key, user_size, movie_size, embed_size, num_layers,
                            num_actions, dim_ff=DIM_FEEDFORWARD):
    """Weights in the PyTorch convention: Linear W is (out, in), y = x @ W.T + b."""
    D = 2 * embed_size
    keys = jax.random.split(key, 4 + num_layers)

    def normal(k, shape, scale=0.02):
        return scale * jax.random.normal(k, shape, dtype=jnp.float32)

    params = {
        "user_embed": normal(keys[0], (user_size, embed_size)),
        "movie_embed": normal(keys[1], (movie_size, embed_size)),
        "fc_w": normal(keys[2], (num_actions, D)),
        "fc_b": jnp.zeros((num_actions,), jnp.float32),
        "layers": [],
    }
    for i in range(num_layers):
        lk = jax.random.split(keys[4 + i], 4)
        params["layers"].append({
            "in_proj_w": normal(lk[0], (3 * D, D)),   # stacked [Wq; Wk; Wv]
            "in_proj_b": jnp.zeros((3 * D,), jnp.float32),
            "out_proj_w": normal(lk[1], (D, D)),
            "out_proj_b": jnp.zeros((D,), jnp.float32),
            "ln1_w": jnp.ones((D,), jnp.float32),
            "ln1_b": jnp.zeros((D,), jnp.float32),
            "lin1_w": normal(lk[2], (dim_ff, D)),
            "lin1_b": jnp.zeros((dim_ff,), jnp.float32),
            "lin2_w": normal(lk[3], (D, dim_ff)),
            "lin2_b": jnp.zeros((D,), jnp.float32),
            "ln2_w": jnp.ones((D,), jnp.float32),
            "ln2_b": jnp.zeros((D,), jnp.float32),
        })
    return params


def pack_params(tp, num_heads):
    """One-time host-side repack: transpose to (in, out), stack layers on a
    leading L axis, fold the 1/sqrt(head_dim) scale into the Q projection,
    pad fc_out lanes to a multiple of 128."""
    layers = tp["layers"]
    D = tp["fc_w"].shape[1]
    A = tp["fc_w"].shape[0]
    a_pad = ((A + LANE - 1) // LANE) * LANE
    hd = D // num_heads
    scale = 1.0 / math.sqrt(hd)

    def row(v):  # (N,) -> (1, N) so it broadcasts over sublanes in-kernel
        return v[None, :]

    def scaled_qkv_w(w):   # (3D, D) torch layout -> scale Q rows -> (D, 3D)
        return jnp.concatenate([w[:D] * scale, w[D:]], axis=0).T

    def scaled_qkv_b(b):   # (3D,) -> scale Q part -> (1, 3D)
        return row(jnp.concatenate([b[:D] * scale, b[D:]]))

    packed = {
        "user_embed": tp["user_embed"],
        "movie_embed": tp["movie_embed"],
        "wqkv": jnp.stack([scaled_qkv_w(l["in_proj_w"]) for l in layers]),  # (L, D, 3D)
        "bqkv": jnp.stack([scaled_qkv_b(l["in_proj_b"]) for l in layers]),  # (L, 1, 3D)
        "wo":   jnp.stack([l["out_proj_w"].T for l in layers]),             # (L, D, D)
        "bo":   jnp.stack([row(l["out_proj_b"]) for l in layers]),          # (L, 1, D)
        "ln1w": jnp.stack([row(l["ln1_w"]) for l in layers]),
        "ln1b": jnp.stack([row(l["ln1_b"]) for l in layers]),
        "w1":   jnp.stack([l["lin1_w"].T for l in layers]),                 # (L, D, FF)
        "b1":   jnp.stack([row(l["lin1_b"]) for l in layers]),              # (L, 1, FF)
        "w2":   jnp.stack([l["lin2_w"].T for l in layers]),                 # (L, FF, D)
        "b2":   jnp.stack([row(l["lin2_b"]) for l in layers]),              # (L, 1, D)
        "ln2w": jnp.stack([row(l["ln2_w"]) for l in layers]),
        "ln2b": jnp.stack([row(l["ln2_b"]) for l in layers]),
        "fc_w": jnp.zeros((D, a_pad), jnp.float32).at[:, :A].set(tp["fc_w"].T),
        "fc_b": jnp.zeros((1, a_pad), jnp.float32).at[0, :A].set(tp["fc_b"]),
    }
    return packed


# ---------------------------------------------------------------------------
# Pure-JAX reference (mirrors PyTorch eval-mode forward), for correctness check
# ---------------------------------------------------------------------------
def reference_forward(tp, state, num_heads, num_layers, num_actions):
    D = tp["fc_w"].shape[1]
    H = num_heads
    hd = D // H
    u = tp["user_embed"][state[:, 0]]
    m = tp["movie_embed"][state[:, 1:6]].mean(axis=1)
    x = jnp.concatenate([u, m], axis=-1)                 # (S, D)
    S = x.shape[0]
    for l in range(num_layers):
        p = tp["layers"][l]
        qkv = x @ p["in_proj_w"].T + p["in_proj_b"]
        q, k, v = jnp.split(qkv, 3, axis=-1)
        qh = q.reshape(S, H, hd).transpose(1, 0, 2)
        kh = k.reshape(S, H, hd).transpose(1, 0, 2)
        vh = v.reshape(S, H, hd).transpose(1, 0, 2)
        s = jnp.einsum("hqd,hkd->hqk", qh, kh) / math.sqrt(hd)
        pa = jax.nn.softmax(s, axis=-1)
        ctx = jnp.einsum("hqk,hkd->hqd", pa, vh).transpose(1, 0, 2).reshape(S, D)
        attn = ctx @ p["out_proj_w"].T + p["out_proj_b"]
        y = x + attn
        y = ((y - y.mean(-1, keepdims=True))
             / jnp.sqrt(y.var(-1, keepdims=True) + LN_EPS)) * p["ln1_w"] + p["ln1_b"]
        h1 = jnp.maximum(y @ p["lin1_w"].T + p["lin1_b"], 0.0)
        h2 = h1 @ p["lin2_w"].T + p["lin2_b"]
        z = y + h2
        x = ((z - z.mean(-1, keepdims=True))
             / jnp.sqrt(z.var(-1, keepdims=True) + LN_EPS)) * p["ln2_w"] + p["ln2_b"]
    return x @ tp["fc_w"].T + tp["fc_b"]


# ---------------------------------------------------------------------------
if __name__ == "__main__":
    user_size, movie_size, embed_size = 50, 100, 16
    num_heads, num_layers, num_actions = 4, 2, 6
    batch = 8

    key = jax.random.PRNGKey(0)
    pkey, skey_u, skey_m = jax.random.split(key, 3)

    torch_params = init_torch_style_params(pkey, user_size, movie_size, embed_size,
                                           num_layers, num_actions)
    params = pack_params(torch_params, num_heads)

    user_ids = jax.random.randint(skey_u, (batch, 1), 0, user_size)
    movie_ids = jax.random.randint(skey_m, (batch, 5), 0, movie_size)
    state = jnp.concatenate([user_ids, movie_ids], axis=1).astype(jnp.int32)  # (B, 6)

    fwd = jax.jit(transformer_net_v2_forward, static_argnums=(2, 3, 4))
    q_values = fwd(params, state, num_heads, num_layers, num_actions)
    q_values = jax.block_until_ready(q_values)

    assert q_values.shape == (batch, num_actions), q_values.shape
    assert q_values.dtype == jnp.float32

    ref = reference_forward(torch_params, state, num_heads, num_layers, num_actions)
    max_err = float(jnp.max(jnp.abs(q_values - ref)))
    assert max_err < 1e-2, f"mismatch vs reference: max abs err = {max_err}"

    print("KERNEL_OK")
</pallas_src>

<mosaic_0001>
module attributes {stable_mosaic.version = 11 : i64} {
  func.func @fused_forward_kernel(%arg0: memref<8x16xf32, #tpu.memory_space<vmem>>, %arg1: memref<8x5x16xf32, #tpu.memory_space<vmem>>, %arg2: memref<2x32x96xf32, #tpu.memory_space<vmem>>, %arg3: memref<2x1x96xf32, #tpu.memory_space<vmem>>, %arg4: memref<2x32x32xf32, #tpu.memory_space<vmem>>, %arg5: memref<2x1x32xf32, #tpu.memory_space<vmem>>, %arg6: memref<2x1x32xf32, #tpu.memory_space<vmem>>, %arg7: memref<2x1x32xf32, #tpu.memory_space<vmem>>, %arg8: memref<2x32x2048xf32, #tpu.memory_space<vmem>>, %arg9: memref<2x1x2048xf32, #tpu.memory_space<vmem>>, %arg10: memref<2x2048x32xf32, #tpu.memory_space<vmem>>, %arg11: memref<2x1x32xf32, #tpu.memory_space<vmem>>, %arg12: memref<2x1x32xf32, #tpu.memory_space<vmem>>, %arg13: memref<2x1x32xf32, #tpu.memory_space<vmem>>, %arg14: memref<32x128xf32, #tpu.memory_space<vmem>>, %arg15: memref<1x128xf32, #tpu.memory_space<vmem>>, %arg16: memref<8x128xf32, #tpu.memory_space<vmem>>) attributes {dimension_semantics = [], scalar_prefetch = 0 : i64, scratch_operands = 0 : i64, tpu.core_type = #tpu.core_type<tc>} {
    %c0 = arith.constant 0 : index
    %c0_0 = arith.constant 0 : index
    %0 = vector.load %arg0[%c0, %c0_0] : memref<8x16xf32, #tpu.memory_space<vmem>>, vector<8x16xf32>
    %c0_1 = arith.constant 0 : index
    %c0_2 = arith.constant 0 : index
    %c0_3 = arith.constant 0 : index
    %1 = vector.load %arg1[%c0_1, %c0_2, %c0_3] : memref<8x5x16xf32, #tpu.memory_space<vmem>>, vector<8x5x16xf32>
    %cst = arith.constant dense<0.000000e+00> : vector<8x16xf32>
    %2 = vector.multi_reduction <add>, %1, %cst [1] : vector<8x5x16xf32> to vector<8x16xf32>
    %cst_4 = arith.constant 5.000000e+00 : f32
    %3 = vector.broadcast %cst_4 : f32 to vector<8x16xf32>
    %4 = arith.divf %2, %3 : vector<8x16xf32>
    %5 = tpu.concatenate %0, %4 in 1 : vector<8x16xf32>, vector<8x16xf32> -> vector<8x32xf32>
    %c0_5 = arith.constant 0 : index
    %c0_6 = arith.constant 0 : index
    %c0_7 = arith.constant 0 : index
    %6 = vector.load %arg2[%c0_5, %c0_6, %c0_7] : memref<2x32x96xf32, #tpu.memory_space<vmem>>, vector<1x32x96xf32>
    %7 = vector.shape_cast %6 : vector<1x32x96xf32> to vector<32x96xf32>
    %cst_8 = arith.constant dense<0.000000e+00> : vector<8x96xf32>
    %8 = tpu.matmul %5, %7, %cst_8 {dimension_numbers = #tpu.dot_dimension_numbers<[1], [0], [0], [1], [0, 0, 1, 1], [], []>} : vector<8x32xf32>, vector<32x96xf32>, vector<8x96xf32> -> vector<8x96xf32>
    %c0_9 = arith.constant 0 : index
    %c0_10 = arith.constant 0 : index
    %c0_11 = arith.constant 0 : index
    %9 = vector.load %arg3[%c0_9, %c0_10, %c0_11] : memref<2x1x96xf32, #tpu.memory_space<vmem>>, vector<1x1x96xf32>
    %10 = vector.shape_cast %9 : vector<1x1x96xf32> to vector<1x96xf32>
    %11 = vector.broadcast %10 : vector<1x96xf32> to vector<8x96xf32>
    %12 = arith.addf %8, %11 : vector<8x96xf32>
    %13 = vector.extract_strided_slice %12 {offsets = [0, 32], sizes = [8, 32], strides = [1, 1]} : vector<8x96xf32> to vector<8x32xf32>
    %14 = tpu.transpose %13, [1, 0] : vector<8x32xf32> -> vector<32x8xf32>
    %c0_12 = arith.constant 0 : index
    %c0_13 = arith.constant 0 : index
    %c0_14 = arith.constant 0 : index
    %15 = vector.load %arg4[%c0_12, %c0_13, %c0_14] : memref<2x32x32xf32, #tpu.memory_space<vmem>>, vector<1x32x32xf32>
    %16 = vector.shape_cast %15 : vector<1x32x32xf32> to vector<32x32xf32>
    %c0_15 = arith.constant 0 : index
    %c0_16 = arith.constant 0 : index
    %c0_17 = arith.constant 0 : index
    %17 = vector.load %arg5[%c0_15, %c0_16, %c0_17] : memref<2x1x32xf32, #tpu.memory_space<vmem>>, vector<1x1x32xf32>
    %18 = vector.shape_cast %17 : vector<1x1x32xf32> to vector<1x32xf32>
    %19 = vector.shape_cast %18 : vector<1x32xf32> to vector<1x32xf32>
    %20 = vector.broadcast %19 : vector<1x32xf32> to vector<8x32xf32>
    %21 = vector.extract_strided_slice %12 {offsets = [0, 0], sizes = [8, 8], strides = [1, 1]} : vector<8x96xf32> to vector<8x8xf32>
    %22 = vector.extract_strided_slice %14 {offsets = [0, 0], sizes = [8, 8], strides = [1, 1]} : vector<32x8xf32> to vector<8x8xf32>
    %23 = vector.extract_strided_slice %12 {offsets = [0, 64], sizes = [8, 8], strides = [1, 1]} : vector<8x96xf32> to vector<8x8xf32>
    %cst_18 = arith.constant dense<0.000000e+00> : vector<8x8xf32>
    %24 = tpu.matmul %21, %22, %cst_18 {dimension_numbers = #tpu.dot_dimension_numbers<[1], [0], [0], [1], [0, 0, 1, 1], [], []>} : vector<8x8xf32>, vector<8x8xf32>, vector<8x8xf32> -> vector<8x8xf32>
    %cst_19 = arith.constant dense<0xFF800000> : vector<8xf32>
    %25 = vector.multi_reduction <maximumf>, %24, %cst_19 [1] : vector<8x8xf32> to vector<8xf32>
    %26 = vector.shape_cast %25 : vector<8xf32> to vector<8x1xf32>
    %27 = vector.broadcast %26 : vector<8x1xf32> to vector<8x8xf32>
    %28 = arith.subf %24, %27 : vector<8x8xf32>
    %29 = math.exp %28 : vector<8x8xf32>
    %cst_20 = arith.constant dense<0.000000e+00> : vector<8xf32>
    %30 = vector.multi_reduction <add>, %29, %cst_20 [1] : vector<8x8xf32> to vector<8xf32>
    %31 = vector.shape_cast %30 : vector<8xf32> to vector<8x1xf32>
    %32 = tpu.reciprocal %31 {approx = true} : vector<8x1xf32> -> vector<8x1xf32>
    %33 = vector.broadcast %32 : vector<8x1xf32> to vector<8x8xf32>
    %34 = arith.mulf %29, %33 : vector<8x8xf32>
    %cst_21 = arith.constant dense<0.000000e+00> : vector<8x8xf32>
    %35 = tpu.matmul %34, %23, %cst_21 {dimension_numbers = #tpu.dot_dimension_numbers<[1], [0], [0], [1], [0, 0, 1, 1], [], []>} : vector<8x8xf32>, vector<8x8xf32>, vector<8x8xf32> -> vector<8x8xf32>
    %36 = vector.extract_strided_slice %16 {offsets = [0, 0], sizes = [8, 32], strides = [1, 1]} : vector<32x32xf32> to vector<8x32xf32>
    %cst_22 = arith.constant dense<0.000000e+00> : vector<8x32xf32>
    %37 = tpu.matmul %35, %36, %cst_22 {dimension_numbers = #tpu.dot_dimension_numbers<[1], [0], [0], [1], [0, 0, 1, 1], [], []>} : vector<8x8xf32>, vector<8x32xf32>, vector<8x32xf32> -> vector<8x32xf32>
    %38 = arith.addf %20, %37 : vector<8x32xf32>
    %39 = vector.extract_strided_slice %12 {offsets = [0, 8], sizes = [8, 8], strides = [1, 1]} : vector<8x96xf32> to vector<8x8xf32>
    %40 = vector.extract_strided_slice %14 {offsets = [8, 0], sizes = [8, 8], strides = [1, 1]} : vector<32x8xf32> to vector<8x8xf32>
    %41 = vector.extract_strided_slice %12 {offsets = [0, 72], sizes = [8, 8], strides = [1, 1]} : vector<8x96xf32> to vector<8x8xf32>
    %cst_23 = arith.constant dense<0.000000e+00> : vector<8x8xf32>
    %42 = tpu.matmul %39, %40, %cst_23 {dimension_numbers = #tpu.dot_dimension_numbers<[1], [0], [0], [1], [0, 0, 1, 1], [], []>} : vector<8x8xf32>, vector<8x8xf32>, vector<8x8xf32> -> vector<8x8xf32>
    %cst_24 = arith.constant dense<0xFF800000> : vector<8xf32>
    %43 = vector.multi_reduction <maximumf>, %42, %cst_24 [1] : vector<8x8xf32> to vector<8xf32>
    %44 = vector.shape_cast %43 : vector<8xf32> to vector<8x1xf32>
    %45 = vector.broadcast %44 : vector<8x1xf32> to vector<8x8xf32>
    %46 = arith.subf %42, %45 : vector<8x8xf32>
    %47 = math.exp %46 : vector<8x8xf32>
    %cst_25 = arith.constant dense<0.000000e+00> : vector<8xf32>
    %48 = vector.multi_reduction <add>, %47, %cst_25 [1] : vector<8x8xf32> to vector<8xf32>
    %49 = vector.shape_cast %48 : vector<8xf32> to vector<8x1xf32>
    %50 = tpu.reciprocal %49 {approx = true} : vector<8x1xf32> -> vector<8x1xf32>
    %51 = vector.broadcast %50 : vector<8x1xf32> to vector<8x8xf32>
    %52 = arith.mulf %47, %51 : vector<8x8xf32>
    %cst_26 = arith.constant dense<0.000000e+00> : vector<8x8xf32>
    %53 = tpu.matmul %52, %41, %cst_26 {dimension_numbers = #tpu.dot_dimension_numbers<[1], [0], [0], [1], [0, 0, 1, 1], [], []>} : vector<8x8xf32>, vector<8x8xf32>, vector<8x8xf32> -> vector<8x8xf32>
    %54 = vector.extract_strided_slice %16 {offsets = [8, 0], sizes = [8, 32], strides = [1, 1]} : vector<32x32xf32> to vector<8x32xf32>
    %cst_27 = arith.constant dense<0.000000e+00> : vector<8x32xf32>
    %55 = tpu.matmul %53, %54, %cst_27 {dimension_numbers = #tpu.dot_dimension_numbers<[1], [0], [0], [1], [0, 0, 1, 1], [], []>} : vector<8x8xf32>, vector<8x32xf32>, vector<8x32xf32> -> vector<8x32xf32>
    %56 = arith.addf %38, %55 : vector<8x32xf32>
    %57 = vector.extract_strided_slice %12 {offsets = [0, 16], sizes = [8, 8], strides = [1, 1]} : vector<8x96xf32> to vector<8x8xf32>
    %58 = vector.extract_strided_slice %14 {offsets = [16, 0], sizes = [8, 8], strides = [1, 1]} : vector<32x8xf32> to vector<8x8xf32>
    %59 = vector.extract_strided_slice %12 {offsets = [0, 80], sizes = [8, 8], strides = [1, 1]} : vector<8x96xf32> to vector<8x8xf32>
    %cst_28 = arith.constant dense<0.000000e+00> : vector<8x8xf32>
    %60 = tpu.matmul %57, %58, %cst_28 {dimension_numbers = #tpu.dot_dimension_numbers<[1], [0], [0], [1], [0, 0, 1, 1], [], []>} : vector<8x8xf32>, vector<8x8xf32>, vector<8x8xf32> -> vector<8x8xf32>
    %cst_29 = arith.constant dense<0xFF800000> : vector<8xf32>
    %61 = vector.multi_reduction <maximumf>, %60, %cst_29 [1] : vector<8x8xf32> to vector<8xf32>
    %62 = vector.shape_cast %61 : vector<8xf32> to vector<8x1xf32>
    %63 = vector.broadcast %62 : vector<8x1xf32> to vector<8x8xf32>
    %64 = arith.subf %60, %63 : vector<8x8xf32>
    %65 = math.exp %64 : vector<8x8xf32>
    %cst_30 = arith.constant dense<0.000000e+00> : vector<8xf32>
    %66 = vector.multi_reduction <add>, %65, %cst_30 [1] : vector<8x8xf32> to vector<8xf32>
    %67 = vector.shape_cast %66 : vector<8xf32> to vector<8x1xf32>
    %68 = tpu.reciprocal %67 {approx = true} : vector<8x1xf32> -> vector<8x1xf32>
    %69 = vector.broadcast %68 : vector<8x1xf32> to vector<8x8xf32>
    %70 = arith.mulf %65, %69 : vector<8x8xf32>
    %cst_31 = arith.constant dense<0.000000e+00> : vector<8x8xf32>
    %71 = tpu.matmul %70, %59, %cst_31 {dimension_numbers = #tpu.dot_dimension_numbers<[1], [0], [0], [1], [0, 0, 1, 1], [], []>} : vector<8x8xf32>, vector<8x8xf32>, vector<8x8xf32> -> vector<8x8xf32>
    %72 = vector.extract_strided_slice %16 {offsets = [16, 0], sizes = [8, 32], strides = [1, 1]} : vector<32x32xf32> to vector<8x32xf32>
    %cst_32 = arith.constant dense<0.000000e+00> : vector<8x32xf32>
    %73 = tpu.matmul %71, %72, %cst_32 {dimension_numbers = #tpu.dot_dimension_numbers<[1], [0], [0], [1], [0, 0, 1, 1], [], []>} : vector<8x8xf32>, vector<8x32xf32>, vector<8x32xf32> -> vector<8x32xf32>
    %74 = arith.addf %56, %73 : vector<8x32xf32>
    %75 = vector.extract_strided_slice %12 {offsets = [0, 24], sizes = [8, 8], strides = [1, 1]} : vector<8x96xf32> to vector<8x8xf32>
    %76 = vector.extract_strided_slice %14 {offsets = [24, 0], sizes = [8, 8], strides = [1, 1]} : vector<32x8xf32> to vector<8x8xf32>
    %77 = vector.extract_strided_slice %12 {offsets = [0, 88], sizes = [8, 8], strides = [1, 1]} : vector<8x96xf32> to vector<8x8xf32>
    %cst_33 = arith.constant dense<0.000000e+00> : vector<8x8xf32>
    %78 = tpu.matmul %75, %76, %cst_33 {dimension_numbers = #tpu.dot_dimension_numbers<[1], [0], [0], [1], [0, 0, 1, 1], [], []>} : vector<8x8xf32>, vector<8x8xf32>, vector<8x8xf32> -> vector<8x8xf32>
    %cst_34 = arith.constant dense<0xFF800000> : vector<8xf32>
    %79 = vector.multi_reduction <maximumf>, %78, %cst_34 [1] : vector<8x8xf32> to vector<8xf32>
    %80 = vector.shape_cast %79 : vector<8xf32> to vector<8x1xf32>
    %81 = vector.broadcast %80 : vector<8x1xf32> to vector<8x8xf32>
    %82 = arith.subf %78, %81 : vector<8x8xf32>
    %83 = math.exp %82 : vector<8x8xf32>
    %cst_35 = arith.constant dense<0.000000e+00> : vector<8xf32>
    %84 = vector.multi_reduction <add>, %83, %cst_35 [1] : vector<8x8xf32> to vector<8xf32>
    %85 = vector.shape_cast %84 : vector<8xf32> to vector<8x1xf32>
    %86 = tpu.reciprocal %85 {approx = true} : vector<8x1xf32> -> vector<8x1xf32>
    %87 = vector.broadcast %86 : vector<8x1xf32> to vector<8x8xf32>
    %88 = arith.mulf %83, %87 : vector<8x8xf32>
    %cst_36 = arith.constant dense<0.000000e+00> : vector<8x8xf32>
    %89 = tpu.matmul %88, %77, %cst_36 {dimension_numbers = #tpu.dot_dimension_numbers<[1], [0], [0], [1], [0, 0, 1, 1], [], []>} : vector<8x8xf32>, vector<8x8xf32>, vector<8x8xf32> -> vector<8x8xf32>
    %90 = vector.extract_strided_slice %16 {offsets = [24, 0], sizes = [8, 32], strides = [1, 1]} : vector<32x32xf32> to vector<8x32xf32>
    %cst_37 = arith.constant dense<0.000000e+00> : vector<8x32xf32>
    %91 = tpu.matmul %89, %90, %cst_37 {dimension_numbers = #tpu.dot_dimension_numbers<[1], [0], [0], [1], [0, 0, 1, 1], [], []>} : vector<8x8xf32>, vector<8x32xf32>, vector<8x32xf32> -> vector<8x32xf32>
    %92 = arith.addf %74, %91 : vector<8x32xf32>
    %93 = arith.addf %5, %92 : vector<8x32xf32>
    %cst_38 = arith.constant dense<0.000000e+00> : vector<8xf32>
    %94 = vector.multi_reduction <add>, %93, %cst_38 [1] : vector<8x32xf32> to vector<8xf32>
    %95 = vector.shape_cast %94 : vector<8xf32> to vector<8x1xf32>
    %cst_39 = arith.constant 3.200000e+01 : f32
    %96 = vector.broadcast %cst_39 : f32 to vector<8x1xf32>
    %97 = arith.divf %95, %96 : vector<8x1xf32>
    %98 = vector.broadcast %97 : vector<8x1xf32> to vector<8x32xf32>
    %99 = arith.subf %93, %98 : vector<8x32xf32>
    %100 = arith.mulf %99, %99 : vector<8x32xf32>
    %cst_40 = arith.constant dense<0.000000e+00> : vector<8xf32>
    %101 = vector.multi_reduction <add>, %100, %cst_40 [1] : vector<8x32xf32> to vector<8xf32>
    %102 = vector.shape_cast %101 : vector<8xf32> to vector<8x1xf32>
    %cst_41 = arith.constant 3.200000e+01 : f32
    %103 = vector.broadcast %cst_41 : f32 to vector<8x1xf32>
    %104 = arith.divf %102, %103 : vector<8x1xf32>
    %105 = vector.broadcast %97 : vector<8x1xf32> to vector<8x32xf32>
    %106 = arith.subf %93, %105 : vector<8x32xf32>
    %cst_42 = arith.constant 9.99999974E-6 : f32
    %107 = vector.broadcast %cst_42 : f32 to vector<8x1xf32>
    %108 = arith.addf %104, %107 : vector<8x1xf32>
    %109 = math.rsqrt %108 : vector<8x1xf32>
    %110 = vector.broadcast %109 : vector<8x1xf32> to vector<8x32xf32>
    %111 = arith.mulf %106, %110 : vector<8x32xf32>
    %c0_43 = arith.constant 0 : index
    %c0_44 = arith.constant 0 : index
    %c0_45 = arith.constant 0 : index
    %112 = vector.load %arg6[%c0_43, %c0_44, %c0_45] : memref<2x1x32xf32, #tpu.memory_space<vmem>>, vector<1x1x32xf32>
    %113 = vector.shape_cast %112 : vector<1x1x32xf32> to vector<1x32xf32>
    %114 = vector.broadcast %113 : vector<1x32xf32> to vector<8x32xf32>
    %115 = arith.mulf %111, %114 : vector<8x32xf32>
    %c0_46 = arith.constant 0 : index
    %c0_47 = arith.constant 0 : index
    %c0_48 = arith.constant 0 : index
    %116 = vector.load %arg7[%c0_46, %c0_47, %c0_48] : memref<2x1x32xf32, #tpu.memory_space<vmem>>, vector<1x1x32xf32>
    %117 = vector.shape_cast %116 : vector<1x1x32xf32> to vector<1x32xf32>
    %118 = vector.broadcast %117 : vector<1x32xf32> to vector<8x32xf32>
    %119 = arith.addf %115, %118 : vector<8x32xf32>
    %c0_49 = arith.constant 0 : index
    %c0_50 = arith.constant 0 : index
    %c0_51 = arith.constant 0 : index
    %120 = vector.load %arg8[%c0_49, %c0_50, %c0_51] : memref<2x32x2048xf32, #tpu.memory_space<vmem>>, vector<1x32x2048xf32>
    %121 = vector.shape_cast %120 : vector<1x32x2048xf32> to vector<32x2048xf32>
    %cst_52 = arith.constant dense<0.000000e+00> : vector<8x2048xf32>
    %122 = tpu.matmul %119, %121, %cst_52 {dimension_numbers = #tpu.dot_dimension_numbers<[1], [0], [0], [1], [0, 0, 1, 1], [], []>} : vector<8x32xf32>, vector<32x2048xf32>, vector<8x2048xf32> -> vector<8x2048xf32>
    %c0_53 = arith.constant 0 : index
    %c0_54 = arith.constant 0 : index
    %c0_55 = arith.constant 0 : index
    %123 = vector.load %arg9[%c0_53, %c0_54, %c0_55] : memref<2x1x2048xf32, #tpu.memory_space<vmem>>, vector<1x1x2048xf32>
    %124 = vector.shape_cast %123 : vector<1x1x2048xf32> to vector<1x2048xf32>
    %125 = vector.broadcast %124 : vector<1x2048xf32> to vector<8x2048xf32>
    %126 = arith.addf %122, %125 : vector<8x2048xf32>
    %cst_56 = arith.constant 0.000000e+00 : f32
    %127 = vector.broadcast %cst_56 : f32 to vector<8x2048xf32>
    %128 = arith.maximumf %126, %127 : vector<8x2048xf32>
    %c0_57 = arith.constant 0 : index
    %c0_58 = arith.constant 0 : index
    %c0_59 = arith.constant 0 : index
    %129 = vector.load %arg10[%c0_57, %c0_58, %c0_59] : memref<2x2048x32xf32, #tpu.memory_space<vmem>>, vector<1x2048x32xf32>
    %130 = vector.shape_cast %129 : vector<1x2048x32xf32> to vector<2048x32xf32>
    %cst_60 = arith.constant dense<0.000000e+00> : vector<8x32xf32>
    %131 = tpu.matmul %128, %130, %cst_60 {dimension_numbers = #tpu.dot_dimension_numbers<[1], [0], [0], [1], [0, 0, 1, 1], [], []>} : vector<8x2048xf32>, vector<2048x32xf32>, vector<8x32xf32> -> vector<8x32xf32>
    %c0_61 = arith.constant 0 : index
    %c0_62 = arith.constant 0 : index
    %c0_63 = arith.constant 0 : index
    %132 = vector.load %arg11[%c0_61, %c0_62, %c0_63] : memref<2x1x32xf32, #tpu.memory_space<vmem>>, vector<1x1x32xf32>
    %133 = vector.shape_cast %132 : vector<1x1x32xf32> to vector<1x32xf32>
    %134 = vector.broadcast %133 : vector<1x32xf32> to vector<8x32xf32>
    %135 = arith.addf %131, %134 : vector<8x32xf32>
    %136 = arith.addf %119, %135 : vector<8x32xf32>
    %cst_64 = arith.constant dense<0.000000e+00> : vector<8xf32>
    %137 = vector.multi_reduction <add>, %136, %cst_64 [1] : vector<8x32xf32> to vector<8xf32>
    %138 = vector.shape_cast %137 : vector<8xf32> to vector<8x1xf32>
    %cst_65 = arith.constant 3.200000e+01 : f32
    %139 = vector.broadcast %cst_65 : f32 to vector<8x1xf32>
    %140 = arith.divf %138, %139 : vector<8x1xf32>
    %141 = vector.broadcast %140 : vector<8x1xf32> to vector<8x32xf32>
    %142 = arith.subf %136, %141 : vector<8x32xf32>
    %143 = arith.mulf %142, %142 : vector<8x32xf32>
    %cst_66 = arith.constant dense<0.000000e+00> : vector<8xf32>
    %144 = vector.multi_reduction <add>, %143, %cst_66 [1] : vector<8x32xf32> to vector<8xf32>
    %145 = vector.shape_cast %144 : vector<8xf32> to vector<8x1xf32>
    %cst_67 = arith.constant 3.200000e+01 : f32
    %146 = vector.broadcast %cst_67 : f32 to vector<8x1xf32>
    %147 = arith.divf %145, %146 : vector<8x1xf32>
    %148 = vector.broadcast %140 : vector<8x1xf32> to vector<8x32xf32>
    %149 = arith.subf %136, %148 : vector<8x32xf32>
    %cst_68 = arith.constant 9.99999974E-6 : f32
    %150 = vector.broadcast %cst_68 : f32 to vector<8x1xf32>
    %151 = arith.addf %147, %150 : vector<8x1xf32>
    %152 = math.rsqrt %151 : vector<8x1xf32>
    %153 = vector.broadcast %152 : vector<8x1xf32> to vector<8x32xf32>
    %154 = arith.mulf %149, %153 : vector<8x32xf32>
    %c0_69 = arith.constant 0 : index
    %c0_70 = arith.constant 0 : index
    %c0_71 = arith.constant 0 : index
    %155 = vector.load %arg12[%c0_69, %c0_70, %c0_71] : memref<2x1x32xf32, #tpu.memory_space<vmem>>, vector<1x1x32xf32>
    %156 = vector.shape_cast %155 : vector<1x1x32xf32> to vector<1x32xf32>
    %157 = vector.broadcast %156 : vector<1x32xf32> to vector<8x32xf32>
    %158 = arith.mulf %154, %157 : vector<8x32xf32>
    %c0_72 = arith.constant 0 : index
    %c0_73 = arith.constant 0 : index
    %c0_74 = arith.constant 0 : index
    %159 = vector.load %arg13[%c0_72, %c0_73, %c0_74] : memref<2x1x32xf32, #tpu.memory_space<vmem>>, vector<1x1x32xf32>
    %160 = vector.shape_cast %159 : vector<1x1x32xf32> to vector<1x32xf32>
    %161 = vector.broadcast %160 : vector<1x32xf32> to vector<8x32xf32>
    %162 = arith.addf %158, %161 : vector<8x32xf32>
    %c1 = arith.constant 1 : index
    %c0_75 = arith.constant 0 : index
    %c0_76 = arith.constant 0 : index
    %163 = vector.load %arg2[%c1, %c0_75, %c0_76] : memref<2x32x96xf32, #tpu.memory_space<vmem>>, vector<1x32x96xf32>
    %164 = vector.shape_cast %163 : vector<1x32x96xf32> to vector<32x96xf32>
    %cst_77 = arith.constant dense<0.000000e+00> : vector<8x96xf32>
    %165 = tpu.matmul %162, %164, %cst_77 {dimension_numbers = #tpu.dot_dimension_numbers<[1], [0], [0], [1], [0, 0, 1, 1], [], []>} : vector<8x32xf32>, vector<32x96xf32>, vector<8x96xf32> -> vector<8x96xf32>
    %c1_78 = arith.constant 1 : index
    %c0_79 = arith.constant 0 : index
    %c0_80 = arith.constant 0 : index
    %166 = vector.load %arg3[%c1_78, %c0_79, %c0_80] : memref<2x1x96xf32, #tpu.memory_space<vmem>>, vector<1x1x96xf32>
    %167 = vector.shape_cast %166 : vector<1x1x96xf32> to vector<1x96xf32>
    %168 = vector.broadcast %167 : vector<1x96xf32> to vector<8x96xf32>
    %169 = arith.addf %165, %168 : vector<8x96xf32>
    %170 = vector.extract_strided_slice %169 {offsets = [0, 32], sizes = [8, 32], strides = [1, 1]} : vector<8x96xf32> to vector<8x32xf32>
    %171 = tpu.transpose %170, [1, 0] : vector<8x32xf32> -> vector<32x8xf32>
    %c1_81 = arith.constant 1 : index
    %c0_82 = arith.constant 0 : index
    %c0_83 = arith.constant 0 : index
    %172 = vector.load %arg4[%c1_81, %c0_82, %c0_83] : memref<2x32x32xf32, #tpu.memory_space<vmem>>, vector<1x32x32xf32>
    %173 = vector.shape_cast %172 : vector<1x32x32xf32> to vector<32x32xf32>
    %c1_84 = arith.constant 1 : index
    %c0_85 = arith.constant 0 : index
    %c0_86 = arith.constant 0 : index
    %174 = vector.load %arg5[%c1_84, %c0_85, %c0_86] : memref<2x1x32xf32, #tpu.memory_space<vmem>>, vector<1x1x32xf32>
    %175 = vector.shape_cast %174 : vector<1x1x32xf32> to vector<1x32xf32>
    %176 = vector.shape_cast %175 : vector<1x32xf32> to vector<1x32xf32>
    %177 = vector.broadcast %176 : vector<1x32xf32> to vector<8x32xf32>
    %178 = vector.extract_strided_slice %169 {offsets = [0, 0], sizes = [8, 8], strides = [1, 1]} : vector<8x96xf32> to vector<8x8xf32>
    %179 = vector.extract_strided_slice %171 {offsets = [0, 0], sizes = [8, 8], strides = [1, 1]} : vector<32x8xf32> to vector<8x8xf32>
    %180 = vector.extract_strided_slice %169 {offsets = [0, 64], sizes = [8, 8], strides = [1, 1]} : vector<8x96xf32> to vector<8x8xf32>
    %cst_87 = arith.constant dense<0.000000e+00> : vector<8x8xf32>
    %181 = tpu.matmul %178, %179, %cst_87 {dimension_numbers = #tpu.dot_dimension_numbers<[1], [0], [0], [1], [0, 0, 1, 1], [], []>} : vector<8x8xf32>, vector<8x8xf32>, vector<8x8xf32> -> vector<8x8xf32>
    %cst_88 = arith.constant dense<0xFF800000> : vector<8xf32>
    %182 = vector.multi_reduction <maximumf>, %181, %cst_88 [1] : vector<8x8xf32> to vector<8xf32>
    %183 = vector.shape_cast %182 : vector<8xf32> to vector<8x1xf32>
    %184 = vector.broadcast %183 : vector<8x1xf32> to vector<8x8xf32>
    %185 = arith.subf %181, %184 : vector<8x8xf32>
    %186 = math.exp %185 : vector<8x8xf32>
    %cst_89 = arith.constant dense<0.000000e+00> : vector<8xf32>
    %187 = vector.multi_reduction <add>, %186, %cst_89 [1] : vector<8x8xf32> to vector<8xf32>
    %188 = vector.shape_cast %187 : vector<8xf32> to vector<8x1xf32>
    %189 = tpu.reciprocal %188 {approx = true} : vector<8x1xf32> -> vector<8x1xf32>
    %190 = vector.broadcast %189 : vector<8x1xf32> to vector<8x8xf32>
    %191 = arith.mulf %186, %190 : vector<8x8xf32>
    %cst_90 = arith.constant dense<0.000000e+00> : vector<8x8xf32>
    %192 = tpu.matmul %191, %180, %cst_90 {dimension_numbers = #tpu.dot_dimension_numbers<[1], [0], [0], [1], [0, 0, 1, 1], [], []>} : vector<8x8xf32>, vector<8x8xf32>, vector<8x8xf32> -> vector<8x8xf32>
    %193 = vector.extract_strided_slice %173 {offsets = [0, 0], sizes = [8, 32], strides = [1, 1]} : vector<32x32xf32> to vector<8x32xf32>
    %cst_91 = arith.constant dense<0.000000e+00> : vector<8x32xf32>
    %194 = tpu.matmul %192, %193, %cst_91 {dimension_numbers = #tpu.dot_dimension_numbers<[1], [0], [0], [1], [0, 0, 1, 1], [], []>} : vector<8x8xf32>, vector<8x32xf32>, vector<8x32xf32> -> vector<8x32xf32>
    %195 = arith.addf %177, %194 : vector<8x32xf32>
    %196 = vector.extract_strided_slice %169 {offsets = [0, 8], sizes = [8, 8], strides = [1, 1]} : vector<8x96xf32> to vector<8x8xf32>
    %197 = vector.extract_strided_slice %171 {offsets = [8, 0], sizes = [8, 8], strides = [1, 1]} : vector<32x8xf32> to vector<8x8xf32>
    %198 = vector.extract_strided_slice %169 {offsets = [0, 72], sizes = [8, 8], strides = [1, 1]} : vector<8x96xf32> to vector<8x8xf32>
    %cst_92 = arith.constant dense<0.000000e+00> : vector<8x8xf32>
    %199 = tpu.matmul %196, %197, %cst_92 {dimension_numbers = #tpu.dot_dimension_numbers<[1], [0], [0], [1], [0, 0, 1, 1], [], []>} : vector<8x8xf32>, vector<8x8xf32>, vector<8x8xf32> -> vector<8x8xf32>
    %cst_93 = arith.constant dense<0xFF800000> : vector<8xf32>
    %200 = vector.multi_reduction <maximumf>, %199, %cst_93 [1] : vector<8x8xf32> to vector<8xf32>
    %201 = vector.shape_cast %200 : vector<8xf32> to vector<8x1xf32>
    %202 = vector.broadcast %201 : vector<8x1xf32> to vector<8x8xf32>
    %203 = arith.subf %199, %202 : vector<8x8xf32>
    %204 = math.exp %203 : vector<8x8xf32>
    %cst_94 = arith.constant dense<0.000000e+00> : vector<8xf32>
    %205 = vector.multi_reduction <add>, %204, %cst_94 [1] : vector<8x8xf32> to vector<8xf32>
    %206 = vector.shape_cast %205 : vector<8xf32> to vector<8x1xf32>
    %207 = tpu.reciprocal %206 {approx = true} : vector<8x1xf32> -> vector<8x1xf32>
    %208 = vector.broadcast %207 : vector<8x1xf32> to vector<8x8xf32>
    %209 = arith.mulf %204, %208 : vector<8x8xf32>
    %cst_95 = arith.constant dense<0.000000e+00> : vector<8x8xf32>
    %210 = tpu.matmul %209, %198, %cst_95 {dimension_numbers = #tpu.dot_dimension_numbers<[1], [0], [0], [1], [0, 0, 1, 1], [], []>} : vector<8x8xf32>, vector<8x8xf32>, vector<8x8xf32> -> vector<8x8xf32>
    %211 = vector.extract_strided_slice %173 {offsets = [8, 0], sizes = [8, 32], strides = [1, 1]} : vector<32x32xf32> to vector<8x32xf32>
    %cst_96 = arith.constant dense<0.000000e+00> : vector<8x32xf32>
    %212 = tpu.matmul %210, %211, %cst_96 {dimension_numbers = #tpu.dot_dimension_numbers<[1], [0], [0], [1], [0, 0, 1, 1], [], []>} : vector<8x8xf32>, vector<8x32xf32>, vector<8x32xf32> -> vector<8x32xf32>
    %213 = arith.addf %195, %212 : vector<8x32xf32>
    %214 = vector.extract_strided_slice %169 {offsets = [0, 16], sizes = [8, 8], strides = [1, 1]} : vector<8x96xf32> to vector<8x8xf32>
    %215 = vector.extract_strided_slice %171 {offsets = [16, 0], sizes = [8, 8], strides = [1, 1]} : vector<32x8xf32> to vector<8x8xf32>
    %216 = vector.extract_strided_slice %169 {offsets = [0, 80], sizes = [8, 8], strides = [1, 1]} : vector<8x96xf32> to vector<8x8xf32>
    %cst_97 = arith.constant dense<0.000000e+00> : vector<8x8xf32>
    %217 = tpu.matmul %214, %215, %cst_97 {dimension_numbers = #tpu.dot_dimension_numbers<[1], [0], [0], [1], [0, 0, 1, 1], [], []>} : vector<8x8xf32>, vector<8x8xf32>, vector<8x8xf32> -> vector<8x8xf32>
    %cst_98 = arith.constant dense<0xFF800000> : vector<8xf32>
    %218 = vector.multi_reduction <maximumf>, %217, %cst_98 [1] : vector<8x8xf32> to vector<8xf32>
    %219 = vector.shape_cast %218 : vector<8xf32> to vector<8x1xf32>
    %220 = vector.broadcast %219 : vector<8x1xf32> to vector<8x8xf32>
    %221 = arith.subf %217, %220 : vector<8x8xf32>
    %222 = math.exp %221 : vector<8x8xf32>
    %cst_99 = arith.constant dense<0.000000e+00> : vector<8xf32>
    %223 = vector.multi_reduction <add>, %222, %cst_99 [1] : vector<8x8xf32> to vector<8xf32>
    %224 = vector.shape_cast %223 : vector<8xf32> to vector<8x1xf32>
    %225 = tpu.reciprocal %224 {approx = true} : vector<8x1xf32> -> vector<8x1xf32>
    %226 = vector.broadcast %225 : vector<8x1xf32> to vector<8x8xf32>
    %227 = arith.mulf %222, %226 : vector<8x8xf32>
    %cst_100 = arith.constant dense<0.000000e+00> : vector<8x8xf32>
    %228 = tpu.matmul %227, %216, %cst_100 {dimension_numbers = #tpu.dot_dimension_numbers<[1], [0], [0], [1], [0, 0, 1, 1], [], []>} : vector<8x8xf32>, vector<8x8xf32>, vector<8x8xf32> -> vector<8x8xf32>
    %229 = vector.extract_strided_slice %173 {offsets = [16, 0], sizes = [8, 32], strides = [1, 1]} : vector<32x32xf32> to vector<8x32xf32>
    %cst_101 = arith.constant dense<0.000000e+00> : vector<8x32xf32>
    %230 = tpu.matmul %228, %229, %cst_101 {dimension_numbers = #tpu.dot_dimension_numbers<[1], [0], [0], [1], [0, 0, 1, 1], [], []>} : vector<8x8xf32>, vector<8x32xf32>, vector<8x32xf32> -> vector<8x32xf32>
    %231 = arith.addf %213, %230 : vector<8x32xf32>
    %232 = vector.extract_strided_slice %169 {offsets = [0, 24], sizes = [8, 8], strides = [1, 1]} : vector<8x96xf32> to vector<8x8xf32>
    %233 = vector.extract_strided_slice %171 {offsets = [24, 0], sizes = [8, 8], strides = [1, 1]} : vector<32x8xf32> to vector<8x8xf32>
    %234 = vector.extract_strided_slice %169 {offsets = [0, 88], sizes = [8, 8], strides = [1, 1]} : vector<8x96xf32> to vector<8x8xf32>
    %cst_102 = arith.constant dense<0.000000e+00> : vector<8x8xf32>
    %235 = tpu.matmul %232, %233, %cst_102 {dimension_numbers = #tpu.dot_dimension_numbers<[1], [0], [0], [1], [0, 0, 1, 1], [], []>} : vector<8x8xf32>, vector<8x8xf32>, vector<8x8xf32> -> vector<8x8xf32>
    %cst_103 = arith.constant dense<0xFF800000> : vector<8xf32>
    %236 = vector.multi_reduction <maximumf>, %235, %cst_103 [1] : vector<8x8xf32> to vector<8xf32>
    %237 = vector.shape_cast %236 : vector<8xf32> to vector<8x1xf32>
    %238 = vector.broadcast %237 : vector<8x1xf32> to vector<8x8xf32>
    %239 = arith.subf %235, %238 : vector<8x8xf32>
    %240 = math.exp %239 : vector<8x8xf32>
    %cst_104 = arith.constant dense<0.000000e+00> : vector<8xf32>
    %241 = vector.multi_reduction <add>, %240, %cst_104 [1] : vector<8x8xf32> to vector<8xf32>
    %242 = vector.shape_cast %241 : vector<8xf32> to vector<8x1xf32>
    %243 = tpu.reciprocal %242 {approx = true} : vector<8x1xf32> -> vector<8x1xf32>
    %244 = vector.broadcast %243 : vector<8x1xf32> to vector<8x8xf32>
    %245 = arith.mulf %240, %244 : vector<8x8xf32>
    %cst_105 = arith.constant dense<0.000000e+00> : vector<8x8xf32>
    %246 = tpu.matmul %245, %234, %cst_105 {dimension_numbers = #tpu.dot_dimension_numbers<[1], [0], [0], [1], [0, 0, 1, 1], [], []>} : vector<8x8xf32>, vector<8x8xf32>, vector<8x8xf32> -> vector<8x8xf32>
    %247 = vector.extract_strided_slice %173 {offsets = [24, 0], sizes = [8, 32], strides = [1, 1]} : vector<32x32xf32> to vector<8x32xf32>
    %cst_106 = arith.constant dense<0.000000e+00> : vector<8x32xf32>
    %248 = tpu.matmul %246, %247, %cst_106 {dimension_numbers = #tpu.dot_dimension_numbers<[1], [0], [0], [1], [0, 0, 1, 1], [], []>} : vector<8x8xf32>, vector<8x32xf32>, vector<8x32xf32> -> vector<8x32xf32>
    %249 = arith.addf %231, %248 : vector<8x32xf32>
    %250 = arith.addf %162, %249 : vector<8x32xf32>
    %cst_107 = arith.constant dense<0.000000e+00> : vector<8xf32>
    %251 = vector.multi_reduction <add>, %250, %cst_107 [1] : vector<8x32xf32> to vector<8xf32>
    %252 = vector.shape_cast %251 : vector<8xf32> to vector<8x1xf32>
    %cst_108 = arith.constant 3.200000e+01 : f32
    %253 = vector.broadcast %cst_108 : f32 to vector<8x1xf32>
    %254 = arith.divf %252, %253 : vector<8x1xf32>
    %255 = vector.broadcast %254 : vector<8x1xf32> to vector<8x32xf32>
    %256 = arith.subf %250, %255 : vector<8x32xf32>
    %257 = arith.mulf %256, %256 : vector<8x32xf32>
    %cst_109 = arith.constant dense<0.000000e+00> : vector<8xf32>
    %258 = vector.multi_reduction <add>, %257, %cst_109 [1] : vector<8x32xf32> to vector<8xf32>
    %259 = vector.shape_cast %258 : vector<8xf32> to vector<8x1xf32>
    %cst_110 = arith.constant 3.200000e+01 : f32
    %260 = vector.broadcast %cst_110 : f32 to vector<8x1xf32>
    %261 = arith.divf %259, %260 : vector<8x1xf32>
    %262 = vector.broadcast %254 : vector<8x1xf32> to vector<8x32xf32>
    %263 = arith.subf %250, %262 : vector<8x32xf32>
    %cst_111 = arith.constant 9.99999974E-6 : f32
    %264 = vector.broadcast %cst_111 : f32 to vector<8x1xf32>
    %265 = arith.addf %261, %264 : vector<8x1xf32>
    %266 = math.rsqrt %265 : vector<8x1xf32>
    %267 = vector.broadcast %266 : vector<8x1xf32> to vector<8x32xf32>
    %268 = arith.mulf %263, %267 : vector<8x32xf32>
    %c1_112 = arith.constant 1 : index
    %c0_113 = arith.constant 0 : index
    %c0_114 = arith.constant 0 : index
    %269 = vector.load %arg6[%c1_112, %c0_113, %c0_114] : memref<2x1x32xf32, #tpu.memory_space<vmem>>, vector<1x1x32xf32>
    %270 = vector.shape_cast %269 : vector<1x1x32xf32> to vector<1x32xf32>
    %271 = vector.broadcast %270 : vector<1x32xf32> to vector<8x32xf32>
    %272 = arith.mulf %268, %271 : vector<8x32xf32>
    %c1_115 = arith.constant 1 : index
    %c0_116 = arith.constant 0 : index
    %c0_117 = arith.constant 0 : index
    %273 = vector.load %arg7[%c1_115, %c0_116, %c0_117] : memref<2x1x32xf32, #tpu.memory_space<vmem>>, vector<1x1x32xf32>
    %274 = vector.shape_cast %273 : vector<1x1x32xf32> to vector<1x32xf32>
    %275 = vector.broadcast %274 : vector<1x32xf32> to vector<8x32xf32>
    %276 = arith.addf %272, %275 : vector<8x32xf32>
    %c1_118 = arith.constant 1 : index
    %c0_119 = arith.constant 0 : index
    %c0_120 = arith.constant 0 : index
    %277 = vector.load %arg8[%c1_118, %c0_119, %c0_120] : memref<2x32x2048xf32, #tpu.memory_space<vmem>>, vector<1x32x2048xf32>
    %278 = vector.shape_cast %277 : vector<1x32x2048xf32> to vector<32x2048xf32>
    %cst_121 = arith.constant dense<0.000000e+00> : vector<8x2048xf32>
    %279 = tpu.matmul %276, %278, %cst_121 {dimension_numbers = #tpu.dot_dimension_numbers<[1], [0], [0], [1], [0, 0, 1, 1], [], []>} : vector<8x32xf32>, vector<32x2048xf32>, vector<8x2048xf32> -> vector<8x2048xf32>
    %c1_122 = arith.constant 1 : index
    %c0_123 = arith.constant 0 : index
    %c0_124 = arith.constant 0 : index
    %280 = vector.load %arg9[%c1_122, %c0_123, %c0_124] : memref<2x1x2048xf32, #tpu.memory_space<vmem>>, vector<1x1x2048xf32>
    %281 = vector.shape_cast %280 : vector<1x1x2048xf32> to vector<1x2048xf32>
    %282 = vector.broadcast %281 : vector<1x2048xf32> to vector<8x2048xf32>
    %283 = arith.addf %279, %282 : vector<8x2048xf32>
    %cst_125 = arith.constant 0.000000e+00 : f32
    %284 = vector.broadcast %cst_125 : f32 to vector<8x2048xf32>
    %285 = arith.maximumf %283, %284 : vector<8x2048xf32>
    %c1_126 = arith.constant 1 : index
    %c0_127 = arith.constant 0 : index
    %c0_128 = arith.constant 0 : index
    %286 = vector.load %arg10[%c1_126, %c0_127, %c0_128] : memref<2x2048x32xf32, #tpu.memory_space<vmem>>, vector<1x2048x32xf32>
    %287 = vector.shape_cast %286 : vector<1x2048x32xf32> to vector<2048x32xf32>
    %cst_129 = arith.constant dense<0.000000e+00> : vector<8x32xf32>
    %288 = tpu.matmul %285, %287, %cst_129 {dimension_numbers = #tpu.dot_dimension_numbers<[1], [0], [0], [1], [0, 0, 1, 1], [], []>} : vector<8x2048xf32>, vector<2048x32xf32>, vector<8x32xf32> -> vector<8x32xf32>
    %c1_130 = arith.constant 1 : index
    %c0_131 = arith.constant 0 : index
    %c0_132 = arith.constant 0 : index
    %289 = vector.load %arg11[%c1_130, %c0_131, %c0_132] : memref<2x1x32xf32, #tpu.memory_space<vmem>>, vector<1x1x32xf32>
    %290 = vector.shape_cast %289 : vector<1x1x32xf32> to vector<1x32xf32>
    %291 = vector.broadcast %290 : vector<1x32xf32> to vector<8x32xf32>
    %292 = arith.addf %288, %291 : vector<8x32xf32>
    %293 = arith.addf %276, %292 : vector<8x32xf32>
    %cst_133 = arith.constant dense<0.000000e+00> : vector<8xf32>
    %294 = vector.multi_reduction <add>, %293, %cst_133 [1] : vector<8x32xf32> to vector<8xf32>
    %295 = vector.shape_cast %294 : vector<8xf32> to vector<8x1xf32>
    %cst_134 = arith.constant 3.200000e+01 : f32
    %296 = vector.broadcast %cst_134 : f32 to vector<8x1xf32>
    %297 = arith.divf %295, %296 : vector<8x1xf32>
    %298 = vector.broadcast %297 : vector<8x1xf32> to vector<8x32xf32>
    %299 = arith.subf %293, %298 : vector<8x32xf32>
    %300 = arith.mulf %299, %299 : vector<8x32xf32>
    %cst_135 = arith.constant dense<0.000000e+00> : vector<8xf32>
    %301 = vector.multi_reduction <add>, %300, %cst_135 [1] : vector<8x32xf32> to vector<8xf32>
    %302 = vector.shape_cast %301 : vector<8xf32> to vector<8x1xf32>
    %cst_136 = arith.constant 3.200000e+01 : f32
    %303 = vector.broadcast %cst_136 : f32 to vector<8x1xf32>
    %304 = arith.divf %302, %303 : vector<8x1xf32>
    %305 = vector.broadcast %297 : vector<8x1xf32> to vector<8x32xf32>
    %306 = arith.subf %293, %305 : vector<8x32xf32>
    %cst_137 = arith.constant 9.99999974E-6 : f32
    %307 = vector.broadcast %cst_137 : f32 to vector<8x1xf32>
    %308 = arith.addf %304, %307 : vector<8x1xf32>
    %309 = math.rsqrt %308 : vector<8x1xf32>
    %310 = vector.broadcast %309 : vector<8x1xf32> to vector<8x32xf32>
    %311 = arith.mulf %306, %310 : vector<8x32xf32>
    %c1_138 = arith.constant 1 : index
    %c0_139 = arith.constant 0 : index
    %c0_140 = arith.constant 0 : index
    %312 = vector.load %arg12[%c1_138, %c0_139, %c0_140] : memref<2x1x32xf32, #tpu.memory_space<vmem>>, vector<1x1x32xf32>
    %313 = vector.shape_cast %312 : vector<1x1x32xf32> to vector<1x32xf32>
    %314 = vector.broadcast %313 : vector<1x32xf32> to vector<8x32xf32>
    %315 = arith.mulf %311, %314 : vector<8x32xf32>
    %c1_141 = arith.constant 1 : index
    %c0_142 = arith.constant 0 : index
    %c0_143 = arith.constant 0 : index
    %316 = vector.load %arg13[%c1_141, %c0_142, %c0_143] : memref<2x1x32xf32, #tpu.memory_space<vmem>>, vector<1x1x32xf32>
    %317 = vector.shape_cast %316 : vector<1x1x32xf32> to vector<1x32xf32>
    %318 = vector.broadcast %317 : vector<1x32xf32> to vector<8x32xf32>
    %319 = arith.addf %315, %318 : vector<8x32xf32>
    %c0_144 = arith.constant 0 : index
    %c0_145 = arith.constant 0 : index
    %320 = vector.load %arg14[%c0_144, %c0_145] : memref<32x128xf32, #tpu.memory_space<vmem>>, vector<32x128xf32>
    %cst_146 = arith.constant dense<0.000000e+00> : vector<8x128xf32>
    %321 = tpu.matmul %319, %320, %cst_146 {dimension_numbers = #tpu.dot_dimension_numbers<[1], [0], [0], [1], [0, 0, 1, 1], [], []>} : vector<8x32xf32>, vector<32x128xf32>, vector<8x128xf32> -> vector<8x128xf32>
    %c0_147 = arith.constant 0 : index
    %c0_148 = arith.constant 0 : index
    %322 = vector.load %arg15[%c0_147, %c0_148] : memref<1x128xf32, #tpu.memory_space<vmem>>, vector<1x128xf32>
    %323 = vector.broadcast %322 : vector<1x128xf32> to vector<8x128xf32>
    %324 = arith.addf %321, %323 : vector<8x128xf32>
    %c0_149 = arith.constant 0 : index
    %c0_150 = arith.constant 0 : index
    %325 = vector.load %arg16[%c0_149, %c0_150] : memref<8x128xf32, #tpu.memory_space<vmem>>, vector<8x128xf32>
    tpu.vector_store %arg16[%c0_149, %c0_150], %324 {strides = array<i32>} : memref<8x128xf32, #tpu.memory_space<vmem>>, vector<8x128xf32>,
    return
  }
}

</mosaic_0001>

<bundles_post_ra>
// kernel: transformer_net_v2_forward.1
= control target key start
LH: loop header
LB: loop body
LE: loop exit
PB: predicated region body
PF: predicated region fallthrough
CT: control target
= control target key end

     0   :  { %s10114_s0 = inlined_call_operand.vmem [shape: f32[8,16], index: 0, kind: input, shape index: {}]   ;;  %s10115_s1 = inlined_call_operand.vmem [shape: f32[8,5,16], index: 1, kind: input, shape index: {}]   ;;  %s10116_s2 = inlined_call_operand.vmem [shape: f32[2,32,96], index: 2, kind: input, shape index: {}]   ;;  %s10117_s3 = inlined_call_operand.vmem [shape: f32[2,1,96], index: 3, kind: input, shape index: {}]   ;;  %s10118_s4 = inlined_call_operand.vmem [shape: f32[2,32,32], index: 4, kind: input, shape index: {}]   ;;  %s10119_s5 = inlined_call_operand.vmem [shape: f32[2,1,32], index: 5, kind: input, shape index: {}]   ;;  %s10120_s6 = inlined_call_operand.vmem [shape: f32[2,1,32], index: 6, kind: input, shape index: {}]   ;;  %s10121_s7 = inlined_call_operand.vmem [shape: f32[2,1,32], index: 7, kind: input, shape index: {}]   ;;  %s10122_s8 = inlined_call_operand.vmem [shape: f32[2,32,2048], index: 8, kind: input, shape index: {}]   ;;  %s10123_s9 = inlined_call_operand.vmem [shape: f32[2,1,2048], index: 9, kind: input, shape index: {}]   ;;  %s10124_s10 = inlined_call_operand.vmem [shape: f32[2,2048,32], index: 10, kind: input, shape index: {}]   ;;  %s10125_s11 = inlined_call_operand.vmem [shape: f32[2,1,32], index: 11, kind: input, shape index: {}]   ;;  %s10126_s12 = inlined_call_operand.vmem [shape: f32[2,1,32], index: 12, kind: input, shape index: {}]   ;;  %s10127_s13 = inlined_call_operand.vmem [shape: f32[2,1,32], index: 13, kind: input, shape index: {}]   ;;  %s10128_s14 = inlined_call_operand.vmem [shape: f32[32,128], index: 14, kind: input, shape index: {}]   ;;  %s10129_s15 = inlined_call_operand.vmem [shape: f32[1,128], index: 15, kind: input, shape index: {}]   ;;  %s10130_s16 = inlined_call_operand.hbm [shape: f32[8,128], index: 16, kind: output, shape index: {}]  }
   0x1   :  { %10138 = sst [smem:[#allocation5_spill]] %s10114_s0 }
   0x2   :  { %v55_v0 = vld [vmem:[%s10115_s1] sm:$0x1f]  ;;  %v56_v1 = vld [vmem:[%s10115_s1 + $0x8] sm:$0x1f]  ;;  %v57_v2 = vld [vmem:[%s10115_s1 + $0x10] sm:$0x1f] }
   0x3   :  { %v58_v3 = vld [vmem:[%s10115_s1 + $0x18] sm:$0x1f]  ;;  %v59_v4 = vld [vmem:[%s10115_s1 + $0x20] sm:$0x1f]  ;;  %v60_v5 = vld [vmem:[%s10115_s1 + $0x28] sm:$0x1f] }
   0x4   :  { %v61_v6 = vld [vmem:[%s10115_s1 + $0x30] sm:$0x1f]  ;;  %v62_v7 = vld [vmem:[%s10115_s1 + $0x38] sm:$0x1f]  ;;  %vm63_vm0 = vcmask 126976  }
   0x5   :  { %v64_v8 = vsel %vm63_vm0, %v55_v0, 0.0  ;;  %v71_v9 = vsel %vm63_vm0, %v56_v1, 0.0  ;;  %v78_v10 = vsel %vm63_vm0, %v57_v2, 0.0  ;;  %v85_v11 = vsel %vm63_vm0, %v58_v3, 0.0 }
   0x6   :  { %v65_v12 = vrot.slane %v64_v8, 4  ;;  %v72_v13 = vrot.slane %v71_v9, 4  ;;  %v79_v14 = vrot.slane %v78_v10, 4  ;;  %v86_v15 = vrot.slane %v85_v11, 4 }
   0x7   :  { %v92_v16 = vsel %vm63_vm0, %v59_v4, 0.0  ;;  %v99_v17 = vsel %vm63_vm0, %v60_v5, 0.0  ;;  %v106_v18 = vsel %vm63_vm0, %v61_v6, 0.0  ;;  %v113_v19 = vsel %vm63_vm0, %v62_v7, 0.0 }
   0x8   :  { %v66_v20 = vadd.f32 %v65_v12, %v64_v8  ;;  %v73_v21 = vadd.f32 %v72_v13, %v71_v9  ;;  %v80_v22 = vadd.f32 %v79_v14, %v78_v10  ;;  %v87_v23 = vadd.f32 %v86_v15, %v85_v11 }
   0x9   :  { %21 = vsyncpa [#allocation3], 0  ;;  %v93_v24 = vrot.slane %v92_v16, 4  ;;  %v100_v25 = vrot.slane %v99_v17, 4  ;;  %v107_v26 = vrot.slane %v106_v18, 4  ;;  %v114_v27 = vrot.slane %v113_v19, 4 }
   0xa   :  { %vm137_vm1 = vcmask 1041409   ;;  %v67_v28 = vrot.slane %v66_v20, 2  ;;  %v74_v29 = vrot.slane %v73_v21, 2  ;;  %v81_v30 = vrot.slane %v80_v22, 2  ;;  %v156_v52 = vld [vmem:[%s10116_s2] sm:$0xff]  ;;  %v157_v53 = vld [vmem:[%s10116_s2 + $0x8] sm:$0xff] }
   0xb   :  { %v88_v31 = vrot.slane %v87_v23, 2  ;;  %v94_v32 = vadd.f32 %v93_v24, %v92_v16  ;;  %v101_v33 = vadd.f32 %v100_v25, %v99_v17  ;;  %v108_v34 = vadd.f32 %v107_v26, %v106_v18  ;;  %v158_v14 = vld [vmem:[%s10116_s2 + $0x10] sm:$0xff]  ;;  %v159_v15 = vld [vmem:[%s10116_s2 + $0x18] sm:$0xff]  ;;  %s7526_s29 = smov 16   ;;  %s10139_s17 = sld [smem:[#allocation5_spill]] }
   0xc   :  { %v115_v35 = vadd.f32 %v114_v27, %v113_v19  ;;  %v68_v36 = vadd.f32 %v67_v28, %v66_v20  ;;  %v75_v37 = vadd.f32 %v74_v29, %v73_v21  ;;  %v82_v38 = vadd.f32 %v81_v30, %v80_v22  ;;  %v5606_v26 = vld [vmem:[%s10117_s3] ss:$0 sm:$0xff]  ;;  %s7527_s20 = smov 96   ;;  %s7528_s21 = smov 64  }
   0xd   :  { %v89_v39 = vadd.f32 %v88_v31, %v87_v23  ;;  %v95_v40 = vrot.slane %v94_v32, 2  ;;  %v102_v41 = vrot.slane %v101_v33, 2  ;;  %v109_v42 = vrot.slane %v108_v34, 2  ;;  %s7529_s1 = smov 120   ;;  %s7530_s22 = smov 88  }
   0xe   :  { %v116_v43 = vrot.slane %v115_v35, 2  ;;  %v69_v44 = vrot.slane %v68_v36, 1  ;;  %v76_v45 = vrot.slane %v75_v37, 1  ;;  %v83_v46 = vrot.slane %v82_v38, 1  ;;  %s10137_s25 = smov 56   ;;  %s10135_s26 = smov 112  }
   0xf   :  { %v90_v47 = vrot.slane %v89_v39, 1  ;;  %v96_v48 = vadd.f32 %v95_v40, %v94_v32  ;;  %v103_v49 = vadd.f32 %v102_v41, %v101_v33  ;;  %v110_v50 = vadd.f32 %v109_v42, %v108_v34  ;;  %s10136_s27 = smov 80   ;;  %s10134_s30 = smov 48  }
  0x10   :  { %v117_v51 = vadd.f32 %v116_v43, %v115_v35  ;;  %v70_v54 = vadd.f32 %v69_v44, %v68_v36  ;;  %v77_v55 = vadd.f32 %v76_v45, %v75_v37  ;;  %v84_v56 = vadd.f32 %v83_v46, %v82_v38  ;;  %v241_v43 = vld [vmem:[%s10118_s4] sm:$0xff]  ;;  %s10132_s0 = smov 104   ;;  %s10131_s28 = smov 40  }
  0x11   :  { %v91_v57 = vadd.f32 %v90_v47, %v89_v39  ;;  %v97_v58 = vrot.slane %v96_v48, 1  ;;  %v104_v59 = vrot.slane %v103_v49, 1  ;;  %v111_v60 = vrot.slane %v110_v50, 1  ;;  %v54_v23 = vld [vmem:[%s10139_s17] sm:$0xff]  ;;  %s10133_s17 = smov 72   ;;  %s10145_s18 = smov 104  }
  0x12   :  { %v118_v61 = vrot.slane %v117_v51, 1  ;;  %v121_v62 = vmul.f32 0.2, %v70_v54  ;;  %v122_v63 = vmul.f32 0.2, %v77_v55  ;;  %v6786_v1 = vpack.c.bf16 %v157_v53, %v156_v52 }
  0x13   :  { %v123_v0 = vmul.f32 0.2, %v84_v56  ;;  %v98_v2 = vadd.f32 %v97_v58, %v96_v48  ;;  %v105_v3 = vadd.f32 %v104_v59, %v103_v49  ;;  %v112_v4 = vadd.f32 %v111_v60, %v110_v50 }
  0x14   :  { %v119_v5 = vadd.f32 %v118_v61, %v117_v51  ;;  %v124_v6 = vmul.f32 0.2, %v91_v57  ;;  %v138_v7 = vsel %vm137_vm1, %v122_v63, %v121_v62  ;;  %vm139_vm2 = vcmask 1042434  }
  0x15   :  { %vm141_vm3 = vcmask 1043459   ;;  %v125_v8 = vmul.f32 0.2, %v98_v2  ;;  %v126_v9 = vmul.f32 0.2, %v105_v3  ;;  %v140_v11 = vsel %vm139_vm2, %v123_v0, %v138_v7  ;;  %v242_v0 = vld [vmem:[%s10118_s4 + $0x8] sm:$0xff] }
  0x16   :  { %v127_v10 = vmul.f32 0.2, %v112_v4  ;;  %v128_v12 = vmul.f32 0.2, %v119_v5  ;;  %v142_v13 = vsel %vm141_vm3, %v124_v6, %v140_v11  ;;  %vm143_vm4 = vcmask 1044484  }
  0x17   :  { %vm145_vm5 = vcmask 1045509   ;;  %v144_v16 = vsel %vm143_vm4, %v125_v8, %v142_v13  ;;  %vm147_vm6 = vcmask 1046534   ;;  %vm149_vm7 = vcmask 1047559  }
  0x18   :  { %v146_v17 = vsel %vm145_vm5, %v126_v9, %v144_v16  ;;  %v7523_v18 = vmov 0.0|0.0   ;;  %v6789_v20 = vpack.c.bf16 %v159_v15, %v158_v14  ;;  %vm7524_vm8 = vmmov 0  }
  0x19   :  { %6785 = vmatprep.subr.bf16.mxu0 %v7523_v18  ;;  %v148_v19 = vsel %vm147_vm6, %v127_v10, %v146_v17  ;;  %v7525_v22 = vmov 0.0   ;;  %vm154_vm9 = vcmask 130048   ;;  %vm167_vm10 = vcmask 261120  }
  0x1a   :  { %6787 = vmatpush3.bf16.msra.mxu0 %v6786_v1  ;;  %v150_v21 = vsel %vm149_vm7, %v128_v12, %v148_v19  ;;  %6640 = vmatprep.mubr.msk.f32.mxu0 %vm7524_vm8, %v7525_v22  ;;  %vm255_vm11 = vcmask 64512   ;;  %v5608_v12 = vld [vmem:[%s10119_s5] ss:$0 sm:$0xff] }
  0x1b   :  { %6788 = vmatprep.subr.bf16.mxu0 %v7523_v18  ;;  %151 = vrot.lane.b32.xlu0 %v150_v21, %s7526_s29 }
  0x1c   :  { %6643 = vmatprep.subr.mxu1 %v7525_v22  ;;  %6645 = vmatprep.mubr.msk.f32.mxu1 %vm7524_vm8, %v7525_v22 }
  0x1e   :  { %6790 = vmatpush3.bf16.msra.mxu0 %v6789_v20 }
  0x1f   :  { %6663 = vmatprep.subr.mxu0 %v7525_v22 }
  0x8d   :  { %v152_v24 = vpop.permute.xlu0 %151 }
  0x8e   :  { %v7672_v25 = vsel %vm154_vm9, %v54_v23, %v152_v24  ;;  %v243_v24 = vld [vmem:[%s10118_s4 + $0x10] sm:$0xff] }
  0x8f   :  { %6641 = vmatmul.mubr.msk.f32.vlgmr.msra.gmra.mrb[0].mxu0 %vm167_vm10, %v7672_v25 }
  0x90   :  { %6665 = vmatprep.mubr.msk.f32.mxu0 %vm7524_vm8, %v7525_v22 }
 0x162   :  { %v237_v27 = vpop.f32.mrb[0].mxu0 }
 0x163   :  { %v7681_v28 = vadd.f32 %v5606_v26, %v237_v27  ;;  %v6642_v29 = vpop.f32.mrb[1].mxu0 }
 0x165   :  { %253 = vrot.lane.b32.xlu0 %v7681_v28, %s7527_s20 }
 0x169   :  { %341 = vrot.lane.b32.xlu0 %v7681_v28, %s7528_s21 }
 0x16d   :  { %491 = vrot.lane.b32.xlu0 %v7681_v28, %s7529_s1 }
 0x1d7   :  { %v254_v30 = vpop.permute.xlu0 %253 }
 0x1d8   :  { %6644 = vmatpush3.xpose.msk.msra.mxu1 %vm255_vm11, %v254_v30 }
 0x1d9   :  { %6648 = vmatprep.subr.mxu1 %v7525_v22 }
 0x1db   :  { %6646 = vmatmul.mubr.msk.f32.vlgmr.msra.gmra.mrb[0].mxu1 %vm255_vm11, %v7681_v28  ;;  %v342_v31 = vpop.permute.xlu0 %341 }
 0x1dc   :  { %6649 = vmatpush3.msra.mxu1 %v342_v31  ;;  %6650 = vmatprep.mubr.msk.f32.mxu1 %vm7524_vm8, %v7525_v22 }
 0x1dd   :  { %6653 = vmatprep.subr.mxu1 %v7525_v22 }
 0x1df   :  { %v492_v47 = vpop.permute.xlu0 %491 }
 0x2ae   :  { %v326_v32 = vpop.f32.mrb[0].mxu1 }
 0x2af   :  { %v6647_v33 = vpop.f32.mrb[1].mxu1  ;;  %v330_v34 = vsel %vm255_vm11, %v326_v32, -inf }
 0x2b0   :  { %331 = vmax.xlane.f32.xlu1 %v330_v34 }
 0x33d   :  { %v332_v35 = vpop.xlane.xlu1 %331 }
 0x33e   :  { %v333_v36 = vsub.f32 %v326_v32, %v332_v35 }
 0x340   :  { %v334_v37 = vmul.f32 1.442695, %v333_v36 }
 0x342   :  { %7459 = vpow2.f32 %v334_v37 }
 0x34c   :  { %v7460_v38 = vpop.eup %7459 }
 0x34d   :  { %v336_v39 = vsel %vm255_vm11, %v7460_v38, 0.0 }
 0x34e   :  { %337 = vadd.xlane.f32.xlu1 %v336_v39 }
 0x35f   :  { %493 = vrot.lane.b32.xlu1 %v7681_v28, %s7530_s22 }
 0x3db   :  { %v338_v40 = vpop.xlane.xlu1 %337 }
 0x3dc   :  { %7461 = vrcp.f32 %v338_v40 }
 0x3df   :  { %v494_v45 = vpop.permute.xlu1 %493 }
 0x3e6   :  { %v7462_v41 = vpop.eup %7461 }
 0x3e7   :  { %v340_v42 = vmul.f32 %v7462_v41, %v7460_v38  ;;  %v244_v38 = vld [vmem:[%s10118_s4 + $0x18] sm:$0xff] }
 0x3e9   :  { %6651 = vmatmul.mubr.msk.f32.vlgmr.msra.gmra.mrb[2].mxu1 %vm255_vm11, %v340_v42 }
 0x3ea   :  { %6654 = vmatpush3.msra.mxu1 %v241_v43  ;;  %6655 = vmatprep.mubr.msk.f32.mxu1 %vm7524_vm8, %v7525_v22 }
 0x3eb   :  { %6658 = vmatprep.subr.mxu1 %v7525_v22 }
 0x4bc   :  { %v413_v44 = vpop.f32.mrb[2].mxu1 }
 0x4bd   :  { %v6652_v46 = vpop.f32.mrb[3].mxu1  ;;  %6656 = vmatmul.mubr.msk.f32.vlgmr.msra.gmra.mrb[4].mxu1 %vm255_vm11, %v413_v44 }
 0x4be   :  { %6659 = vmatpush3.xpose.msk.msra.mxu1 %vm255_vm11, %v494_v45  ;;  %6660 = vmatprep.mubr.msk.f32.mxu1 %vm7524_vm8, %v7525_v22 }
 0x4bf   :  { %6668 = vmatprep.subr.mxu1 %v7525_v22 }
 0x4c1   :  { %6661 = vmatmul.mubr.msk.f32.vlgmr.msra.gmra.mrb[6].mxu1 %vm255_vm11, %v492_v47 }
 0x4c2   :  { %6670 = vmatprep.mubr.msk.f32.mxu1 %vm7524_vm8, %v7525_v22  ;;  %6669 = vmatpush3.msra.mxu1 %v242_v0  ;;  %v1241_v0 = vld [vmem:[%s10122_s8 + $0x10] sm:$0xff] }
 0x4c3   :  { %6678 = vmatprep.subr.mxu1 %v7525_v22 }
 0x590   :  { %v486_v48 = vpop.f32.mrb[4].mxu1 }
 0x591   :  { %v6657_v49 = vpop.f32.mrb[5].mxu1  ;;  %v490_v13 = vadd.f32 %v5608_v12, %v486_v48  ;;  %v1273_v12 = vld [vmem:[%s10122_s8 + $0x110] sm:$0xff] }
 0x594   :  { %v565_v50 = vpop.f32.mrb[6].mxu1 }
 0x595   :  { %v6662_v51 = vpop.f32.mrb[7].mxu1  ;;  %v569_v52 = vsel %vm255_vm11, %v565_v50, -inf }
 0x596   :  { %570 = vmax.xlane.f32.xlu0 %v569_v52 }
 0x5ac   :  { %580 = vrot.lane.b32.xlu0 %v7681_v28, %s10137_s25  ;;  %s10144_s25 = smov 72  }
 0x5b0   :  { %730 = vrot.lane.b32.xlu0 %v7681_v28, %s10135_s26 }
 0x623   :  { %v571_v53 = vpop.xlane.xlu0 %570 }
 0x624   :  { %v572_v54 = vsub.f32 %v565_v50, %v571_v53 }
 0x626   :  { %v573_v55 = vmul.f32 1.442695, %v572_v54 }
 0x627   :  { %v581_v56 = vpop.permute.xlu0 %580 }
 0x628   :  { %7463 = vpow2.f32 %v573_v55  ;;  %6664 = vmatpush3.msra.mxu0 %v581_v56  ;;  %v1240_v56 = vld [vmem:[%s10122_s8 + $0x8] sm:$0xff] }
 0x629   :  { %6673 = vmatprep.subr.mxu0 %v7525_v22 }
 0x62b   :  { %v731_v63 = vpop.permute.xlu0 %730 }
 0x632   :  { %v7464_v57 = vpop.eup %7463 }
 0x633   :  { %v575_v58 = vsel %vm255_vm11, %v7464_v57, 0.0 }
 0x634   :  { %576 = vadd.xlane.f32.xlu1 %v575_v58 }
 0x645   :  { %732 = vrot.lane.b32.xlu1 %v7681_v28, %s10136_s27 }
 0x6c1   :  { %v577_v59 = vpop.xlane.xlu1 %576 }
 0x6c2   :  { %7465 = vrcp.f32 %v577_v59  ;;  %v1258_v59 = vld [vmem:[%s10122_s8 + $0x98] sm:$0xff] }
 0x6c5   :  { %v733_v62 = vpop.permute.xlu1 %732 }
 0x6cc   :  { %v7466_v60 = vpop.eup %7465 }
 0x6cd   :  { %v579_v61 = vmul.f32 %v7466_v60, %v7464_v57  ;;  %v1256_v57 = vld [vmem:[%s10122_s8 + $0x88] sm:$0xff]  ;;  %v1239_v60 = vld [vmem:[%s10122_s8] sm:$0xff] }
 0x6ce   :  { %v6791_v58 = vpack.c.bf16 %v1256_v57, %v1240_v56  ;;  %v1263_v56 = vld [vmem:[%s10122_s8 + $0xc0] sm:$0xff] }
 0x6cf   :  { %6666 = vmatmul.mubr.msk.f32.vlgmr.msra.gmra.mrb[2].mxu0 %vm255_vm11, %v579_v61  ;;  %v1255_v61 = vld [vmem:[%s10122_s8 + $0x80] sm:$0xff] }
 0x6d0   :  { %6674 = vmatpush3.xpose.msk.msra.mxu0 %vm255_vm11, %v733_v62  ;;  %6675 = vmatprep.mubr.msk.f32.mxu0 %vm7524_vm8, %v7525_v22 }
 0x6d1   :  { %6683 = vmatprep.subr.mxu0 %v7525_v22 }
 0x6d3   :  { %6676 = vmatmul.mubr.msk.f32.vlgmr.msra.gmra.mrb[4].mxu0 %vm255_vm11, %v731_v63  ;;  %v6793_v63 = vpack.c.bf16 %v1255_v61, %v1239_v60  ;;  %v1280_v60 = vld [vmem:[%s10122_s8 + $0x148] sm:$0xff] }
 0x6d4   :  { %6685 = vmatprep.mubr.msk.f32.mxu0 %vm7524_vm8, %v7525_v22  ;;  %6684 = vmatpush3.msra.mxu0 %v243_v24  ;;  %v1296_v61 = vld [vmem:[%s10122_s8 + $0x1c8] sm:$0xff] }
 0x6d5   :  { %6693 = vmatprep.subr.mxu0 %v7525_v22 }
 0x7a2   :  { %v652_v1 = vpop.f32.mrb[2].mxu0 }
 0x7a3   :  { %v6667_v2 = vpop.f32.mrb[3].mxu0  ;;  %6671 = vmatmul.mubr.msk.f32.vlgmr.msra.gmra.mrb[8].mxu1 %vm255_vm11, %v652_v1  ;;  %v1257_v1 = vld [vmem:[%s10122_s8 + $0x90] sm:$0xff] }
 0x7a4   :  { %6680 = vmatprep.mubr.msk.f32.mxu1 %vm7524_vm8, %v7525_v22  ;;  %v6801_v2 = vpack.c.bf16 %v1257_v1, %v1241_v0 }
 0x7a6   :  { %v804_v3 = vpop.f32.mrb[4].mxu0 }
 0x7a7   :  { %v6677_v4 = vpop.f32.mrb[5].mxu0  ;;  %v808_v5 = vsel %vm255_vm11, %v804_v3, -inf }
 0x7a8   :  { %809 = vmax.xlane.f32.xlu0 %v808_v5  ;;  %v1288_v4 = vld [vmem:[%s10122_s8 + $0x188] sm:$0xff]  ;;  %v1274_v5 = vld [vmem:[%s10122_s8 + $0x118] sm:$0xff] }
 0x7be   :  { %819 = vrot.lane.b32.xlu0 %v7681_v28, %s10134_s30 }
 0x7c2   :  { %969 = vrot.lane.b32.xlu0 %v7681_v28, %s10132_s0 }
 0x835   :  { %v810_v6 = vpop.xlane.xlu0 %809 }
 0x836   :  { %v811_v7 = vsub.f32 %v804_v3, %v810_v6  ;;  %v1272_v3 = vld [vmem:[%s10122_s8 + $0x108] sm:$0xff] }
 0x837   :  { %v6795_v6 = vpack.c.bf16 %v1288_v4, %v1272_v3  ;;  %v1295_v3 = vld [vmem:[%s10122_s8 + $0x1c0] sm:$0xff]  ;;  %v6827_v4 = vpack.c.bf16 %v1296_v61, %v1280_v60  ;;  %v1995_v60 = vld [vmem:[%s10124_s10 + $0xa8] sm:$0xff] }
 0x838   :  { %v812_v8 = vmul.f32 1.442695, %v811_v7  ;;  %v1290_v7 = vld [vmem:[%s10122_s8 + $0x198] sm:$0xff]  ;;  %v2026_v61 = vld [vmem:[%s10124_s10 + $0x1a0] sm:$0xff] }
 0x839   :  { %v820_v9 = vpop.permute.xlu0 %819 }
 0x83a   :  { %7467 = vpow2.f32 %v812_v8  ;;  %6679 = vmatpush3.msra.mxu1 %v820_v9  ;;  %v1271_v8 = vld [vmem:[%s10122_s8 + $0x100] sm:$0xff] }
 0x83b   :  { %6688 = vmatprep.subr.mxu1 %v7525_v22  ;;  %v1287_v9 = vld [vmem:[%s10122_s8 + $0x180] sm:$0xff] }
 0x83d   :  { %v970_v23 = vpop.permute.xlu0 %969 }
 0x844   :  { %v7468_v10 = vpop.eup %7467 }
 0x845   :  { %v814_v11 = vsel %vm255_vm11, %v7468_v10, 0.0 }
 0x846   :  { %815 = vadd.xlane.f32.xlu1 %v814_v11  ;;  %v6797_v11 = vpack.c.bf16 %v1287_v9, %v1271_v8  ;;  %v1252_v8 = vld [vmem:[%s10122_s8 + $0x68] sm:$0xff] }
 0x847   :  { %v1268_v9 = vld [vmem:[%s10122_s8 + $0xe8] sm:$0xff] }
 0x857   :  { %971 = vrot.lane.b32.xlu1 %v7681_v28, %s10133_s17  ;;  %s10143_s17 = smov 48  }
 0x876   :  { %v725_v14 = vpop.f32.mrb[8].mxu1 }
 0x877   :  { %v729_v15 = vadd.f32 %v725_v14, %v490_v13  ;;  %v6672_v16 = vpop.f32.mrb[9].mxu1  ;;  %v1289_v13 = vld [vmem:[%s10122_s8 + $0x190] sm:$0xff] }
 0x878   :  { %v6805_v14 = vpack.c.bf16 %v1289_v13, %v1273_v12  ;;  %v1260_v16 = vld [vmem:[%s10122_s8 + $0xa8] sm:$0xff] }
 0x8d3   :  { %v816_v17 = vpop.xlane.xlu1 %815 }
 0x8d4   :  { %7469 = vrcp.f32 %v816_v17  ;;  %v1246_v17 = vld [vmem:[%s10122_s8 + $0x38] sm:$0xff] }
 0x8d7   :  { %v972_v21 = vpop.permute.xlu1 %971 }
 0x8de   :  { %v7470_v19 = vpop.eup %7469 }
 0x8df   :  { %v818_v20 = vmul.f32 %v7470_v19, %v7468_v10  ;;  %v6803_v10 = vpack.c.bf16 %v1290_v7, %v1274_v5  ;;  %v1297_v7 = vld [vmem:[%s10122_s8 + $0x1d0] sm:$0xff] }
 0x8e1   :  { %6681 = vmatmul.mubr.msk.f32.vlgmr.msra.gmra.mrb[10].mxu1 %vm255_vm11, %v818_v20  ;;  %v1262_v20 = vld [vmem:[%s10122_s8 + $0xb8] sm:$0xff] }
 0x8e2   :  { %6689 = vmatpush3.xpose.msk.msra.mxu1 %vm255_vm11, %v972_v21  ;;  %6690 = vmatprep.mubr.msk.f32.mxu1 %vm7524_vm8, %v7525_v22  ;;  %v6815_v21 = vpack.c.bf16 %v1262_v20, %v1246_v17  ;;  %v1269_v20 = vld [vmem:[%s10122_s8 + $0xf0] sm:$0xff] }
 0x8e3   :  { %6698 = vmatprep.subr.mxu1 %v7525_v22 }
 0x8e5   :  { %6691 = vmatmul.mubr.msk.f32.vlgmr.msra.gmra.mrb[12].mxu1 %vm255_vm11, %v970_v23 }
 0x8e6   :  { %6700 = vmatprep.mubr.msk.f32.mxu1 %vm7524_vm8, %v7525_v22  ;;  %6699 = vmatpush3.msra.mxu1 %v244_v38  ;;  %v1278_v38 = vld [vmem:[%s10122_s8 + $0x138] sm:$0xff] }
 0x9b4   :  { %v891_v26 = vpop.f32.mrb[10].mxu1 }
 0x9b5   :  { %v6682_v27 = vpop.f32.mrb[11].mxu1  ;;  %6686 = vmatmul.mubr.msk.f32.vlgmr.msra.gmra.mrb[6].mxu0 %vm255_vm11, %v891_v26 }
 0x9b6   :  { %6695 = vmatprep.mubr.msk.f32.mxu0 %vm7524_vm8, %v7525_v22  ;;  %v5625_v27 = vld [vmem:[%s10120_s6] ss:$0 sm:$0xff] }
 0x9b8   :  { %v1043_v29 = vpop.f32.mrb[12].mxu1 }
 0x9b9   :  { %v6692_v30 = vpop.f32.mrb[13].mxu1  ;;  %v1047_v31 = vsel %vm255_vm11, %v1043_v29, -inf }
 0x9ba   :  { %1048 = vmax.xlane.f32.xlu0 %v1047_v31  ;;  %v5626_v30 = vld [vmem:[%s10121_s7] ss:$0 sm:$0xff] }
 0x9bb   :  { %v1243_v31 = vld [vmem:[%s10122_s8 + $0x20] sm:$0xff] }
 0x9d0   :  { %1058 = vrot.lane.b32.xlu0 %v7681_v28, %s10131_s28  ;;  %s10146_s28 = smov 40  }
 0xa47   :  { %v1049_v32 = vpop.xlane.xlu0 %1048 }
 0xa48   :  { %v1050_v33 = vsub.f32 %v1043_v29, %v1049_v32  ;;  %v1259_v32 = vld [vmem:[%s10122_s8 + $0xa0] sm:$0xff] }
 0xa4a   :  { %v1051_v34 = vmul.f32 1.442695, %v1050_v33 }
 0xa4b   :  { %v1059_v35 = vpop.permute.xlu0 %1058 }
 0xa4c   :  { %7471 = vpow2.f32 %v1051_v34  ;;  %6694 = vmatpush3.msra.mxu0 %v1059_v35  ;;  %v1245_v34 = vld [vmem:[%s10122_s8 + $0x30] sm:$0xff] }
 0xa4d   :  { %6792 = vmatprep.subr.bf16.mxu0 %v6791_v58  ;;  %v1261_v35 = vld [vmem:[%s10122_s8 + $0xb0] sm:$0xff] }
 0xa4e   :  { %v1249_v58 = vld [vmem:[%s10122_s8 + $0x50] sm:$0xff] }
 0xa56   :  { %v7472_v36 = vpop.eup %7471 }
 0xa57   :  { %v1053_v37 = vsel %vm255_vm11, %v7472_v36, 0.0 }
 0xa58   :  { %1054 = vadd.xlane.f32.xlu1 %v1053_v37  ;;  %v1292_v37 = vld [vmem:[%s10122_s8 + $0x1a8] sm:$0xff] }
 0xa88   :  { %v964_v39 = vpop.f32.mrb[6].mxu0 }
 0xa89   :  { %v968_v40 = vadd.f32 %v964_v39, %v729_v15  ;;  %v6687_v41 = vpop.f32.mrb[7].mxu0  ;;  %v1244_v15 = vld [vmem:[%s10122_s8 + $0x28] sm:$0xff]  ;;  %v1294_v39 = vld [vmem:[%s10122_s8 + $0x1b8] sm:$0xff] }
 0xa8a   :  { %v6807_v19 = vpack.c.bf16 %v1260_v16, %v1244_v15  ;;  %v6809_v41 = vpack.c.bf16 %v1259_v32, %v1243_v31  ;;  %v1267_v15 = vld [vmem:[%s10122_s8 + $0xe0] sm:$0xff]  ;;  %v6839_v16 = vpack.c.bf16 %v1268_v9, %v1252_v8  ;;  %v1997_v8 = vld [vmem:[%s10124_s10 + $0xb8] sm:$0xff]  ;;  %v2028_v9 = vld [vmem:[%s10124_s10 + $0x1b0] sm:$0xff] }
 0xa8b   :  { %v1299_v31 = vld [vmem:[%s10122_s8 + $0x1e0] sm:$0xff] }
 0xae5   :  { %v1055_v42 = vpop.xlane.xlu1 %1054 }
 0xae6   :  { %7473 = vrcp.f32 %v1055_v42  ;;  %v6817_v42 = vpack.c.bf16 %v1261_v35, %v1245_v34  ;;  %v1285_v34 = vld [vmem:[%s10122_s8 + $0x170] sm:$0xff] }
 0xae7   :  { %v1301_v35 = vld [vmem:[%s10122_s8 + $0x1f0] sm:$0xff] }
 0xaf0   :  { %v7474_v28 = vpop.eup %7473 }
 0xaf1   :  { %v1057_v43 = vmul.f32 %v7474_v28, %v7472_v36  ;;  %v1276_v36 = vld [vmem:[%s10122_s8 + $0x128] sm:$0xff]  ;;  %v1275_v28 = vld [vmem:[%s10122_s8 + $0x120] sm:$0xff] }
 0xaf3   :  { %6696 = vmatmul.mubr.msk.f32.vlgmr.msra.gmra.mrb[8].mxu0 %vm255_vm11, %v1057_v43  ;;  %v1291_v43 = vld [vmem:[%s10122_s8 + $0x1a0] sm:$0xff] }
 0xaf4   :  { %1454 = vmatprep.mubr.f32.mxu0 %v7525_v22  ;;  %6794 = vmatpush1.bf16.msra.mxu0 %v6793_v63  ;;  %v1298_v63 = vld [vmem:[%s10122_s8 + $0x1d8] sm:$0xff] }
 0xaf5   :  { %6796 = vmatprep.subr.bf16.mxu0 %v6795_v6  ;;  %v1281_v6 = vld [vmem:[%s10122_s8 + $0x150] sm:$0xff] }
 0xaf6   :  { %v6837_v13 = vpack.c.bf16 %v1297_v7, %v1281_v6  ;;  %v2011_v6 = vld [vmem:[%s10124_s10 + $0x128] sm:$0xff]  ;;  %v1996_v7 = vld [vmem:[%s10124_s10 + $0xb0] sm:$0xff] }
 0xaf8   :  { %6798 = vmatpush1.bf16.msra.mxu0 %v6797_v11  ;;  %v1270_v11 = vld [vmem:[%s10122_s8 + $0xf8] sm:$0xff] }
 0xaf9   :  { %6808 = vmatprep.subr.bf16.mxu0 %v6807_v19  ;;  %v1253_v19 = vld [vmem:[%s10122_s8 + $0x70] sm:$0xff] }
 0xbc6   :  { %v1130_v44 = vpop.f32.mrb[8].mxu0 }
 0xbc7   :  { %v6697_v45 = vpop.f32.mrb[9].mxu0  ;;  %6701 = vmatmul.mubr.msk.f32.vlgmr.msra.gmra.mrb[14].mxu1 %vm255_vm11, %v1130_v44 }
 0xbc8   :  { %1525 = vmatprep.mubr.f32.mxu1 %v7525_v22  ;;  %v6811_v45 = vpack.c.bf16 %v1292_v37, %v1276_v36  ;;  %v1990_v36 = vld [vmem:[%s10124_s10 + $0x80] sm:$0xff]  ;;  %v1991_v37 = vld [vmem:[%s10124_s10 + $0x88] sm:$0xff] }
 0xc9a   :  { %v1203_v46 = vpop.f32.mrb[14].mxu1 }
 0xc9b   :  { %v1207_v47 = vadd.f32 %v1203_v46, %v968_v40  ;;  %v6702_v48 = vpop.f32.mrb[15].mxu1  ;;  %v6819_v46 = vpack.c.bf16 %v1294_v39, %v1278_v38  ;;  %v2022_v38 = vld [vmem:[%s10124_s10 + $0x180] sm:$0xff]  ;;  %v2023_v39 = vld [vmem:[%s10124_s10 + $0x188] sm:$0xff] }
 0xc9c   :  { %v1293_v48 = vld [vmem:[%s10122_s8 + $0x1b0] sm:$0xff] }
 0xc9d   :  { %v1208_v49 = vadd.f32 %v1207_v47, %v7672_v25  ;;  %v1242_v25 = vld [vmem:[%s10122_s8 + $0x18] sm:$0xff]  ;;  %v1277_v47 = vld [vmem:[%s10122_s8 + $0x130] sm:$0xff] }
 0xc9e   :  { %v6799_v62 = vpack.c.bf16 %v1258_v59, %v1242_v25  ;;  %v1265_v59 = vld [vmem:[%s10122_s8 + $0xd0] sm:$0xff] }
 0xc9f   :  { %v1209_v50 = vsel %vm167_vm10, %v1208_v49, 0.0  ;;  %v6833_v1 = vpack.c.bf16 %v1265_v59, %v1249_v58  ;;  %v2009_v58 = vld [vmem:[%s10124_s10 + $0x118] sm:$0xff]  ;;  %v1994_v59 = vld [vmem:[%s10124_s10 + $0xa0] sm:$0xff] }
 0xca0   :  { %1210 = vadd.xlane.f32.xlu1 %v1209_v50  ;;  %6800 = vmatprep.subr.bf16.mxu1 %v6799_v62  ;;  %v1264_v50 = vld [vmem:[%s10122_s8 + $0xc8] sm:$0xff]  ;;  %v1282_v62 = vld [vmem:[%s10122_s8 + $0x158] sm:$0xff] }
 0xca1   :  { %6802 = vmatpush1.bf16.msra.mxu1 %v6801_v2  ;;  %v1279_v2 = vld [vmem:[%s10122_s8 + $0x140] sm:$0xff]  ;;  %v6835_v5 = vpack.c.bf16 %v1298_v63, %v1282_v62  ;;  %v2027_v62 = vld [vmem:[%s10124_s10 + $0x1a8] sm:$0xff] }
 0xca2   :  { %6804 = vmatprep.subr.bf16.mxu1 %v6803_v10  ;;  %v1254_v10 = vld [vmem:[%s10122_s8 + $0x78] sm:$0xff]  ;;  %v6829_v12 = vpack.c.bf16 %v1295_v3, %v1279_v2  ;;  %v1979_v2 = vld [vmem:[%s10124_s10 + $0x28] sm:$0xff]  ;;  %v6863_v3 = vpack.c.bf16 %v1995_v60, %v1994_v59  ;;  %v2004_v60 = vld [vmem:[%s10124_s10 + $0xf0] sm:$0xff] }
 0xca3   :  { %v6847_v17 = vpack.c.bf16 %v1270_v11, %v1254_v10  ;;  %v2029_v10 = vld [vmem:[%s10124_s10 + $0x1b8] sm:$0xff] }
 0xca5   :  { %6806 = vmatpush1.bf16.msra.mxu1 %v6805_v14  ;;  %v1251_v14 = vld [vmem:[%s10122_s8 + $0x60] sm:$0xff] }
 0xca6   :  { %6816 = vmatprep.subr.bf16.mxu1 %v6815_v21  ;;  %v1284_v21 = vld [vmem:[%s10122_s8 + $0x168] sm:$0xff] }
 0xd2d   :  { %v1211_v51 = vpop.xlane.xlu1 %1210 }
 0xd2e   :  { %v1213_v52 = vmul.f32 0.03125, %v1211_v51  ;;  %v1250_v51 = vld [vmem:[%s10122_s8 + $0x58] sm:$0xff] }
 0xd30   :  { %v1214_v53 = vsub.f32 %v1208_v49, %v1213_v52  ;;  %v1248_v49 = vld [vmem:[%s10122_s8 + $0x48] sm:$0xff]  ;;  %v1266_v52 = vld [vmem:[%s10122_s8 + $0xd8] sm:$0xff] }
 0xd31   :  { %v6823_v57 = vpack.c.bf16 %v1264_v50, %v1248_v49  ;;  %v6831_v25 = vpack.c.bf16 %v1266_v52, %v1250_v51  ;;  %v1993_v49 = vld [vmem:[%s10124_s10 + $0x98] sm:$0xff]  ;;  %v2024_v50 = vld [vmem:[%s10124_s10 + $0x190] sm:$0xff] }
 0xd32   :  { %v1215_v54 = vmul.f32 %v1214_v53, %v1214_v53  ;;  %v2025_v51 = vld [vmem:[%s10124_s10 + $0x198] sm:$0xff] }
 0xd34   :  { %v1216_v55 = vsel %vm167_vm10, %v1215_v54, 0.0  ;;  %v6821_v54 = vpack.c.bf16 %v1293_v48, %v1277_v47  ;;  %v2007_v47 = vld [vmem:[%s10124_s10 + $0x108] sm:$0xff]  ;;  %v1992_v48 = vld [vmem:[%s10124_s10 + $0x90] sm:$0xff] }
 0xd35   :  { %1217 = vadd.xlane.f32.xlu1 %v1216_v55  ;;  %v1247_v55 = vld [vmem:[%s10122_s8 + $0x40] sm:$0xff] }
 0xd36   :  { %v6825_v0 = vpack.c.bf16 %v1263_v56, %v1247_v55  ;;  %v1977_v55 = vld [vmem:[%s10124_s10 + $0x18] sm:$0xff]  ;;  %v6859_v56 = vpack.c.bf16 %v1993_v49, %v1992_v48  ;;  %v2003_v48 = vld [vmem:[%s10124_s10 + $0xe8] sm:$0xff]  ;;  %v2034_v49 = vld [vmem:[%s10124_s10 + $0x1e0] sm:$0xff] }
 0xdc2   :  { %v1218_v23 = vpop.xlane.xlu1 %1217 }
 0xdc3   :  { %v1219_v24 = vmul.f32 0.03125, %v1218_v23  ;;  %v1300_v23 = vld [vmem:[%s10122_s8 + $0x1e8] sm:$0xff] }
 0xdc4   :  { %v6843_v32 = vpack.c.bf16 %v1300_v23, %v1284_v21  ;;  %v1999_v21 = vld [vmem:[%s10124_s10 + $0xc8] sm:$0xff]  ;;  %v2030_v23 = vld [vmem:[%s10124_s10 + $0x1c0] sm:$0xff] }
 0xdc5   :  { %v1220_v26 = vadd.f32 1e-05, %v1219_v24  ;;  %v1286_v24 = vld [vmem:[%s10122_s8 + $0x178] sm:$0xff] }
 0xdc7   :  { %7475 = vrsqrt.f32 %v1220_v26  ;;  %v1302_v26 = vld [vmem:[%s10122_s8 + $0x1f8] sm:$0xff] }
 0xdd1   :  { %v7476_v29 = vpop.eup %7475 }
 0xdd2   :  { %v1222_v33 = vmul.f32 %v7476_v29, %v1214_v53  ;;  %v6813_v53 = vpack.c.bf16 %v1291_v43, %v1275_v28  ;;  %v6849_v29 = vpack.c.bf16 %v1269_v20, %v1253_v19  ;;  %v1975_v28 = vld [vmem:[%s10124_s10 + $0x8] sm:$0xff]  ;;  %v6855_v43 = vpack.c.bf16 %v1991_v37, %v1990_v36  ;;  %v2013_v19 = vld [vmem:[%s10124_s10 + $0x138] sm:$0xff]  ;;  %v1998_v20 = vld [vmem:[%s10124_s10 + $0xc0] sm:$0xff] }
 0xdd3   :  { %v2001_v36 = vld [vmem:[%s10124_s10 + $0xd8] sm:$0xff]  ;;  %v2032_v37 = vld [vmem:[%s10124_s10 + $0x1d0] sm:$0xff] }
 0xdd4   :  { %v1230_v40 = vmul.f32 %v5625_v27, %v1222_v33  ;;  %v6841_v27 = vpack.c.bf16 %v1267_v15, %v1251_v14  ;;  %v6851_v33 = vpack.c.bf16 %v1302_v26, %v1286_v24  ;;  %v1981_v14 = vld [vmem:[%s10124_s10 + $0x38] sm:$0xff]  ;;  %v6867_v15 = vpack.c.bf16 %v1997_v8, %v1996_v7  ;;  %v2031_v24 = vld [vmem:[%s10124_s10 + $0x1c8] sm:$0xff]  ;;  %v2054_v8 = vld [vmem:[%s10124_s10 + $0x280] sm:$0xff] }
 0xdd6   :  { %v7876_v44 = vadd.f32 %v5626_v30, %v1230_v40  ;;  %v1283_v30 = vld [vmem:[%s10122_s8 + $0x160] sm:$0xff] }
 0xdd7   :  { %v6845_v40 = vpack.c.bf16 %v1299_v31, %v1283_v30  ;;  %v1983_v30 = vld [vmem:[%s10124_s10 + $0x48] sm:$0xff]  ;;  %v6871_v31 = vpack.c.bf16 %v1999_v21, %v1998_v20 }
 0xdd8   :  { %5627 = vmatmul.mubr.msk.f32.vlgmr.msra.gmra.mrb[10].mxu0 %vm167_vm10, %v7876_v44  ;;  %5628 = vmatmul.mubr.msk.f32.vlgmr.msra.gmra.mrb[16].mxu1 %vm167_vm10, %v7876_v44 }
 0xdd9   :  { %6810 = vmatpush1.bf16.msra.mxu0 %v6809_v41  ;;  %6818 = vmatpush1.bf16.msra.mxu1 %v6817_v42  ;;  %v6853_v41 = vpack.c.bf16 %v1301_v35, %v1285_v34  ;;  %v1974_v42 = vld [vmem:[%s10124_s10] sm:$0xff]  ;;  %v2015_v34 = vld [vmem:[%s10124_s10 + $0x148] sm:$0xff]  ;;  %v2000_v35 = vld [vmem:[%s10124_s10 + $0xd0] sm:$0xff] }
 0xdda   :  { %6812 = vmatprep.subr.bf16.mxu0 %v6811_v45  ;;  %6820 = vmatprep.subr.bf16.mxu1 %v6819_v46  ;;  %v6887_v45 = vpack.c.bf16 %v2023_v39, %v2022_v38  ;;  %v2006_v46 = vld [vmem:[%s10124_s10 + $0x100] sm:$0xff]  ;;  %v6857_v52 = vpack.c.bf16 %v1975_v28, %v1974_v42  ;;  %v2033_v38 = vld [vmem:[%s10124_s10 + $0x1d8] sm:$0xff]  ;;  %v6875_v28 = vpack.c.bf16 %v2001_v36, %v2000_v35 }
 0xddb   :  { %1596 = vmatprep.mubr.f32.mxu0 %v7525_v22  ;;  %1667 = vmatprep.mubr.f32.mxu1 %v7525_v22  ;;  %v1985_v42 = vld [vmem:[%s10124_s10 + $0x58] sm:$0xff] }
 0xddd   :  { %6814 = vmatpush1.bf16.msra.mxu0 %v6813_v53  ;;  %6822 = vmatpush1.bf16.msra.mxu1 %v6821_v54  ;;  %v6889_v53 = vpack.c.bf16 %v2007_v47, %v2006_v46  ;;  %v1976_v54 = vld [vmem:[%s10124_s10 + $0x10] sm:$0xff]  ;;  %v2017_v46 = vld [vmem:[%s10124_s10 + $0x158] sm:$0xff]  ;;  %v2002_v47 = vld [vmem:[%s10124_s10 + $0xe0] sm:$0xff] }
 0xdde   :  { %6824 = vmatprep.subr.bf16.mxu0 %v6823_v57  ;;  %6832 = vmatprep.subr.bf16.mxu1 %v6831_v25  ;;  %v6891_v57 = vpack.c.bf16 %v2025_v51, %v2024_v50  ;;  %v2008_v25 = vld [vmem:[%s10124_s10 + $0x110] sm:$0xff]  ;;  %v6861_v63 = vpack.c.bf16 %v1977_v55, %v1976_v54  ;;  %v2035_v50 = vld [vmem:[%s10124_s10 + $0x1e8] sm:$0xff]  ;;  %v6879_v54 = vpack.c.bf16 %v2003_v48, %v2002_v47 }
 0xddf   :  { %v6911_v55 = vpack.c.bf16 %v2035_v50, %v2034_v49 }
 0xde0   :  { %5629 = vmatmul.mubr.msk.f32.vlgmr.msra.gmra.mrb[12].mxu0 %vm167_vm10, %v7876_v44  ;;  %5630 = vmatmul.mubr.msk.f32.vlgmr.msra.gmra.mrb[18].mxu1 %vm167_vm10, %v7876_v44 }
 0xde1   :  { %6826 = vmatpush1.bf16.msra.mxu0 %v6825_v0  ;;  %6834 = vmatpush1.bf16.msra.mxu1 %v6833_v1  ;;  %v6893_v0 = vpack.c.bf16 %v2009_v58, %v2008_v25  ;;  %v1978_v1 = vld [vmem:[%s10124_s10 + $0x20] sm:$0xff]  ;;  %v2019_v25 = vld [vmem:[%s10124_s10 + $0x168] sm:$0xff] }
 0xde2   :  { %6828 = vmatprep.subr.bf16.mxu0 %v6827_v4  ;;  %6836 = vmatprep.subr.bf16.mxu1 %v6835_v5  ;;  %v6895_v4 = vpack.c.bf16 %v2027_v62, %v2026_v61  ;;  %v2010_v5 = vld [vmem:[%s10124_s10 + $0x120] sm:$0xff]  ;;  %v6865_v11 = vpack.c.bf16 %v1979_v2, %v1978_v1  ;;  %v2005_v61 = vld [vmem:[%s10124_s10 + $0xf8] sm:$0xff]  ;;  %v2036_v62 = vld [vmem:[%s10124_s10 + $0x1f0] sm:$0xff] }
 0xde3   :  { %1738 = vmatprep.mubr.f32.mxu0 %v7525_v22  ;;  %1809 = vmatprep.mubr.f32.mxu1 %v7525_v22  ;;  %v1988_v1 = vld [vmem:[%s10124_s10 + $0x70] sm:$0xff]  ;;  %v1989_v2 = vld [vmem:[%s10124_s10 + $0x78] sm:$0xff] }
 0xde5   :  { %6830 = vmatpush1.bf16.msra.mxu0 %v6829_v12  ;;  %6838 = vmatpush1.bf16.msra.mxu1 %v6837_v13  ;;  %v6897_v12 = vpack.c.bf16 %v2011_v6, %v2010_v5  ;;  %v1980_v13 = vld [vmem:[%s10124_s10 + $0x30] sm:$0xff]  ;;  %v2021_v6 = vld [vmem:[%s10124_s10 + $0x178] sm:$0xff] }
 0xde6   :  { %6840 = vmatprep.subr.bf16.mxu0 %v6839_v16  ;;  %6848 = vmatprep.subr.bf16.mxu1 %v6847_v17  ;;  %v6899_v16 = vpack.c.bf16 %v2029_v10, %v2028_v9  ;;  %v2012_v17 = vld [vmem:[%s10124_s10 + $0x130] sm:$0xff]  ;;  %v6869_v26 = vpack.c.bf16 %v1981_v14, %v1980_v13  ;;  %v2055_v9 = vld [vmem:[%s10124_s10 + $0x288] sm:$0xff]  ;;  %v2086_v10 = vld [vmem:[%s10124_s10 + $0x380] sm:$0xff]  ;;  %v1307_v14 = vlaneseq }
 0xde7   :  { %v2020_v5 = vld [vmem:[%s10124_s10 + $0x170] sm:$0xff] }
 0xde8   :  { %5631 = vmatmul.mubr.msk.f32.vlgmr.msra.gmra.mrb[14].mxu0 %vm167_vm10, %v7876_v44  ;;  %5632 = vmatmul.mubr.msk.f32.vlgmr.msra.gmra.mrb[20].mxu1 %vm167_vm10, %v7876_v44  ;;  %v6917_v7 = vpack.c.bf16 %v2021_v6, %v2020_v5  ;;  %v2043_v5 = vld [vmem:[%s10124_s10 + $0x228] sm:$0xff] }
 0xde9   :  { %6842 = vmatpush1.bf16.msra.mxu0 %v6841_v27  ;;  %6850 = vmatpush1.bf16.msra.mxu1 %v6849_v29  ;;  %v6901_v27 = vpack.c.bf16 %v2013_v19, %v2012_v17  ;;  %v1982_v29 = vld [vmem:[%s10124_s10 + $0x40] sm:$0xff] }
 0xdea   :  { %6844 = vmatprep.subr.bf16.mxu0 %v6843_v32  ;;  %6852 = vmatprep.subr.bf16.mxu1 %v6851_v33  ;;  %v6903_v32 = vpack.c.bf16 %v2031_v24, %v2030_v23  ;;  %v2014_v33 = vld [vmem:[%s10124_s10 + $0x140] sm:$0xff]  ;;  %v6873_v39 = vpack.c.bf16 %v1983_v30, %v1982_v29 }
 0xdeb   :  { %1880 = vmatprep.mubr.f32.mxu0 %v7525_v22  ;;  %1951 = vmatprep.mubr.f32.mxu1 %v7525_v22  ;;  %v8217_v19 = vld [vmem:[%s10123_s9] sm:$0xff] }
 0xded   :  { %6846 = vmatpush1.bf16.msra.mxu0 %v6845_v40  ;;  %6854 = vmatpush1.bf16.msra.mxu1 %v6853_v41  ;;  %v6905_v40 = vpack.c.bf16 %v2015_v34, %v2014_v33  ;;  %v1984_v41 = vld [vmem:[%s10124_s10 + $0x50] sm:$0xff] }
 0xdee   :  { %6856 = vmatprep.subr.bf16.mxu0 %v6855_v43  ;;  %6888 = vmatprep.subr.bf16.mxu1 %v6887_v45  ;;  %v6907_v43 = vpack.c.bf16 %v2033_v38, %v2032_v37  ;;  %v2016_v45 = vld [vmem:[%s10124_s10 + $0x150] sm:$0xff]  ;;  %v6877_v51 = vpack.c.bf16 %v1985_v42, %v1984_v41  ;;  %v2070_v37 = vld [vmem:[%s10124_s10 + $0x300] sm:$0xff]  ;;  %v2071_v38 = vld [vmem:[%s10124_s10 + $0x308] sm:$0xff] }
 0xdef   :  { %v6953_v50 = vpack.c.bf16 %v2071_v38, %v2070_v37  ;;  %v2077_v37 = vld [vmem:[%s10124_s10 + $0x338] sm:$0xff]  ;;  %v2062_v38 = vld [vmem:[%s10124_s10 + $0x2c0] sm:$0xff] }
 0xdf0   :  { %5633 = vmatmul.mubr.msk.f32.vlgmr.msra.gmra.mrb[16].mxu0 %vm167_vm10, %v7876_v44  ;;  %5634 = vmatmul.mubr.msk.f32.vlgmr.msra.gmra.mrb[22].mxu1 %vm167_vm10, %v7876_v44 }
 0xdf1   :  { %6858 = vmatpush3.bf16.msra.mxu0 %v6857_v52  ;;  %6890 = vmatpush3.bf16.msra.mxu1 %v6889_v53  ;;  %v6909_v52 = vpack.c.bf16 %v2017_v46, %v2016_v45  ;;  %v1986_v53 = vld [vmem:[%s10124_s10 + $0x60] sm:$0xff]  ;;  %v2088_v45 = vld [vmem:[%s10124_s10 + $0x390] sm:$0xff]  ;;  %v2089_v46 = vld [vmem:[%s10124_s10 + $0x398] sm:$0xff] }
 0xdf2   :  { %6860 = vmatprep.subr.bf16.mxu0 %v6859_v56  ;;  %6892 = vmatprep.subr.bf16.mxu1 %v6891_v57  ;;  %v1987_v56 = vld [vmem:[%s10124_s10 + $0x68] sm:$0xff]  ;;  %v2018_v57 = vld [vmem:[%s10124_s10 + $0x160] sm:$0xff] }
 0xdf3   :  { %v6881_v58 = vpack.c.bf16 %v1987_v56, %v1986_v53  ;;  %v6913_v59 = vpack.c.bf16 %v2019_v25, %v2018_v57  ;;  %v6955_v56 = vpack.c.bf16 %v2089_v46, %v2088_v45  ;;  %v2072_v57 = vld [vmem:[%s10124_s10 + $0x310] sm:$0xff]  ;;  %v2073_v25 = vld [vmem:[%s10124_s10 + $0x318] sm:$0xff] }
 0xdf5   :  { %6862 = vmatpush3.bf16.msra.mxu0 %v6861_v63  ;;  %6894 = vmatpush3.bf16.msra.mxu1 %v6893_v0  ;;  %v6883_v63 = vpack.c.bf16 %v2005_v61, %v2004_v60  ;;  %v2037_v0 = vld [vmem:[%s10124_s10 + $0x1f8] sm:$0xff]  ;;  %v2059_v61 = vld [vmem:[%s10124_s10 + $0x2a8] sm:$0xff] }
 0xdf6   :  { %6864 = vmatprep.subr.bf16.mxu0 %v6863_v3  ;;  %6896 = vmatprep.subr.bf16.mxu1 %v6895_v4  ;;  %v6915_v3 = vpack.c.bf16 %v2037_v0, %v2036_v62  ;;  %v6885_v4 = vpack.c.bf16 %v1989_v2, %v1988_v1  ;;  %v2090_v62 = vld [vmem:[%s10124_s10 + $0x3a0] sm:$0xff] }
 0xdf9   :  { %6866 = vmatpush3.bf16.msra.mxu0 %v6865_v11  ;;  %6898 = vmatpush3.bf16.msra.mxu1 %v6897_v12  ;;  %v6919_v11 = vpack.c.bf16 %v2055_v9, %v2054_v8  ;;  %v2087_v12 = vld [vmem:[%s10124_s10 + $0x388] sm:$0xff] }
 0xdfa   :  { %6868 = vmatprep.subr.bf16.mxu0 %v6867_v15  ;;  %6900 = vmatprep.subr.bf16.mxu1 %v6899_v16  ;;  %v6951_v13 = vpack.c.bf16 %v2087_v12, %v2086_v10  ;;  %v8206_v15 = vshrl.u32 %v1307_v14, 7  ;;  %v2074_v10 = vld [vmem:[%s10124_s10 + $0x320] sm:$0xff]  ;;  %v2060_v12 = vld [vmem:[%s10124_s10 + $0x2b0] sm:$0xff] }
 0xdfc   :  { %v8209_v16 = vsub.s32 0, %v8206_v15  ;;  %v8212_v17 = vsub.s32 2, %v8206_v15  ;;  %v8220_v20 = vsub.s32 1, %v8206_v15  ;;  %v8223_v21 = vsub.s32 3, %v8206_v15 }
 0xdfd   :  { %6870 = vmatpush3.bf16.msra.mxu0 %v6869_v26  ;;  %6902 = vmatpush3.bf16.msra.mxu1 %v6901_v27  ;;  %v8249_v42 = vsub.s32 5, %v8206_v15 }
 0xdfe   :  { %6872 = vmatprep.subr.bf16.mxu0 %v6871_v31  ;;  %6904 = vmatprep.subr.bf16.mxu1 %v6903_v32  ;;  %v1310_v23 = vrot.slane %v8217_v19, %v8209_v16  ;;  %v1318_v24 = vrot.slane %v8217_v19, %v8212_v17  ;;  %v1314_v26 = vrot.slane %v8217_v19, %v8220_v20  ;;  %v2038_v31 = vld [vmem:[%s10124_s10 + $0x200] sm:$0xff]  ;;  %v2039_v32 = vld [vmem:[%s10124_s10 + $0x208] sm:$0xff] }
 0xdff   :  { %v1322_v27 = vrot.slane %v8217_v19, %v8223_v21  ;;  %v6921_v49 = vpack.c.bf16 %v2039_v32, %v2038_v31  ;;  %v2044_v32 = vld [vmem:[%s10124_s10 + $0x230] sm:$0xff] }
 0xe01   :  { %6874 = vmatpush3.bf16.msra.mxu0 %v6873_v39  ;;  %6906 = vmatpush3.bf16.msra.mxu1 %v6905_v40  ;;  %v2056_v39 = vld [vmem:[%s10124_s10 + $0x290] sm:$0xff] }
 0xe02   :  { %6876 = vmatprep.subr.bf16.mxu0 %v6875_v28  ;;  %6908 = vmatprep.subr.bf16.mxu1 %v6907_v43  ;;  %v8252_v28 = vsub.s32 7, %v8206_v15  ;;  %v2057_v43 = vld [vmem:[%s10124_s10 + $0x298] sm:$0xff] }
 0xe04   :  { %v1338_v60 = vrot.slane %v8217_v19, %v8252_v28 }
 0xe05   :  { %6878 = vmatpush3.bf16.msra.mxu0 %v6877_v51  ;;  %6910 = vmatpush3.bf16.msra.mxu1 %v6909_v52  ;;  %v2040_v51 = vld [vmem:[%s10124_s10 + $0x210] sm:$0xff]  ;;  %v2041_v52 = vld [vmem:[%s10124_s10 + $0x218] sm:$0xff] }
 0xe06   :  { %6880 = vmatprep.subr.bf16.mxu0 %v6879_v54  ;;  %6912 = vmatprep.subr.bf16.mxu1 %v6911_v55  ;;  %v6923_v55 = vpack.c.bf16 %v2057_v43, %v2056_v39  ;;  %v6925_v2 = vpack.c.bf16 %v2041_v52, %v2040_v51  ;;  %v2063_v39 = vld [vmem:[%s10124_s10 + $0x2c8] sm:$0xff] }
 0xe07   :  { %v6935_v52 = vpack.c.bf16 %v2063_v39, %v2062_v38  ;;  %v2101_v38 = vld [vmem:[%s10124_s10 + $0x3f8] sm:$0xff] }
 0xe09   :  { %6882 = vmatpush3.bf16.msra.mxu0 %v6881_v58  ;;  %6914 = vmatpush3.bf16.msra.mxu1 %v6913_v59  ;;  %v2058_v58 = vld [vmem:[%s10124_s10 + $0x2a0] sm:$0xff]  ;;  %v1330_v59 = vrot.slane %v8217_v19, %v8249_v42 }
 0xe0a   :  { %6884 = vmatprep.subr.bf16.mxu0 %v6883_v63  ;;  %6916 = vmatprep.subr.bf16.mxu1 %v6915_v3  ;;  %v2091_v63 = vld [vmem:[%s10124_s10 + $0x3a8] sm:$0xff]  ;;  %v6957_v3 = vpack.c.bf16 %v2073_v25, %v2072_v57  ;;  %v6927_v8 = vpack.c.bf16 %v2059_v61, %v2058_v58  ;;  %v2065_v57 = vld [vmem:[%s10124_s10 + $0x2d8] sm:$0xff]  ;;  %v2096_v25 = vld [vmem:[%s10124_s10 + $0x3d0] sm:$0xff] }
 0xe0b   :  { %v6959_v9 = vpack.c.bf16 %v2091_v63, %v2090_v62  ;;  %v2097_v58 = vld [vmem:[%s10124_s10 + $0x3d8] sm:$0xff]  ;;  %v2048_v63 = vld [vmem:[%s10124_s10 + $0x250] sm:$0xff] }
 0xe0d   :  { %6886 = vmatpush3.bf16.msra.mxu0 %v6885_v4  ;;  %6918 = vmatpush3.bf16.msra.mxu1 %v6917_v7  ;;  %v2042_v4 = vld [vmem:[%s10124_s10 + $0x220] sm:$0xff] }
 0xe0e   :  { %6920 = vmatprep.subr.bf16.mxu0 %v6919_v11  ;;  %6952 = vmatprep.subr.bf16.mxu1 %v6951_v13  ;;  %v2075_v11 = vld [vmem:[%s10124_s10 + $0x328] sm:$0xff] }
 0xe0f   :  { %v6961_v31 = vpack.c.bf16 %v2075_v11, %v2074_v10  ;;  %v2098_v10 = vld [vmem:[%s10124_s10 + $0x3e0] sm:$0xff]  ;;  %v2099_v11 = vld [vmem:[%s10124_s10 + $0x3e8] sm:$0xff] }
 0xeab   :  { %v1456_v29 = vpop.f32.mrb[10].mxu0  ;;  %v1527_v30 = vpop.f32.mrb[16].mxu1 }
 0xeac   :  { %v1457_v33 = vadd.f32 %v1456_v29, %v1310_v23  ;;  %v1528_v34 = vadd.f32 %v1527_v30, %v1318_v24  ;;  %v1458_v35 = vpop.f32.mrb[11].mxu0  ;;  %v1529_v36 = vpop.f32.mrb[17].mxu1  ;;  %v2061_v23 = vld [vmem:[%s10124_s10 + $0x2b8] sm:$0xff]  ;;  %v2092_v24 = vld [vmem:[%s10124_s10 + $0x3b0] sm:$0xff]  ;;  %v6929_v30 = vpack.c.bf16 %v2043_v5, %v2042_v4  ;;  %v6971_v5 = vpack.c.bf16 %v2097_v58, %v2096_v25  ;;  %v2151_v25 = vld [vmem:[%s10124_s10 + $0x588] sm:$0xff] }
 0xead   :  { %v1459_v40 = vadd.f32 %v1458_v35, %v1314_v26  ;;  %v1530_v41 = vadd.f32 %v1529_v36, %v1322_v27  ;;  %v2093_v26 = vld [vmem:[%s10124_s10 + $0x3b8] sm:$0xff]  ;;  %v2076_v36 = vld [vmem:[%s10124_s10 + $0x330] sm:$0xff] }
 0xeae   :  { %v1958_v53 = vmax.f32 %v1457_v33, 0.0  ;;  %v1960_v54 = vmax.f32 %v1528_v34, 0.0  ;;  %v2045_v33 = vld [vmem:[%s10124_s10 + $0x238] sm:$0xff]  ;;  %v6931_v34 = vpack.c.bf16 %v2061_v23, %v2060_v12  ;;  %v6963_v35 = vpack.c.bf16 %v2093_v26, %v2092_v24  ;;  %v2050_v26 = vld [vmem:[%s10124_s10 + $0x260] sm:$0xff] }
 0xeaf   :  { %v1959_v47 = vmax.f32 %v1459_v40, 0.0  ;;  %v1961_v48 = vmax.f32 %v1530_v41, 0.0  ;;  %v2094_v40 = vld [vmem:[%s10124_s10 + $0x3c0] sm:$0xff]  ;;  %v2095_v41 = vld [vmem:[%s10124_s10 + $0x3c8] sm:$0xff]  ;;  %v6933_v46 = vpack.c.bf16 %v2045_v33, %v2044_v32  ;;  %v8410_v12 = vsub.s32 4, %v8206_v15 }
 0xeb0   :  { %v6975_v32 = vpack.c.bf16 %v2099_v11, %v2098_v10  ;;  %v2082_v33 = vld [vmem:[%s10124_s10 + $0x360] sm:$0xff]  ;;  %v2121_v10 = vld [vmem:[%s10124_s10 + $0x498] sm:$0xff] }
 0xeb1   :  { %2301 = vmatprep.mubr.f32.mxu0 %v1959_v47  ;;  %2371 = vmatprep.mubr.f32.mxu1 %v1961_v48  ;;  %v6965_v47 = vpack.c.bf16 %v2077_v37, %v2076_v36  ;;  %v2046_v48 = vld [vmem:[%s10124_s10 + $0x240] sm:$0xff]  ;;  %v2069_v36 = vld [vmem:[%s10124_s10 + $0x2f8] sm:$0xff]  ;;  %v2100_v37 = vld [vmem:[%s10124_s10 + $0x3f0] sm:$0xff]  ;;  %v1326_v39 = vrot.slane %v8217_v19, %v8410_v12 }
 0xeb2   :  { %2302 = vmatmul.mubr.f32.vlgmr.msra.gmra.mrb[18].mxu0 %v1958_v53  ;;  %2372 = vmatmul.mubr.f32.vlgmr.msra.gmra.mrb[24].mxu1 %v1960_v54  ;;  %v6967_v53 = vpack.c.bf16 %v2095_v41, %v2094_v40  ;;  %v2078_v54 = vld [vmem:[%s10124_s10 + $0x340] sm:$0xff]  ;;  %v2153_v11 = vld [vmem:[%s10124_s10 + $0x598] sm:$0xff] }
 0xeb3   :  { %v8291_v0 = vpop.f32.mrb[12].mxu0  ;;  %v8293_v1 = vpop.f32.mrb[18].mxu1  ;;  %6922 = vmatpush3.bf16.msra.mxu0 %v6921_v49  ;;  %6954 = vmatpush3.bf16.msra.mxu1 %v6953_v50  ;;  %v2047_v49 = vld [vmem:[%s10124_s10 + $0x248] sm:$0xff] }
 0xeb4   :  { %v1600_v6 = vpop.f32.mrb[13].mxu0  ;;  %v1671_v7 = vpop.f32.mrb[19].mxu1  ;;  %6924 = vmatprep.subr.bf16.mxu0 %v6923_v55  ;;  %6956 = vmatprep.subr.bf16.mxu1 %v6955_v56  ;;  %v2079_v55 = vld [vmem:[%s10124_s10 + $0x348] sm:$0xff]  ;;  %v2064_v56 = vld [vmem:[%s10124_s10 + $0x2d0] sm:$0xff]  ;;  %v6937_v61 = vpack.c.bf16 %v2047_v49, %v2046_v48 }
 0xeb5   :  { %v1601_v13 = vadd.f32 %v1600_v6, %v1330_v59  ;;  %v1672_v14 = vadd.f32 %v1671_v7, %v1338_v60  ;;  %v8376_v59 = vsub.s32 6, %v8206_v15  ;;  %v8381_v60 = vld [vmem:[%s10123_s9 + $0x8] sm:$0xff]  ;;  %v6969_v62 = vpack.c.bf16 %v2079_v55, %v2078_v54  ;;  %v2080_v6 = vld [vmem:[%s10124_s10 + $0x350] sm:$0xff]  ;;  %v2081_v7 = vld [vmem:[%s10124_s10 + $0x358] sm:$0xff] }
 0xeb6   :  { %v6939_v4 = vpack.c.bf16 %v2065_v57, %v2064_v56  ;;  %v6973_v24 = vpack.c.bf16 %v2081_v7, %v2080_v6  ;;  %v2084_v48 = vld [vmem:[%s10124_s10 + $0x370] sm:$0xff]  ;;  %v2085_v54 = vld [vmem:[%s10124_s10 + $0x378] sm:$0xff]  ;;  %v2118_v55 = vld [vmem:[%s10124_s10 + $0x480] sm:$0xff]  ;;  %v1346_v57 = vrot.slane %v8381_v60, %v8220_v20  ;;  %v1354_v58 = vrot.slane %v8381_v60, %v8223_v21 }
 0xeb7   :  { %v1963_v27 = vmax.f32 %v1601_v13, 0.0  ;;  %v1965_v29 = vmax.f32 %v1672_v14, 0.0  ;;  %6926 = vmatpush3.bf16.msra.mxu0 %v6925_v2  ;;  %6958 = vmatpush3.bf16.msra.mxu1 %v6957_v3  ;;  %v2049_v2 = vld [vmem:[%s10124_s10 + $0x258] sm:$0xff]  ;;  %v1366_v3 = vrot.slane %v8381_v60, %v8376_v59  ;;  %v1334_v49 = vrot.slane %v8217_v19, %v8376_v59  ;;  %v2119_v56 = vld [vmem:[%s10124_s10 + $0x488] sm:$0xff]  ;;  %v2150_v19 = vld [vmem:[%s10124_s10 + $0x580] sm:$0xff] }
 0xeb8   :  { %6928 = vmatprep.subr.bf16.mxu0 %v6927_v8  ;;  %6960 = vmatprep.subr.bf16.mxu1 %v6959_v9  ;;  %v2066_v8 = vld [vmem:[%s10124_s10 + $0x2e0] sm:$0xff]  ;;  %v2067_v9 = vld [vmem:[%s10124_s10 + $0x2e8] sm:$0xff]  ;;  %v6941_v23 = vpack.c.bf16 %v2049_v2, %v2048_v63  ;;  %v6983_v63 = vpack.c.bf16 %v2119_v56, %v2118_v55  ;;  %v1599_v2 = vadd.f32 %v8291_v0, %v1326_v39  ;;  %v2124_v55 = vld [vmem:[%s10124_s10 + $0x4b0] sm:$0xff] }
 0xeb9   :  { %2441 = vmatprep.mubr.f32.mxu0 %v1963_v27  ;;  %2511 = vmatprep.mubr.f32.mxu1 %v1965_v29  ;;  %v2051_v27 = vld [vmem:[%s10124_s10 + $0x268] sm:$0xff]  ;;  %v2154_v39 = vld [vmem:[%s10124_s10 + $0x5a0] sm:$0xff]  ;;  %v2125_v56 = vld [vmem:[%s10124_s10 + $0x4b8] sm:$0xff] }
 0xeba   :  { %v6945_v40 = vpack.c.bf16 %v2051_v27, %v2050_v26  ;;  %v2103_v6 = vld [vmem:[%s10124_s10 + $0x408] sm:$0xff]  ;;  %v2104_v26 = vld [vmem:[%s10124_s10 + $0x410] sm:$0xff]  ;;  %v2105_v27 = vld [vmem:[%s10124_s10 + $0x418] sm:$0xff] }
 0xebb   :  { %v8343_v43 = vpop.f32.mrb[14].mxu0  ;;  %v8345_v45 = vpop.f32.mrb[20].mxu1  ;;  %6930 = vmatpush3.bf16.msra.mxu0 %v6929_v30  ;;  %6962 = vmatpush3.bf16.msra.mxu1 %v6961_v31  ;;  %v6943_v31 = vpack.c.bf16 %v2067_v9, %v2066_v8  ;;  %v2134_v8 = vld [vmem:[%s10124_s10 + $0x500] sm:$0xff]  ;;  %v2135_v0 = vld [vmem:[%s10124_s10 + $0x508] sm:$0xff] }
 0xebc   :  { %v8353_v50 = vpop.f32.mrb[15].mxu0  ;;  %v8355_v51 = vpop.f32.mrb[21].mxu1  ;;  %6932 = vmatprep.subr.bf16.mxu0 %v6931_v34  ;;  %6964 = vmatprep.subr.bf16.mxu1 %v6963_v35  ;;  %v2083_v34 = vld [vmem:[%s10124_s10 + $0x368] sm:$0xff]  ;;  %v2068_v35 = vld [vmem:[%s10124_s10 + $0x2f0] sm:$0xff] }
 0xebd   :  { %v6977_v41 = vpack.c.bf16 %v2083_v34, %v2082_v33  ;;  %v1743_v7 = vadd.f32 %v8353_v50, %v1346_v57  ;;  %v1814_v9 = vadd.f32 %v8355_v51, %v1354_v58  ;;  %v2152_v50 = vld [vmem:[%s10124_s10 + $0x590] sm:$0xff]  ;;  %v7017_v51 = vpack.c.bf16 %v2135_v0, %v2134_v8  ;;  %v2159_v8 = vld [vmem:[%s10124_s10 + $0x5c8] sm:$0xff] }
 0xebe   :  { %v7019_v34 = vpack.c.bf16 %v2153_v11, %v2152_v50  ;;  %v2156_v57 = vld [vmem:[%s10124_s10 + $0x5b0] sm:$0xff]  ;;  %v2111_v50 = vld [vmem:[%s10124_s10 + $0x448] sm:$0xff]  ;;  %v2142_v11 = vld [vmem:[%s10124_s10 + $0x540] sm:$0xff] }
 0xebf   :  { %6934 = vmatpush3.bf16.msra.mxu0 %v6933_v46  ;;  %6966 = vmatpush3.bf16.msra.mxu1 %v6965_v47  ;;  %v2052_v46 = vld [vmem:[%s10124_s10 + $0x270] sm:$0xff]  ;;  %v2053_v47 = vld [vmem:[%s10124_s10 + $0x278] sm:$0xff] }
 0xec0   :  { %6936 = vmatprep.subr.bf16.mxu0 %v6935_v52  ;;  %6968 = vmatprep.subr.bf16.mxu1 %v6967_v53  ;;  %v6947_v52 = vpack.c.bf16 %v2069_v36, %v2068_v35  ;;  %v6979_v53 = vpack.c.bf16 %v2101_v38, %v2100_v37  ;;  %v2137_v35 = vld [vmem:[%s10124_s10 + $0x518] sm:$0xff]  ;;  %v2122_v36 = vld [vmem:[%s10124_s10 + $0x4a0] sm:$0xff]  ;;  %v2123_v37 = vld [vmem:[%s10124_s10 + $0x4a8] sm:$0xff]  ;;  %v1969_v38 = vmax.f32 %v1814_v9, 0.0 }
 0xec3   :  { %v8412_v13 = vpop.f32.mrb[16].mxu0  ;;  %v1953_v14 = vpop.f32.mrb[22].mxu1  ;;  %6938 = vmatpush3.bf16.msra.mxu0 %v6937_v61  ;;  %6970 = vmatpush3.bf16.msra.mxu1 %v6969_v62  ;;  %v6949_v61 = vpack.c.bf16 %v2053_v47, %v2052_v46  ;;  %v6981_v62 = vpack.c.bf16 %v2085_v54, %v2084_v48  ;;  %v6991_v47 = vpack.c.bf16 %v2123_v37, %v2122_v36  ;;  %v2106_v48 = vld [vmem:[%s10124_s10 + $0x420] sm:$0xff]  ;;  %v2139_v54 = vld [vmem:[%s10124_s10 + $0x528] sm:$0xff]  ;;  %v2144_v36 = vld [vmem:[%s10124_s10 + $0x550] sm:$0xff] }
 0xec4   :  { %v8420_v29 = vadd.f32 %v1953_v14, %v1366_v3  ;;  %v8422_v30 = vpop.f32.mrb[17].mxu0  ;;  %v8424_v15 = vpop.f32.mrb[23].mxu1  ;;  %6940 = vmatprep.subr.bf16.mxu0 %v6939_v4  ;;  %6972 = vmatprep.subr.bf16.mxu1 %v6971_v5  ;;  %v1670_v3 = vadd.f32 %v8293_v1, %v1334_v49  ;;  %v7015_v4 = vpack.c.bf16 %v2151_v25, %v2150_v19  ;;  %v2102_v5 = vld [vmem:[%s10124_s10 + $0x400] sm:$0xff]  ;;  %v2120_v1 = vld [vmem:[%s10124_s10 + $0x490] sm:$0xff]  ;;  %v2107_v49 = vld [vmem:[%s10124_s10 + $0x428] sm:$0xff] }
 0xec5   :  { %v6985_v14 = vpack.c.bf16 %v2103_v6, %v2102_v5  ;;  %v6987_v33 = vpack.c.bf16 %v2121_v10, %v2120_v1  ;;  %v2157_v19 = vld [vmem:[%s10124_s10 + $0x5b8] sm:$0xff]  ;;  %v6993_v25 = vpack.c.bf16 %v2107_v49, %v2106_v48  ;;  %v2126_v5 = vld [vmem:[%s10124_s10 + $0x4c0] sm:$0xff]  ;;  %v2127_v6 = vld [vmem:[%s10124_s10 + $0x4c8] sm:$0xff] }
 0xec6   :  { %v6999_v9 = vpack.c.bf16 %v2127_v6, %v2126_v5  ;;  %v2110_v10 = vld [vmem:[%s10124_s10 + $0x440] sm:$0xff]  ;;  %v2148_v5 = vld [vmem:[%s10124_s10 + $0x570] sm:$0xff]  ;;  %v1350_v6 = vrot.slane %v8381_v60, %v8212_v17 }
 0xec7   :  { %6942 = vmatpush3.bf16.msra.mxu0 %v6941_v23  ;;  %6974 = vmatpush3.bf16.msra.mxu1 %v6973_v24  ;;  %v1962_v23 = vmax.f32 %v1599_v2, 0.0  ;;  %v1964_v24 = vmax.f32 %v1670_v3, 0.0  ;;  %v2140_v2 = vld [vmem:[%s10124_s10 + $0x530] sm:$0xff]  ;;  %v7027_v3 = vpack.c.bf16 %v2157_v19, %v2156_v57  ;;  %v2133_v19 = vld [vmem:[%s10124_s10 + $0x4f8] sm:$0xff] }
 0xec8   :  { %6944 = vmatprep.subr.bf16.mxu0 %v6943_v31  ;;  %6976 = vmatprep.subr.bf16.mxu1 %v6975_v32  ;;  %v2136_v31 = vld [vmem:[%s10124_s10 + $0x510] sm:$0xff]  ;;  %v1967_v32 = vmax.f32 %v1743_v7, 0.0  ;;  %v2158_v7 = vld [vmem:[%s10124_s10 + $0x5c0] sm:$0xff] }
 0xec9   :  { %v7021_v46 = vpack.c.bf16 %v2137_v35, %v2136_v31  ;;  %v7001_v31 = vpack.c.bf16 %v2111_v50, %v2110_v10  ;;  %v2113_v35 = vld [vmem:[%s10124_s10 + $0x458] sm:$0xff]  ;;  %v2132_v57 = vld [vmem:[%s10124_s10 + $0x4f0] sm:$0xff]  ;;  %v2214_v10 = vld [vmem:[%s10124_s10 + $0x780] sm:$0xff] }
 0xeca   :  { %v2215_v50 = vld [vmem:[%s10124_s10 + $0x788] sm:$0xff] }
 0xecb   :  { %6946 = vmatpush3.bf16.msra.mxu0 %v6945_v40  ;;  %6978 = vmatpush3.bf16.msra.mxu1 %v6977_v41  ;;  %v2155_v40 = vld [vmem:[%s10124_s10 + $0x5a8] sm:$0xff]  ;;  %v6989_v41 = vpack.c.bf16 %v2105_v27, %v2104_v26  ;;  %v2160_v26 = vld [vmem:[%s10124_s10 + $0x5d0] sm:$0xff]  ;;  %v2161_v27 = vld [vmem:[%s10124_s10 + $0x5d8] sm:$0xff] }
 0xecc   :  { %6948 = vmatprep.subr.bf16.mxu0 %v6947_v52  ;;  %6980 = vmatprep.subr.bf16.mxu1 %v6979_v53  ;;  %v2138_v52 = vld [vmem:[%s10124_s10 + $0x520] sm:$0xff]  ;;  %v7023_v53 = vpack.c.bf16 %v2155_v40, %v2154_v39  ;;  %v7035_v37 = vpack.c.bf16 %v2161_v27, %v2160_v26  ;;  %v2131_v40 = vld [vmem:[%s10124_s10 + $0x4e8] sm:$0xff] }
 0xecd   :  { %v7025_v58 = vpack.c.bf16 %v2139_v54, %v2138_v52  ;;  %v2130_v39 = vld [vmem:[%s10124_s10 + $0x4e0] sm:$0xff]  ;;  %v2167_v27 = vld [vmem:[%s10124_s10 + $0x608] sm:$0xff] }
 0xece   :  { %v7007_v49 = vpack.c.bf16 %v2131_v40, %v2130_v39  ;;  %v2114_v52 = vld [vmem:[%s10124_s10 + $0x460] sm:$0xff] }
 0xecf   :  { %6950 = vmatpush3.bf16.msra.mxu0 %v6949_v61  ;;  %6982 = vmatpush3.bf16.msra.mxu1 %v6981_v62  ;;  %v6995_v61 = vpack.c.bf16 %v2125_v56, %v2124_v55  ;;  %v2108_v62 = vld [vmem:[%s10124_s10 + $0x430] sm:$0xff]  ;;  %v2146_v54 = vld [vmem:[%s10124_s10 + $0x560] sm:$0xff]  ;;  %v2147_v56 = vld [vmem:[%s10124_s10 + $0x568] sm:$0xff] }
 0xed0   :  { %6984 = vmatprep.subr.bf16.mxu0 %v6983_v63  ;;  %7016 = vmatprep.subr.bf16.mxu1 %v7015_v4  ;;  %v2109_v63 = vld [vmem:[%s10124_s10 + $0x438] sm:$0xff]  ;;  %v2166_v26 = vld [vmem:[%s10124_s10 + $0x600] sm:$0xff] }
 0xed1   :  { %v2141_v4 = vld [vmem:[%s10124_s10 + $0x538] sm:$0xff]  ;;  %v6997_v0 = vpack.c.bf16 %v2109_v63, %v2108_v62  ;;  %v1342_v62 = vrot.slane %v8381_v60, %v8209_v16  ;;  %v7041_v63 = vpack.c.bf16 %v2147_v56, %v2146_v54  ;;  %v2218_v56 = vld [vmem:[%s10124_s10 + $0x7a0] sm:$0xff] }
 0xed2   :  { %2442 = vmatmul.mubr.f32.vlgmr.msra.gmra.mrb[20].mxu0 %v1962_v23  ;;  %2512 = vmatmul.mubr.f32.vlgmr.msra.gmra.mrb[26].mxu1 %v1964_v24  ;;  %v7029_v1 = vpack.c.bf16 %v2141_v4, %v2140_v2  ;;  %v2143_v23 = vld [vmem:[%s10124_s10 + $0x548] sm:$0xff]  ;;  %v2128_v24 = vld [vmem:[%s10124_s10 + $0x4d0] sm:$0xff]  ;;  %v7011_v2 = vpack.c.bf16 %v2133_v19, %v2132_v57  ;;  %v2117_v4 = vld [vmem:[%s10124_s10 + $0x478] sm:$0xff] }
 0xed3   :  { %6986 = vmatpush3.bf16.msra.mxu0 %v6985_v14  ;;  %2581 = vmatprep.mubr.f32.mxu0 %v1967_v32  ;;  %v7031_v14 = vpack.c.bf16 %v2159_v8, %v2158_v7  ;;  %v7033_v32 = vpack.c.bf16 %v2143_v23, %v2142_v11  ;;  %v2149_v8 = vld [vmem:[%s10124_s10 + $0x578] sm:$0xff]  ;;  %v1370_v11 = vrot.slane %v8381_v60, %v8252_v28  ;;  %v2219_v57 = vld [vmem:[%s10124_s10 + $0x7a8] sm:$0xff] }
 0xed4   :  { %7018 = vmatpush3.bf16.msra.mxu1 %v7017_v51  ;;  %2651 = vmatprep.mubr.f32.mxu1 %v1969_v38  ;;  %v2129_v51 = vld [vmem:[%s10124_s10 + $0x4d8] sm:$0xff]  ;;  %v1741_v23 = vadd.f32 %v8343_v43, %v1342_v62  ;;  %v2198_v43 = vld [vmem:[%s10124_s10 + $0x700] sm:$0xff] }
 0xed5   :  { %6988 = vmatprep.subr.bf16.mxu0 %v6987_v33  ;;  %7020 = vmatprep.subr.bf16.mxu1 %v7019_v34  ;;  %v7003_v33 = vpack.c.bf16 %v2129_v51, %v2128_v24  ;;  %v2112_v34 = vld [vmem:[%s10124_s10 + $0x450] sm:$0xff]  ;;  %v2145_v38 = vld [vmem:[%s10124_s10 + $0x558] sm:$0xff]  ;;  %v7045_v24 = vpack.c.bf16 %v2149_v8, %v2148_v5  ;;  %v2170_v62 = vld [vmem:[%s10124_s10 + $0x620] sm:$0xff] }
 0xed6   :  { %v7037_v48 = vpack.c.bf16 %v2145_v38, %v2144_v36  ;;  %v1956_v36 = vadd.f32 %v8424_v15, %v1370_v11  ;;  %v2216_v38 = vld [vmem:[%s10124_s10 + $0x790] sm:$0xff]  ;;  %v1966_v39 = vmax.f32 %v1741_v23, 0.0  ;;  %v2169_v15 = vld [vmem:[%s10124_s10 + $0x618] sm:$0xff] }
 0xed7   :  { %6990 = vmatpush3.bf16.msra.mxu0 %v6989_v41  ;;  %v2162_v41 = vld [vmem:[%s10124_s10 + $0x5e0] sm:$0xff]  ;;  %v2188_v5 = vld [vmem:[%s10124_s10 + $0x6b0] sm:$0xff]  ;;  %v2221_v8 = vld [vmem:[%s10124_s10 + $0x7b8] sm:$0xff] }
 0xed8   :  { %7022 = vmatpush3.bf16.msra.mxu1 %v7021_v46  ;;  %6992 = vmatprep.subr.bf16.mxu0 %v6991_v47  ;;  %v2163_v46 = vld [vmem:[%s10124_s10 + $0x5e8] sm:$0xff]  ;;  %v7005_v47 = vpack.c.bf16 %v2113_v35, %v2112_v34  ;;  %v2184_v35 = vld [vmem:[%s10124_s10 + $0x690] sm:$0xff]  ;;  %v1973_v19 = vmax.f32 %v1956_v36, 0.0  ;;  %v2205_v23 = vld [vmem:[%s10124_s10 + $0x738] sm:$0xff] }
 0xed9   :  { %7024 = vmatprep.subr.bf16.mxu1 %v7023_v53  ;;  %v2115_v53 = vld [vmem:[%s10124_s10 + $0x468] sm:$0xff]  ;;  %v7039_v55 = vpack.c.bf16 %v2163_v46, %v2162_v41  ;;  %v2168_v41 = vld [vmem:[%s10124_s10 + $0x610] sm:$0xff] }
 0xeda   :  { %v2200_v46 = vld [vmem:[%s10124_s10 + $0x710] sm:$0xff]  ;;  %v2207_v36 = vld [vmem:[%s10124_s10 + $0x748] sm:$0xff] }
 0xedb   :  { %6994 = vmatpush3.bf16.msra.mxu0 %v6993_v25  ;;  %v2164_v25 = vld [vmem:[%s10124_s10 + $0x5f0] sm:$0xff] }
 0xedc   :  { %7026 = vmatpush3.bf16.msra.mxu1 %v7025_v58  ;;  %6996 = vmatprep.subr.bf16.mxu0 %v6995_v61  ;;  %v2165_v58 = vld [vmem:[%s10124_s10 + $0x5f8] sm:$0xff]  ;;  %v7009_v61 = vpack.c.bf16 %v2115_v53, %v2114_v52  ;;  %v2186_v52 = vld [vmem:[%s10124_s10 + $0x6a0] sm:$0xff]  ;;  %v2187_v53 = vld [vmem:[%s10124_s10 + $0x6a8] sm:$0xff] }
 0xedd   :  { %7028 = vmatprep.subr.bf16.mxu1 %v7027_v3  ;;  %v2116_v3 = vld [vmem:[%s10124_s10 + $0x470] sm:$0xff]  ;;  %v7043_v7 = vpack.c.bf16 %v2165_v58, %v2164_v25  ;;  %v7053_v25 = vpack.c.bf16 %v2169_v15, %v2168_v41 }
 0xede   :  { %v2204_v11 = vld [vmem:[%s10124_s10 + $0x730] sm:$0xff] }
 0xedf   :  { %6998 = vmatpush3.bf16.msra.mxu0 %v6997_v0  ;;  %v2182_v0 = vld [vmem:[%s10124_s10 + $0x680] sm:$0xff] }
 0xee0   :  { %7030 = vmatpush3.bf16.msra.mxu1 %v7029_v1  ;;  %7000 = vmatprep.subr.bf16.mxu0 %v6999_v9  ;;  %v2183_v1 = vld [vmem:[%s10124_s10 + $0x688] sm:$0xff]  ;;  %v1362_v9 = vrot.slane %v8381_v60, %v8249_v42 }
 0xee1   :  { %7032 = vmatprep.subr.bf16.mxu1 %v7031_v14  ;;  %v7013_v14 = vpack.c.bf16 %v2117_v4, %v2116_v3  ;;  %v7047_v51 = vpack.c.bf16 %v2183_v1, %v2182_v0  ;;  %v7087_v3 = vpack.c.bf16 %v2219_v57, %v2218_v56  ;;  %v2203_v4 = vld [vmem:[%s10124_s10 + $0x728] sm:$0xff] }
 0xee2   :  { %v1885_v34 = vadd.f32 %v8422_v30, %v1362_v9  ;;  %v2217_v30 = vld [vmem:[%s10124_s10 + $0x798] sm:$0xff]  ;;  %v2227_v56 = vld [vmem:[%s10124_s10 + $0x7e8] sm:$0xff] }
 0xee3   :  { %7002 = vmatpush3.bf16.msra.mxu0 %v7001_v31  ;;  %v1812_v31 = vadd.f32 %v8345_v45, %v1350_v6  ;;  %v2185_v45 = vld [vmem:[%s10124_s10 + $0x698] sm:$0xff] }
 0xee4   :  { %7034 = vmatpush3.bf16.msra.mxu1 %v7033_v32  ;;  %7004 = vmatprep.subr.bf16.mxu0 %v7003_v33  ;;  %v7079_v32 = vpack.c.bf16 %v2215_v50, %v2214_v10  ;;  %v2199_v33 = vld [vmem:[%s10124_s10 + $0x708] sm:$0xff]  ;;  %v1971_v54 = vmax.f32 %v1885_v34, 0.0  ;;  %v2189_v6 = vld [vmem:[%s10124_s10 + $0x6b8] sm:$0xff]  ;;  %v2172_v10 = vld [vmem:[%s10124_s10 + $0x630] sm:$0xff] }
 0xee5   :  { %7036 = vmatprep.subr.bf16.mxu1 %v7035_v37  ;;  %v7049_v37 = vpack.c.bf16 %v2167_v27, %v2166_v26  ;;  %v7081_v40 = vpack.c.bf16 %v2199_v33, %v2198_v43  ;;  %v7059_v9 = vpack.c.bf16 %v2189_v6, %v2188_v5  ;;  %v2173_v50 = vld [vmem:[%s10124_s10 + $0x638] sm:$0xff]  ;;  %v2222_v26 = vld [vmem:[%s10124_s10 + $0x7c0] sm:$0xff]  ;;  %v2223_v27 = vld [vmem:[%s10124_s10 + $0x7c8] sm:$0xff] }
 0xee6   :  { %v2174_v33 = vld [vmem:[%s10124_s10 + $0x640] sm:$0xff]  ;;  %v2175_v34 = vld [vmem:[%s10124_s10 + $0x648] sm:$0xff]  ;;  %v2228_v5 = vld [vmem:[%s10124_s10 + $0x7f0] sm:$0xff] }
 0xee7   :  { %7006 = vmatpush3.bf16.msra.mxu0 %v7005_v47  ;;  %v1968_v47 = vmax.f32 %v1812_v31, 0.0  ;;  %v7061_v31 = vpack.c.bf16 %v2173_v50, %v2172_v10  ;;  %v2229_v6 = vld [vmem:[%s10124_s10 + $0x7f8] sm:$0xff] }
 0xee8   :  { %7038 = vmatpush3.bf16.msra.mxu1 %v7037_v48  ;;  %7008 = vmatprep.subr.bf16.mxu0 %v7007_v49  ;;  %v7051_v48 = vpack.c.bf16 %v2185_v45, %v2184_v35  ;;  %v2201_v49 = vld [vmem:[%s10124_s10 + $0x718] sm:$0xff]  ;;  %v2206_v35 = vld [vmem:[%s10124_s10 + $0x740] sm:$0xff]  ;;  %v7095_v45 = vpack.c.bf16 %v2223_v27, %v2222_v26  ;;  %v7107_v50 = vpack.c.bf16 %v2229_v6, %v2228_v5  ;;  %v1972_v26 = vmax.f32 %v8420_v29, 0.0 }
 0xee9   :  { %7040 = vmatprep.subr.bf16.mxu1 %v7039_v55  ;;  %v7083_v55 = vpack.c.bf16 %v2217_v30, %v2216_v38  ;;  %v7085_v58 = vpack.c.bf16 %v2201_v49, %v2200_v46  ;;  %v2193_v38 = vld [vmem:[%s10124_s10 + $0x6d8] sm:$0xff]  ;;  %v2224_v30 = vld [vmem:[%s10124_s10 + $0x7d0] sm:$0xff]  ;;  %v7097_v41 = vpack.c.bf16 %v2207_v36, %v2206_v35 }
 0xeea   :  { %v2176_v46 = vld [vmem:[%s10124_s10 + $0x650] sm:$0xff]  ;;  %v2181_v10 = vld [vmem:[%s10124_s10 + $0x678] sm:$0xff] }
 0xeeb   :  { %7010 = vmatpush3.bf16.msra.mxu0 %v7009_v61  ;;  %v7055_v61 = vpack.c.bf16 %v2187_v53, %v2186_v52  ;;  %v2209_v52 = vld [vmem:[%s10124_s10 + $0x758] sm:$0xff]  ;;  %v2194_v53 = vld [vmem:[%s10124_s10 + $0x6e0] sm:$0xff] }
 0xeec   :  { %7042 = vmatpush3.bf16.msra.mxu1 %v7041_v63  ;;  %7012 = vmatprep.subr.bf16.mxu0 %v7011_v2  ;;  %v2171_v63 = vld [vmem:[%s10124_s10 + $0x628] sm:$0xff]  ;;  %v2202_v2 = vld [vmem:[%s10124_s10 + $0x720] sm:$0xff] }
 0xeed   :  { %7044 = vmatprep.subr.bf16.mxu1 %v7043_v7  ;;  %v2220_v7 = vld [vmem:[%s10124_s10 + $0x7b0] sm:$0xff]  ;;  %v7057_v0 = vpack.c.bf16 %v2171_v63, %v2170_v62  ;;  %v7089_v1 = vpack.c.bf16 %v2203_v4, %v2202_v2  ;;  %v2210_v62 = vld [vmem:[%s10124_s10 + $0x760] sm:$0xff]  ;;  %v2211_v2 = vld [vmem:[%s10124_s10 + $0x768] sm:$0xff] }
 0xeee   :  { %v2197_v4 = vld [vmem:[%s10124_s10 + $0x6f8] sm:$0xff] }
 0xeef   :  { %7014 = vmatpush3.bf16.msra.mxu0 %v7013_v14  ;;  %v7091_v14 = vpack.c.bf16 %v2221_v8, %v2220_v7  ;;  %v1358_v8 = vrot.slane %v8381_v60, %v8410_v12  ;;  %v2213_v60 = vld [vmem:[%s10124_s10 + $0x778] sm:$0xff] }
 0xef0   :  { %7046 = vmatpush3.bf16.msra.mxu1 %v7045_v24  ;;  %7048 = vmatprep.subr.bf16.mxu0 %v7047_v51  ;;  %v2190_v24 = vld [vmem:[%s10124_s10 + $0x6c0] sm:$0xff]  ;;  %v2191_v51 = vld [vmem:[%s10124_s10 + $0x6c8] sm:$0xff] }
 0xef1   :  { %7080 = vmatprep.subr.bf16.mxu1 %v7079_v32  ;;  %v7093_v32 = vpack.c.bf16 %v2205_v23, %v2204_v11  ;;  %v7063_v43 = vpack.c.bf16 %v2191_v51, %v2190_v24  ;;  %v2212_v11 = vld [vmem:[%s10124_s10 + $0x770] sm:$0xff]  ;;  %v1883_v23 = vadd.f32 %v8412_v13, %v1358_v8  ;;  %v5638_v8 = vld [vmem:[%s10116_s2 + $0x20] sm:$0xff] }
 0xef2   :  { %2582 = vmatmul.mubr.f32.vlgmr.msra.gmra.mrb[22].mxu0 %v1966_v39  ;;  %v2225_v39 = vld [vmem:[%s10124_s10 + $0x7d8] sm:$0xff]  ;;  %v7109_v24 = vpack.c.bf16 %v2213_v60, %v2212_v11 }
 0xef3   :  { %2652 = vmatmul.mubr.f32.vlgmr.msra.gmra.mrb[28].mxu1 %v1968_v47  ;;  %7050 = vmatpush3.bf16.msra.mxu0 %v7049_v37  ;;  %v2192_v37 = vld [vmem:[%s10124_s10 + $0x6d0] sm:$0xff]  ;;  %v2177_v47 = vld [vmem:[%s10124_s10 + $0x658] sm:$0xff]  ;;  %v7099_v49 = vpack.c.bf16 %v2225_v39, %v2224_v30  ;;  %v1970_v51 = vmax.f32 %v1883_v23, 0.0  ;;  %v5636_v23 = vld [vmem:[%s10126_s12] ss:$0 sm:$0xff] }
 0xef4   :  { %2721 = vmatprep.mubr.f32.mxu0 %v1971_v54  ;;  %7082 = vmatpush3.bf16.msra.mxu1 %v7081_v40  ;;  %v7065_v40 = vpack.c.bf16 %v2175_v34, %v2174_v33  ;;  %v7067_v15 = vpack.c.bf16 %v2193_v38, %v2192_v37  ;;  %v2195_v54 = vld [vmem:[%s10124_s10 + $0x6e8] sm:$0xff]  ;;  %v7069_v57 = vpack.c.bf16 %v2177_v47, %v2176_v46 }
 0xef5   :  { %2791 = vmatprep.mubr.f32.mxu1 %v1973_v19  ;;  %7052 = vmatprep.subr.bf16.mxu0 %v7051_v48  ;;  %v2208_v48 = vld [vmem:[%s10124_s10 + $0x750] sm:$0xff] }
 0xef6   :  { %7084 = vmatprep.subr.bf16.mxu1 %v7083_v55  ;;  %v2226_v55 = vld [vmem:[%s10124_s10 + $0x7e0] sm:$0xff]  ;;  %v7101_v19 = vpack.c.bf16 %v2209_v52, %v2208_v48 }
 0xef7   :  { %7054 = vmatpush3.bf16.msra.mxu0 %v7053_v25  ;;  %v7071_v25 = vpack.c.bf16 %v2195_v54, %v2194_v53  ;;  %v7103_v63 = vpack.c.bf16 %v2227_v56, %v2226_v55 }
 0xef8   :  { %7086 = vmatpush3.bf16.msra.mxu1 %v7085_v58  ;;  %7056 = vmatprep.subr.bf16.mxu0 %v7055_v61  ;;  %v2178_v58 = vld [vmem:[%s10124_s10 + $0x660] sm:$0xff]  ;;  %v2179_v61 = vld [vmem:[%s10124_s10 + $0x668] sm:$0xff] }
 0xef9   :  { %7088 = vmatprep.subr.bf16.mxu1 %v7087_v3  ;;  %v2196_v3 = vld [vmem:[%s10124_s10 + $0x6f0] sm:$0xff]  ;;  %v7073_v7 = vpack.c.bf16 %v2179_v61, %v2178_v58 }
 0xefb   :  { %7058 = vmatpush3.bf16.msra.mxu0 %v7057_v0  ;;  %v7105_v0 = vpack.c.bf16 %v2211_v2, %v2210_v62 }
 0xefc   :  { %7090 = vmatpush3.bf16.msra.mxu1 %v7089_v1  ;;  %7060 = vmatprep.subr.bf16.mxu0 %v7059_v9  ;;  %v7075_v1 = vpack.c.bf16 %v2197_v4, %v2196_v3  ;;  %v2180_v9 = vld [vmem:[%s10124_s10 + $0x670] sm:$0xff] }
 0xefd   :  { %7092 = vmatprep.subr.bf16.mxu1 %v7091_v14  ;;  %v7077_v14 = vpack.c.bf16 %v2181_v10, %v2180_v9  ;;  %v5641_v9 = vld [vmem:[%s10116_s2 + $0x38] sm:$0xff] }
 0xeff   :  { %7062 = vmatpush3.bf16.msra.mxu0 %v7061_v31  ;;  %v5635_v31 = vld [vmem:[%s10125_s11] ss:$0 sm:$0xff] }
 0xf00   :  { %7094 = vmatpush3.bf16.msra.mxu1 %v7093_v32  ;;  %7064 = vmatprep.subr.bf16.mxu0 %v7063_v43 }
 0xf01   :  { %7096 = vmatprep.subr.bf16.mxu1 %v7095_v45 }
 0xf03   :  { %7066 = vmatpush3.bf16.msra.mxu0 %v7065_v40 }
 0xf04   :  { %7098 = vmatpush3.bf16.msra.mxu1 %v7097_v41  ;;  %7068 = vmatprep.subr.bf16.mxu0 %v7067_v15 }
 0xf05   :  { %7100 = vmatprep.subr.bf16.mxu1 %v7099_v49 }
 0xf07   :  { %7070 = vmatpush3.bf16.msra.mxu0 %v7069_v57 }
 0xf08   :  { %7102 = vmatpush3.bf16.msra.mxu1 %v7101_v19  ;;  %7072 = vmatprep.subr.bf16.mxu0 %v7071_v25 }
 0xf09   :  { %7104 = vmatprep.subr.bf16.mxu1 %v7103_v63 }
 0xf0b   :  { %7074 = vmatpush3.bf16.msra.mxu0 %v7073_v7 }
 0xf0c   :  { %7106 = vmatpush3.bf16.msra.mxu1 %v7105_v0  ;;  %7076 = vmatprep.subr.bf16.mxu0 %v7075_v1  ;;  %v5639_v0 = vld [vmem:[%s10116_s2 + $0x28] sm:$0xff] }
 0xf0d   :  { %7108 = vmatprep.subr.bf16.mxu1 %v7107_v50  ;;  %v7112_v1 = vpack.c.bf16 %v5639_v0, %v5638_v8 }
 0xf0f   :  { %7078 = vmatpush3.bf16.msra.mxu0 %v7077_v14 }
 0xf10   :  { %7110 = vmatpush3.bf16.msra.mxu1 %v7109_v24  ;;  %7111 = vmatprep.subr.bf16.mxu0 %v7523_v18 }
 0xf11   :  { %6714 = vmatprep.subr.mxu1 %v7525_v22 }
 0xf12   :  { %2722 = vmatmul.mubr.f32.vlgmr.msra.gmra.mrb[24].mxu0 %v1970_v51  ;;  %v5637_v51 = vld [vmem:[%s10127_s13] ss:$0 sm:$0xff] }
 0xf13   :  { %2792 = vmatmul.mubr.f32.vlgmr.msra.gmra.mrb[30].mxu1 %v1972_v26  ;;  %6711 = vmatprep.mubr.msk.f32.mxu0 %vm7524_vm8, %v7525_v22 }
 0xf14   :  { %6716 = vmatprep.mubr.msk.f32.mxu1 %vm7524_vm8, %v7525_v22  ;;  %7113 = vmatpush3.bf16.msra.mxu0 %v7112_v1 }
 0xf15   :  { %7114 = vmatprep.subr.bf16.mxu0 %v7523_v18 }
 0xf85   :  { %v6070_v13 = vpop.f32.mrb[18].mxu0  ;;  %v6105_v27 = vpop.f32.mrb[24].mxu1 }
 0xf86   :  { %v6071_v32 = vpop.f32.mrb[19].mxu0  ;;  %v6106_v43 = vpop.f32.mrb[25].mxu1 }
 0xf87   :  { %v6072_v33 = vadd.f32 %v6071_v32, %v6070_v13  ;;  %v6107_v29 = vadd.f32 %v6106_v43, %v6105_v27  ;;  %v5643_v27 = vld [vmem:[%s10117_s3 + $0x1] ss:$0 sm:$0xff]  ;;  %s10140_s3 = smov 56  }
 0xf89   :  { %v2304_v34 = vadd.f32 %v6072_v33, %v5635_v31 }
 0xf8b   :  { %v2374_v35 = vadd.f32 %v6107_v29, %v2304_v34 }
 0xfa5   :  { %v6140_v45 = vpop.f32.mrb[20].mxu0  ;;  %v6175_v36 = vpop.f32.mrb[26].mxu1 }
 0xfa6   :  { %v6141_v37 = vpop.f32.mrb[21].mxu0  ;;  %v6176_v38 = vpop.f32.mrb[27].mxu1 }
 0xfa7   :  { %v6142_v30 = vadd.f32 %v6141_v37, %v6140_v45  ;;  %v6177_v39 = vadd.f32 %v6176_v38, %v6175_v36 }
 0xfa9   :  { %v2444_v40 = vadd.f32 %v6142_v30, %v2374_v35 }
 0xfab   :  { %v2514_v41 = vadd.f32 %v6177_v39, %v2444_v40  ;;  %v5645_v40 = vld [vmem:[%s10118_s4 + $0x20] sm:$0xff] }
 0xfc5   :  { %v6210_v15 = vpop.f32.mrb[22].mxu0 }
 0xfc6   :  { %v6245_v46 = vpop.f32.mrb[28].mxu1  ;;  %v6211_v47 = vpop.f32.mrb[23].mxu0 }
 0xfc7   :  { %v6212_v48 = vadd.f32 %v6211_v47, %v6210_v15  ;;  %v6246_v49 = vpop.f32.mrb[29].mxu1 }
 0xfc8   :  { %v6247_v52 = vadd.f32 %v6246_v49, %v6245_v46 }
 0xfc9   :  { %v2584_v53 = vadd.f32 %v6212_v48, %v2514_v41 }
 0xfcb   :  { %v2654_v54 = vadd.f32 %v6247_v52, %v2584_v53 }
 0xfe5   :  { %v6280_v55 = vpop.f32.mrb[24].mxu0 }
 0xfe6   :  { %v6315_v56 = vpop.f32.mrb[30].mxu1  ;;  %v6281_v57 = vpop.f32.mrb[25].mxu0 }
 0xfe7   :  { %v6282_v19 = vadd.f32 %v6281_v57, %v6280_v55  ;;  %v6316_v25 = vpop.f32.mrb[31].mxu1 }
 0xfe8   :  { %v6317_v58 = vadd.f32 %v6316_v25, %v6315_v56 }
 0xfe9   :  { %v2724_v61 = vadd.f32 %v6282_v19, %v2654_v54 }
 0xfeb   :  { %v2794_v62 = vadd.f32 %v6317_v58, %v2724_v61 }
 0xfed   :  { %v2797_v63 = vadd.f32 %v2794_v62, %v7876_v44  ;;  %v5640_v44 = vld [vmem:[%s10116_s2 + $0x30] sm:$0xff] }
 0xfee   :  { %v7115_v10 = vpack.c.bf16 %v5641_v9, %v5640_v44 }
 0xfef   :  { %v2798_v2 = vsel %vm167_vm10, %v2797_v63, 0.0 }
 0xff0   :  { %2799 = vadd.xlane.f32.xlu1 %v2798_v2  ;;  %7116 = vmatpush3.bf16.msra.mxu0 %v7115_v10 }
 0xff1   :  { %6724 = vmatprep.subr.mxu0 %v7525_v22 }
0x107d   :  { %v2800_v3 = vpop.xlane.xlu1 %2799 }
0x107e   :  { %v2801_v4 = vmul.f32 0.03125, %v2800_v3 }
0x1080   :  { %v2802_v5 = vsub.f32 %v2797_v63, %v2801_v4 }
0x1082   :  { %v2803_v6 = vmul.f32 %v2802_v5, %v2802_v5 }
0x1084   :  { %v2804_v7 = vsel %vm167_vm10, %v2803_v6, 0.0 }
0x1085   :  { %2805 = vadd.xlane.f32.xlu1 %v2804_v7  ;;  %v5646_v7 = vld [vmem:[%s10118_s4 + $0x28] sm:$0xff] }
0x1112   :  { %v2806_v50 = vpop.xlane.xlu1 %2805 }
0x1113   :  { %v2807_v11 = vmul.f32 0.03125, %v2806_v50 }
0x1115   :  { %v2808_v60 = vadd.f32 1e-05, %v2807_v11 }
0x1117   :  { %7477 = vrsqrt.f32 %v2808_v60 }
0x1121   :  { %v7478_v14 = vpop.eup %7477 }
0x1122   :  { %v2810_v24 = vmul.f32 %v7478_v14, %v2802_v5 }
0x1124   :  { %v2818_v26 = vmul.f32 %v5636_v23, %v2810_v24  ;;  %v5650_v24 = vld [vmem:[%s10119_s5 + $0x1] ss:$0 sm:$0xff] }
0x1126   :  { %v8900_v13 = vadd.f32 %v5637_v51, %v2818_v26 }
0x1128   :  { %6712 = vmatmul.mubr.msk.f32.vlgmr.msra.gmra.mrb[26].mxu0 %vm167_vm10, %v8900_v13 }
0x1129   :  { %6726 = vmatprep.mubr.msk.f32.mxu0 %vm7524_vm8, %v7525_v22  ;;  %6725 = vmatpush3.msra.mxu0 %v5645_v40 }
0x112a   :  { %6734 = vmatprep.subr.mxu0 %v7525_v22 }
0x11fb   :  { %v2909_v31 = vpop.f32.mrb[26].mxu0 }
0x11fc   :  { %v8909_v32 = vadd.f32 %v5643_v27, %v2909_v31  ;;  %v6713_v43 = vpop.f32.mrb[27].mxu0 }
0x11fe   :  { %2927 = vrot.lane.b32.xlu0 %v8909_v32, %s7527_s20  ;;  %s10141_s20 = smov 80  }
0x1270   :  { %v2928_v33 = vpop.permute.xlu0 %2927 }
0x1271   :  { %6715 = vmatpush3.xpose.msk.msra.mxu1 %vm255_vm11, %v2928_v33 }
0x1272   :  { %6719 = vmatprep.subr.mxu1 %v7525_v22 }
0x1274   :  { %6717 = vmatmul.mubr.msk.f32.vlgmr.msra.gmra.mrb[32].mxu1 %vm255_vm11, %v8909_v32 }
0x1275   :  { %6721 = vmatprep.mubr.msk.f32.mxu1 %vm7524_vm8, %v7525_v22 }
0x1347   :  { %v2999_v29 = vpop.f32.mrb[32].mxu1 }
0x1348   :  { %v6718_v34 = vpop.f32.mrb[33].mxu1  ;;  %v3003_v35 = vsel %vm255_vm11, %v2999_v29, -inf }
0x1349   :  { %3004 = vmax.xlane.f32.xlu1 %v3003_v35 }
0x135a   :  { %3014 = vrot.lane.b32.xlu1 %v8909_v32, %s7528_s21 }
0x135e   :  { %3166 = vrot.lane.b32.xlu1 %v8909_v32, %s7530_s22  ;;  %s10142_s22 = smov 112  }
0x1362   :  { %3164 = vrot.lane.b32.xlu1 %v8909_v32, %s7529_s1 }
0x13d6   :  { %v3005_v45 = vpop.xlane.xlu1 %3004 }
0x13d7   :  { %v3006_v36 = vsub.f32 %v2999_v29, %v3005_v45  ;;  %v5647_v45 = vld [vmem:[%s10118_s4 + $0x30] sm:$0xff] }
0x13d9   :  { %v3007_v37 = vmul.f32 1.442695, %v3006_v36 }
0x13da   :  { %v3015_v38 = vpop.permute.xlu1 %3014 }
0x13db   :  { %7479 = vpow2.f32 %v3007_v37  ;;  %6720 = vmatpush3.msra.mxu1 %v3015_v38 }
0x13dc   :  { %6729 = vmatprep.subr.mxu1 %v7525_v22 }
0x13de   :  { %v3167_v46 = vpop.permute.xlu1 %3166 }
0x13e2   :  { %v3165_v48 = vpop.permute.xlu1 %3164 }
0x13e5   :  { %v7480_v30 = vpop.eup %7479 }
0x13e6   :  { %v3009_v39 = vsel %vm255_vm11, %v7480_v30, 0.0 }
0x13e7   :  { %3010 = vadd.xlane.f32.xlu0 %v3009_v39 }
0x13fd   :  { %3253 = vrot.lane.b32.xlu0 %v8909_v32, %s10140_s3 }
0x1401   :  { %3405 = vrot.lane.b32.xlu0 %v8909_v32, %s10141_s20 }
0x1474   :  { %v3011_v41 = vpop.xlane.xlu0 %3010 }
0x1475   :  { %7481 = vrcp.f32 %v3011_v41 }
0x1478   :  { %v3254_v52 = vpop.permute.xlu0 %3253 }
0x147c   :  { %v3406_v2 = vpop.permute.xlu0 %3405 }
0x147f   :  { %v7482_v15 = vpop.eup %7481 }
0x1480   :  { %v3013_v47 = vmul.f32 %v7482_v15, %v7480_v30 }
0x1482   :  { %6722 = vmatmul.mubr.msk.f32.vlgmr.msra.gmra.mrb[34].mxu1 %vm255_vm11, %v3013_v47 }
0x1483   :  { %6730 = vmatpush3.xpose.msk.msra.mxu1 %vm255_vm11, %v3167_v46  ;;  %6731 = vmatprep.mubr.msk.f32.mxu1 %vm7524_vm8, %v7525_v22 }
0x1484   :  { %6739 = vmatprep.subr.mxu1 %v7525_v22 }
0x1486   :  { %6732 = vmatmul.mubr.msk.f32.vlgmr.msra.gmra.mrb[36].mxu1 %vm255_vm11, %v3165_v48  ;;  %v5648_v48 = vld [vmem:[%s10118_s4 + $0x38] sm:$0xff] }
0x1487   :  { %6741 = vmatprep.mubr.msk.f32.mxu1 %vm7524_vm8, %v7525_v22  ;;  %6740 = vmatpush3.msra.mxu1 %v5646_v7  ;;  %v5672_v7 = vld [vmem:[%s10122_s8 + $0x208] sm:$0xff] }
0x1488   :  { %6749 = vmatprep.subr.mxu1 %v7525_v22 }
0x1555   :  { %v3086_v49 = vpop.f32.mrb[34].mxu1 }
0x1556   :  { %v6723_v53 = vpop.f32.mrb[35].mxu1  ;;  %6727 = vmatmul.mubr.msk.f32.vlgmr.msra.gmra.mrb[28].mxu0 %vm255_vm11, %v3086_v49 }
0x1557   :  { %6735 = vmatpush3.msra.mxu0 %v3254_v52  ;;  %6736 = vmatprep.mubr.msk.f32.mxu0 %vm7524_vm8, %v7525_v22 }
0x1558   :  { %6744 = vmatprep.subr.mxu0 %v7525_v22 }
0x1559   :  { %v3238_v54 = vpop.f32.mrb[36].mxu1 }
0x155a   :  { %v6733_v55 = vpop.f32.mrb[37].mxu1  ;;  %v3242_v56 = vsel %vm255_vm11, %v3238_v54, -inf }
0x155b   :  { %3243 = vmax.xlane.f32.xlu1 %v3242_v56 }
0x15e8   :  { %v3244_v57 = vpop.xlane.xlu1 %3243 }
0x15e9   :  { %v3245_v19 = vsub.f32 %v3238_v54, %v3244_v57 }
0x15eb   :  { %v3246_v25 = vmul.f32 1.442695, %v3245_v19 }
0x15ed   :  { %7483 = vpow2.f32 %v3246_v25 }
0x15f7   :  { %v7484_v58 = vpop.eup %7483 }
0x15f8   :  { %v3248_v61 = vsel %vm255_vm11, %v7484_v58, 0.0 }
0x15f9   :  { %3249 = vadd.xlane.f32.xlu0 %v3248_v61 }
0x160f   :  { %3403 = vrot.lane.b32.xlu0 %v8909_v32, %s10142_s22 }
0x1629   :  { %v3159_v62 = vpop.f32.mrb[28].mxu0 }
0x162a   :  { %v6728_v63 = vpop.f32.mrb[29].mxu0  ;;  %v3163_v51 = vadd.f32 %v5650_v24, %v3159_v62  ;;  %v5720_v24 = vld [vmem:[%s10122_s8 + $0x388] sm:$0xff] }
0x1686   :  { %v3250_v3 = vpop.xlane.xlu0 %3249 }
0x1687   :  { %7485 = vrcp.f32 %v3250_v3 }
0x168a   :  { %v3404_v6 = vpop.permute.xlu0 %3403 }
0x1691   :  { %v7486_v4 = vpop.eup %7485 }
0x1692   :  { %v3252_v5 = vmul.f32 %v7486_v4, %v7484_v58 }
0x1694   :  { %6737 = vmatmul.mubr.msk.f32.vlgmr.msra.gmra.mrb[30].mxu0 %vm255_vm11, %v3252_v5 }
0x1695   :  { %6745 = vmatpush3.xpose.msk.msra.mxu0 %vm255_vm11, %v3406_v2  ;;  %6746 = vmatprep.mubr.msk.f32.mxu0 %vm7524_vm8, %v7525_v22 }
0x1696   :  { %6754 = vmatprep.subr.mxu0 %v7525_v22 }
0x1698   :  { %6747 = vmatmul.mubr.msk.f32.vlgmr.msra.gmra.mrb[32].mxu0 %vm255_vm11, %v3404_v6 }
0x1699   :  { %6756 = vmatprep.mubr.msk.f32.mxu0 %vm7524_vm8, %v7525_v22  ;;  %6755 = vmatpush3.msra.mxu0 %v5647_v45 }
0x169a   :  { %6764 = vmatprep.subr.mxu0 %v7525_v22 }
0x1767   :  { %v3325_v8 = vpop.f32.mrb[30].mxu0 }
0x1768   :  { %v6738_v0 = vpop.f32.mrb[31].mxu0  ;;  %6742 = vmatmul.mubr.msk.f32.vlgmr.msra.gmra.mrb[38].mxu1 %vm255_vm11, %v3325_v8  ;;  %v5688_v8 = vld [vmem:[%s10122_s8 + $0x288] sm:$0xff] }
0x1769   :  { %6751 = vmatprep.mubr.msk.f32.mxu1 %vm7524_vm8, %v7525_v22  ;;  %v7117_v0 = vpack.c.bf16 %v5688_v8, %v5672_v7  ;;  %v5725_v7 = vld [vmem:[%s10122_s8 + $0x3b0] sm:$0xff]  ;;  %v5680_v8 = vld [vmem:[%s10122_s8 + $0x248] sm:$0xff] }
0x176b   :  { %v3477_v1 = vpop.f32.mrb[32].mxu0 }
0x176c   :  { %v6748_v44 = vpop.f32.mrb[33].mxu0  ;;  %v3481_v9 = vsel %vm255_vm11, %v3477_v1, -inf }
0x176d   :  { %3482 = vmax.xlane.f32.xlu1 %v3481_v9  ;;  %v5671_v44 = vld [vmem:[%s10122_s8 + $0x200] sm:$0xff] }
0x176e   :  { %v5687_v9 = vld [vmem:[%s10122_s8 + $0x280] sm:$0xff] }
0x177e   :  { %3492 = vrot.lane.b32.xlu1 %v8909_v32, %s10143_s17 }
0x1782   :  { %3644 = vrot.lane.b32.xlu1 %v8909_v32, %s10144_s25 }
0x1786   :  { %3642 = vrot.lane.b32.xlu1 %v8909_v32, %s10145_s18  ;;  %s7538_s18 = smov [#allocation2]  }
0x17fa   :  { %v3483_v10 = vpop.xlane.xlu1 %3482 }
0x17fb   :  { %v3484_v50 = vsub.f32 %v3477_v1, %v3483_v10  ;;  %v5690_v1 = vld [vmem:[%s10122_s8 + $0x298] sm:$0xff] }
0x17fd   :  { %v3485_v11 = vmul.f32 1.442695, %v3484_v50  ;;  %v7119_v50 = vpack.c.bf16 %v5687_v9, %v5671_v44 }
0x17fe   :  { %v3493_v60 = vpop.permute.xlu1 %3492 }
0x17ff   :  { %7487 = vpow2.f32 %v3485_v11  ;;  %6750 = vmatpush3.msra.mxu1 %v3493_v60  ;;  %v5673_v11 = vld [vmem:[%s10122_s8 + $0x210] sm:$0xff] }
0x1800   :  { %6759 = vmatprep.subr.mxu1 %v7525_v22  ;;  %v5689_v60 = vld [vmem:[%s10122_s8 + $0x290] sm:$0xff] }
0x1802   :  { %v3645_v29 = vpop.permute.xlu1 %3644 }
0x1806   :  { %v3643_v35 = vpop.permute.xlu1 %3642 }
0x1809   :  { %v7488_v14 = vpop.eup %7487 }
0x180a   :  { %v3487_v23 = vsel %vm255_vm11, %v7488_v14, 0.0 }
0x180b   :  { %3488 = vadd.xlane.f32.xlu0 %v3487_v23  ;;  %v5704_v23 = vld [vmem:[%s10122_s8 + $0x308] sm:$0xff] }
0x183b   :  { %v3398_v26 = vpop.f32.mrb[38].mxu1 }
0x183c   :  { %v3402_v27 = vadd.f32 %v3398_v26, %v3163_v51  ;;  %v6743_v31 = vpop.f32.mrb[39].mxu1  ;;  %v5706_v51 = vld [vmem:[%s10122_s8 + $0x318] sm:$0xff]  ;;  %v7121_v26 = vpack.c.bf16 %v5720_v24, %v5704_v23  ;;  %v5697_v23 = vld [vmem:[%s10122_s8 + $0x2d0] sm:$0xff]  ;;  %v5712_v24 = vld [vmem:[%s10122_s8 + $0x348] sm:$0xff] }
0x183d   :  { %v5703_v31 = vld [vmem:[%s10122_s8 + $0x300] sm:$0xff] }
0x1898   :  { %v3489_v43 = vpop.xlane.xlu0 %3488 }
0x1899   :  { %7489 = vrcp.f32 %v3489_v43  ;;  %v5719_v43 = vld [vmem:[%s10122_s8 + $0x380] sm:$0xff] }
0x18a3   :  { %v7490_v33 = vpop.eup %7489 }
0x18a4   :  { %v3491_v34 = vmul.f32 %v7490_v33, %v7488_v14  ;;  %v7127_v14 = vpack.c.bf16 %v5689_v60, %v5673_v11 }
0x18a6   :  { %6752 = vmatmul.mubr.msk.f32.vlgmr.msra.gmra.mrb[40].mxu1 %vm255_vm11, %v3491_v34  ;;  %v5705_v34 = vld [vmem:[%s10122_s8 + $0x310] sm:$0xff] }
0x18a7   :  { %6760 = vmatpush3.xpose.msk.msra.mxu1 %vm255_vm11, %v3645_v29  ;;  %6761 = vmatprep.mubr.msk.f32.mxu1 %vm7524_vm8, %v7525_v22  ;;  %v7123_v29 = vpack.c.bf16 %v5719_v43, %v5703_v31 }
0x18a8   :  { %6769 = vmatprep.subr.mxu1 %v7525_v22 }
0x18aa   :  { %6762 = vmatmul.mubr.msk.f32.vlgmr.msra.gmra.mrb[42].mxu1 %vm255_vm11, %v3643_v35  ;;  %v5721_v35 = vld [vmem:[%s10122_s8 + $0x390] sm:$0xff] }
0x18ab   :  { %6771 = vmatprep.mubr.msk.f32.mxu1 %vm7524_vm8, %v7525_v22  ;;  %6770 = vmatpush3.msra.mxu1 %v5648_v48  ;;  %v7131_v45 = vpack.c.bf16 %v5721_v35, %v5705_v34 }
0x1979   :  { %v3564_v36 = vpop.f32.mrb[40].mxu1 }
0x197a   :  { %v6753_v37 = vpop.f32.mrb[41].mxu1  ;;  %6757 = vmatmul.mubr.msk.f32.vlgmr.msra.gmra.mrb[34].mxu0 %vm255_vm11, %v3564_v36  ;;  %v5676_v36 = vld [vmem:[%s10122_s8 + $0x228] sm:$0xff] }
0x197b   :  { %6766 = vmatprep.mubr.msk.f32.mxu0 %vm7524_vm8, %v7525_v22  ;;  %v5692_v37 = vld [vmem:[%s10122_s8 + $0x2a8] sm:$0xff] }
0x197d   :  { %v3716_v38 = vpop.f32.mrb[42].mxu1 }
0x197e   :  { %v6763_v30 = vpop.f32.mrb[43].mxu1  ;;  %v3720_v39 = vsel %vm255_vm11, %v3716_v38, -inf }
0x197f   :  { %3721 = vmax.xlane.f32.xlu1 %v3720_v39  ;;  %v7133_v30 = vpack.c.bf16 %v5692_v37, %v5676_v36  ;;  %v5694_v39 = vld [vmem:[%s10122_s8 + $0x2b8] sm:$0xff]  ;;  %v5729_v36 = vld [vmem:[%s10122_s8 + $0x3d0] sm:$0xff]  ;;  %v5684_v37 = vld [vmem:[%s10122_s8 + $0x268] sm:$0xff] }
0x1a0c   :  { %v3722_v40 = vpop.xlane.xlu1 %3721 }
0x1a0d   :  { %v3723_v41 = vsub.f32 %v3716_v38, %v3722_v40  ;;  %v5678_v38 = vld [vmem:[%s10122_s8 + $0x238] sm:$0xff] }
0x1a0e   :  { %v7141_v40 = vpack.c.bf16 %v5694_v39, %v5678_v38  ;;  %v5700_v38 = vld [vmem:[%s10122_s8 + $0x2e8] sm:$0xff]  ;;  %v5702_v39 = vld [vmem:[%s10122_s8 + $0x2f8] sm:$0xff] }
0x1a0f   :  { %v3724_v15 = vmul.f32 1.442695, %v3723_v41 }
0x1a11   :  { %7491 = vpow2.f32 %v3724_v15 }
0x1a1b   :  { %v7492_v46 = vpop.eup %7491 }
0x1a1c   :  { %v3726_v47 = vsel %vm255_vm11, %v7492_v46, 0.0 }
0x1a1d   :  { %3727 = vadd.xlane.f32.xlu0 %v3726_v47  ;;  %v5668_v47 = vld [vmem:[%s10120_s6 + $0x1] ss:$0 sm:$0xff] }
0x1a33   :  { %3731 = vrot.lane.b32.xlu0 %v8909_v32, %s10146_s28 }
0x1a4d   :  { %v3637_v49 = vpop.f32.mrb[34].mxu0 }
0x1a4e   :  { %v3641_v52 = vadd.f32 %v3637_v49, %v3402_v27  ;;  %v6758_v53 = vpop.f32.mrb[35].mxu0  ;;  %v5722_v27 = vld [vmem:[%s10122_s8 + $0x398] sm:$0xff]  ;;  %v5670_v49 = vld [vmem:[%s10121_s7 + $0x1] ss:$0 sm:$0xff]  ;;  %s5598_s7 = sshll.u32 %s7538_s18, 4  ;;  %s5599_s7 = int_to_ptr.vmem [resolvable:$true] %s5598_s7 }
0x1a4f   :  { %v7129_v33 = vpack.c.bf16 %v5722_v27, %v5706_v51  ;;  %v5691_v53 = vld [vmem:[%s10122_s8 + $0x2a0] sm:$0xff]  ;;  %v5728_v51 = vld [vmem:[%s10122_s8 + $0x3c8] sm:$0xff]  ;;  %v5730_v27 = vld [vmem:[%s10122_s8 + $0x3d8] sm:$0xff]  ;;  %p7504_p1 = scmp.lt.s32.totalorder %s5599_s7, %s5599_s7 }
0x1a50   :  { %v7153_v34 = vpack.c.bf16 %v5728_v51, %v5712_v24  ;;  %v5747_v51 = vld [vmem:[%s10124_s10 + $0x810] sm:$0xff] }
0x1aaa   :  { %v3728_v54 = vpop.xlane.xlu0 %3727 }
0x1aab   :  { %7493 = vrcp.f32 %v3728_v54 }
0x1aae   :  { %v3732_v55 = vpop.permute.xlu0 %3731 }
0x1aaf   :  { %6765 = vmatpush3.msra.mxu0 %v3732_v55  ;;  %v5677_v55 = vld [vmem:[%s10122_s8 + $0x230] sm:$0xff] }
0x1ab0   :  { %7118 = vmatprep.subr.bf16.mxu0 %v7117_v0  ;;  %v5682_v0 = vld [vmem:[%s10122_s8 + $0x258] sm:$0xff] }
0x1ab5   :  { %v7494_v56 = vpop.eup %7493 }
0x1ab6   :  { %v3730_v57 = vmul.f32 %v7494_v56, %v7492_v46  ;;  %v5693_v56 = vld [vmem:[%s10122_s8 + $0x2b0] sm:$0xff] }
0x1ab8   :  { %6767 = vmatmul.mubr.msk.f32.vlgmr.msra.gmra.mrb[36].mxu0 %vm255_vm11, %v3730_v57  ;;  %v5708_v57 = vld [vmem:[%s10122_s8 + $0x328] sm:$0xff] }
0x1ab9   :  { %4130 = vmatprep.mubr.f32.mxu0 %v7525_v22  ;;  %7120 = vmatpush1.bf16.msra.mxu0 %v7119_v50  ;;  %v5695_v50 = vld [vmem:[%s10122_s8 + $0x2c0] sm:$0xff] }
0x1aba   :  { %7122 = vmatprep.subr.bf16.mxu0 %v7121_v26  ;;  %v5714_v26 = vld [vmem:[%s10122_s8 + $0x358] sm:$0xff] }
0x1abb   :  { %v7161_v35 = vpack.c.bf16 %v5730_v27, %v5714_v26  ;;  %v5748_v26 = vld [vmem:[%s10124_s10 + $0x818] sm:$0xff] }
0x1abd   :  { %7124 = vmatpush1.bf16.msra.mxu0 %v7123_v29  ;;  %v5727_v29 = vld [vmem:[%s10122_s8 + $0x3c0] sm:$0xff] }
0x1abe   :  { %7134 = vmatprep.subr.bf16.mxu0 %v7133_v30  ;;  %v5686_v30 = vld [vmem:[%s10122_s8 + $0x278] sm:$0xff] }
0x1b8b   :  { %v3803_v19 = vpop.f32.mrb[36].mxu0 }
0x1b8c   :  { %v6768_v32 = vpop.f32.mrb[37].mxu0  ;;  %6772 = vmatmul.mubr.msk.f32.vlgmr.msra.gmra.mrb[44].mxu1 %vm255_vm11, %v3803_v19  ;;  %v5724_v19 = vld [vmem:[%s10122_s8 + $0x3a8] sm:$0xff] }
0x1b8d   :  { %4201 = vmatprep.mubr.f32.mxu1 %v7525_v22  ;;  %v5710_v32 = vld [vmem:[%s10122_s8 + $0x338] sm:$0xff] }
0x1c5f   :  { %v3876_v25 = vpop.f32.mrb[44].mxu1 }
0x1c60   :  { %v3880_v58 = vadd.f32 %v3876_v25, %v3641_v52  ;;  %v6773_v61 = vpop.f32.mrb[45].mxu1  ;;  %v5675_v52 = vld [vmem:[%s10122_s8 + $0x220] sm:$0xff]  ;;  %v5726_v25 = vld [vmem:[%s10122_s8 + $0x3b8] sm:$0xff] }
0x1c61   :  { %v7135_v61 = vpack.c.bf16 %v5691_v53, %v5675_v52  ;;  %v5701_v52 = vld [vmem:[%s10122_s8 + $0x2f0] sm:$0xff]  ;;  %v5716_v53 = vld [vmem:[%s10122_s8 + $0x368] sm:$0xff] }
0x1c62   :  { %v3881_v62 = vadd.f32 %v3880_v58, %v8900_v13  ;;  %v5674_v13 = vld [vmem:[%s10122_s8 + $0x218] sm:$0xff] }
0x1c63   :  { %v7125_v10 = vpack.c.bf16 %v5690_v1, %v5674_v13  ;;  %v5696_v13 = vld [vmem:[%s10122_s8 + $0x2c8] sm:$0xff]  ;;  %v5698_v1 = vld [vmem:[%s10122_s8 + $0x2d8] sm:$0xff] }
0x1c64   :  { %v3882_v63 = vsel %vm167_vm10, %v3881_v62, 0.0  ;;  %v7149_v11 = vpack.c.bf16 %v5696_v13, %v5680_v8  ;;  %v7157_v60 = vpack.c.bf16 %v5698_v1, %v5682_v0  ;;  %v5745_v13 = vld [vmem:[%s10124_s10 + $0x800] sm:$0xff]  ;;  %v5746_v0 = vld [vmem:[%s10124_s10 + $0x808] sm:$0xff] }
0x1c65   :  { %3883 = vadd.xlane.f32.xlu0 %v3882_v63  ;;  %7126 = vmatprep.subr.bf16.mxu1 %v7125_v10  ;;  %v5707_v63 = vld [vmem:[%s10122_s8 + $0x320] sm:$0xff] }
0x1c66   :  { %7128 = vmatpush1.bf16.msra.mxu1 %v7127_v14  ;;  %v5679_v10 = vld [vmem:[%s10122_s8 + $0x240] sm:$0xff]  ;;  %v5681_v14 = vld [vmem:[%s10122_s8 + $0x250] sm:$0xff] }
0x1c67   :  { %7130 = vmatprep.subr.bf16.mxu1 %v7129_v33  ;;  %v7151_v31 = vpack.c.bf16 %v5695_v50, %v5679_v10  ;;  %v7159_v43 = vpack.c.bf16 %v5697_v23, %v5681_v14  ;;  %v5711_v33 = vld [vmem:[%s10122_s8 + $0x340] sm:$0xff]  ;;  %v5778_v10 = vld [vmem:[%s10124_s10 + $0x908] sm:$0xff]  ;;  %v5763_v50 = vld [vmem:[%s10124_s10 + $0x890] sm:$0xff]  ;;  %v7183_v23 = vpack.c.bf16 %v5746_v0, %v5745_v13 }
0x1c68   :  { %v5796_v14 = vld [vmem:[%s10124_s10 + $0x998] sm:$0xff]  ;;  %v5786_v13 = vld [vmem:[%s10124_s10 + $0x948] sm:$0xff]  ;;  %v5771_v0 = vld [vmem:[%s10124_s10 + $0x8d0] sm:$0xff] }
0x1c6a   :  { %7132 = vmatpush1.bf16.msra.mxu1 %v7131_v45  ;;  %v5713_v45 = vld [vmem:[%s10122_s8 + $0x350] sm:$0xff] }
0x1c6b   :  { %7142 = vmatprep.subr.bf16.mxu1 %v7141_v40  ;;  %v7155_v40 = vpack.c.bf16 %v5727_v29, %v5711_v33  ;;  %v5780_v33 = vld [vmem:[%s10124_s10 + $0x918] sm:$0xff]  ;;  %v5765_v29 = vld [vmem:[%s10124_s10 + $0x8a0] sm:$0xff] }
0x1cf2   :  { %v3884_v2 = vpop.xlane.xlu0 %3883 }
0x1cf3   :  { %v3885_v3 = vmul.f32 0.03125, %v3884_v2  ;;  %v5723_v2 = vld [vmem:[%s10122_s8 + $0x3a0] sm:$0xff] }
0x1cf4   :  { %v7139_v44 = vpack.c.bf16 %v5723_v2, %v5707_v63  ;;  %v5733_v63 = vld [vmem:[%s10122_s8 + $0x3f0] sm:$0xff]  ;;  %v5761_v2 = vld [vmem:[%s10124_s10 + $0x880] sm:$0xff] }
0x1cf5   :  { %v3886_v4 = vsub.f32 %v3881_v62, %v3885_v3  ;;  %v7143_v62 = vpack.c.bf16 %v5693_v56, %v5677_v55  ;;  %v5718_v55 = vld [vmem:[%s10122_s8 + $0x378] sm:$0xff] }
0x1cf6   :  { %v5734_v56 = vld [vmem:[%s10122_s8 + $0x3f8] sm:$0xff] }
0x1cf7   :  { %v3887_v5 = vmul.f32 %v3886_v4, %v3886_v4 }
0x1cf9   :  { %v3888_v6 = vsel %vm167_vm10, %v3887_v5, 0.0  ;;  %v7145_v5 = vpack.c.bf16 %v5726_v25, %v5710_v32  ;;  %v5715_v32 = vld [vmem:[%s10122_s8 + $0x360] sm:$0xff] }
0x1cfa   :  { %3889 = vadd.xlane.f32.xlu1 %v3888_v6  ;;  %v5709_v6 = vld [vmem:[%s10122_s8 + $0x330] sm:$0xff]  ;;  %v5731_v25 = vld [vmem:[%s10122_s8 + $0x3e0] sm:$0xff] }
0x1cfb   :  { %v7147_v9 = vpack.c.bf16 %v5725_v7, %v5709_v6  ;;  %v5794_v6 = vld [vmem:[%s10124_s10 + $0x988] sm:$0xff]  ;;  %v7171_v7 = vpack.c.bf16 %v5731_v25, %v5715_v32  ;;  %v5784_v32 = vld [vmem:[%s10124_s10 + $0x938] sm:$0xff]  ;;  %v5769_v25 = vld [vmem:[%s10124_s10 + $0x8c0] sm:$0xff] }
0x1d87   :  { %v3890_v41 = vpop.xlane.xlu1 %3889 }
0x1d88   :  { %v3891_v15 = vmul.f32 0.03125, %v3890_v41  ;;  %v7163_v41 = vpack.c.bf16 %v5729_v36, %v5713_v45  ;;  %v5798_v45 = vld [vmem:[%s10124_s10 + $0x9a8] sm:$0xff]  ;;  %v7187_v36 = vpack.c.bf16 %v5748_v26, %v5747_v51  ;;  %v5788_v51 = vld [vmem:[%s10124_s10 + $0x958] sm:$0xff]  ;;  %v5773_v26 = vld [vmem:[%s10124_s10 + $0x8e0] sm:$0xff] }
0x1d8a   :  { %v3892_v46 = vadd.f32 1e-05, %v3891_v15  ;;  %v5683_v15 = vld [vmem:[%s10122_s8 + $0x260] sm:$0xff] }
0x1d8c   :  { %7495 = vrsqrt.f32 %v3892_v46  ;;  %v5699_v46 = vld [vmem:[%s10122_s8 + $0x2e0] sm:$0xff] }
0x1d96   :  { %v7496_v48 = vpop.eup %7495 }
0x1d97   :  { %v3894_v54 = vmul.f32 %v7496_v48, %v3886_v4  ;;  %v7137_v4 = vpack.c.bf16 %v5724_v19, %v5708_v57  ;;  %v7173_v48 = vpack.c.bf16 %v5702_v39, %v5686_v30  ;;  %v7167_v57 = vpack.c.bf16 %v5699_v46, %v5683_v15  ;;  %v5750_v30 = vld [vmem:[%s10124_s10 + $0x828] sm:$0xff]  ;;  %v5767_v46 = vld [vmem:[%s10124_s10 + $0x8b0] sm:$0xff] }
0x1d98   :  { %v5782_v15 = vld [vmem:[%s10124_s10 + $0x928] sm:$0xff] }
0x1d99   :  { %v3903_v58 = vmul.f32 %v5668_v47, %v3894_v54  ;;  %v7165_v47 = vpack.c.bf16 %v5700_v38, %v5684_v37  ;;  %v5732_v54 = vld [vmem:[%s10122_s8 + $0x3e8] sm:$0xff]  ;;  %v5749_v38 = vld [vmem:[%s10124_s10 + $0x820] sm:$0xff] }
0x1d9b   :  { %v9104_v3 = vadd.f32 %v5670_v49, %v3903_v58  ;;  %v5685_v49 = vld [vmem:[%s10122_s8 + $0x270] sm:$0xff]  ;;  %v7169_v58 = vpack.c.bf16 %v5732_v54, %v5716_v53 }
0x1d9c   :  { %v7175_v19 = vpack.c.bf16 %v5701_v52, %v5685_v49  ;;  %v5800_v49 = vld [vmem:[%s10124_s10 + $0x9b8] sm:$0xff]  ;;  %v7191_v52 = vpack.c.bf16 %v5750_v30, %v5749_v38  ;;  %v5751_v54 = vld [vmem:[%s10124_s10 + $0x830] sm:$0xff]  ;;  %v5790_v38 = vld [vmem:[%s10124_s10 + $0x968] sm:$0xff] }
0x1d9d   :  { %5737 = vmatmul.mubr.msk.f32.vlgmr.msra.gmra.mrb[38].mxu0 %vm167_vm10, %v9104_v3  ;;  %5738 = vmatmul.mubr.msk.f32.vlgmr.msra.gmra.mrb[46].mxu1 %vm167_vm10, %v9104_v3 }
0x1d9e   :  { %7136 = vmatpush1.bf16.msra.mxu0 %v7135_v61  ;;  %7144 = vmatpush1.bf16.msra.mxu1 %v7143_v62  ;;  %v7177_v61 = vpack.c.bf16 %v5734_v56, %v5718_v55  ;;  %v5717_v62 = vld [vmem:[%s10122_s8 + $0x370] sm:$0xff]  ;;  %v5752_v55 = vld [vmem:[%s10124_s10 + $0x838] sm:$0xff] }
0x1d9f   :  { %7138 = vmatprep.subr.bf16.mxu0 %v7137_v4  ;;  %7146 = vmatprep.subr.bf16.mxu1 %v7145_v5  ;;  %v5762_v4 = vld [vmem:[%s10124_s10 + $0x888] sm:$0xff]  ;;  %v5793_v5 = vld [vmem:[%s10124_s10 + $0x980] sm:$0xff]  ;;  %v7179_v8 = vpack.c.bf16 %v5733_v63, %v5717_v62  ;;  %v7195_v63 = vpack.c.bf16 %v5752_v55, %v5751_v54  ;;  %v5791_v54 = vld [vmem:[%s10124_s10 + $0x970] sm:$0xff] }
0x1da0   :  { %4272 = vmatprep.mubr.f32.mxu0 %v7525_v22  ;;  %4343 = vmatprep.mubr.f32.mxu1 %v7525_v22  ;;  %v7181_v1 = vpack.c.bf16 %v5762_v4, %v5761_v2  ;;  %v5802_v62 = vld [vmem:[%s10124_s10 + $0x9c8] sm:$0xff]  ;;  %v5753_v4 = vld [vmem:[%s10124_s10 + $0x840] sm:$0xff]  ;;  %v5792_v55 = vld [vmem:[%s10124_s10 + $0x978] sm:$0xff] }
0x1da2   :  { %7140 = vmatpush1.bf16.msra.mxu0 %v7139_v44  ;;  %7148 = vmatpush1.bf16.msra.mxu1 %v7147_v9  ;;  %v7213_v44 = vpack.c.bf16 %v5794_v6, %v5793_v5  ;;  %v5777_v9 = vld [vmem:[%s10124_s10 + $0x900] sm:$0xff]  ;;  %v5754_v5 = vld [vmem:[%s10124_s10 + $0x848] sm:$0xff] }
0x1da3   :  { %7150 = vmatprep.subr.bf16.mxu0 %v7149_v11  ;;  %7158 = vmatprep.subr.bf16.mxu1 %v7157_v60  ;;  %v5764_v11 = vld [vmem:[%s10124_s10 + $0x898] sm:$0xff]  ;;  %v5795_v60 = vld [vmem:[%s10124_s10 + $0x990] sm:$0xff]  ;;  %v7215_v24 = vpack.c.bf16 %v5778_v10, %v5777_v9  ;;  %v7199_v10 = vpack.c.bf16 %v5754_v5, %v5753_v4 }
0x1da4   :  { %v7185_v27 = vpack.c.bf16 %v5764_v11, %v5763_v50  ;;  %v5804_v9 = vld [vmem:[%s10124_s10 + $0x9d8] sm:$0xff]  ;;  %v5755_v11 = vld [vmem:[%s10124_s10 + $0x850] sm:$0xff] }
0x1da5   :  { %5739 = vmatmul.mubr.msk.f32.vlgmr.msra.gmra.mrb[40].mxu0 %vm167_vm10, %v9104_v3  ;;  %5740 = vmatmul.mubr.msk.f32.vlgmr.msra.gmra.mrb[48].mxu1 %vm167_vm10, %v9104_v3 }
0x1da6   :  { %7152 = vmatpush1.bf16.msra.mxu0 %v7151_v31  ;;  %7160 = vmatpush1.bf16.msra.mxu1 %v7159_v43  ;;  %v7217_v31 = vpack.c.bf16 %v5796_v14, %v5795_v60  ;;  %v5779_v43 = vld [vmem:[%s10124_s10 + $0x910] sm:$0xff]  ;;  %v5756_v60 = vld [vmem:[%s10124_s10 + $0x858] sm:$0xff] }
0x1da7   :  { %7154 = vmatprep.subr.bf16.mxu0 %v7153_v34  ;;  %7162 = vmatprep.subr.bf16.mxu1 %v7161_v35  ;;  %v5766_v34 = vld [vmem:[%s10124_s10 + $0x8a8] sm:$0xff]  ;;  %v5797_v35 = vld [vmem:[%s10124_s10 + $0x9a0] sm:$0xff]  ;;  %v7219_v37 = vpack.c.bf16 %v5780_v33, %v5779_v43  ;;  %v7203_v33 = vpack.c.bf16 %v5756_v60, %v5755_v11  ;;  %v5827_v11 = vld [vmem:[%s10124_s10 + $0xa90] sm:$0xff] }
0x1da8   :  { %4414 = vmatprep.mubr.f32.mxu0 %v7525_v22  ;;  %4485 = vmatprep.mubr.f32.mxu1 %v7525_v22  ;;  %v7189_v39 = vpack.c.bf16 %v5766_v34, %v5765_v29  ;;  %v5806_v43 = vld [vmem:[%s10124_s10 + $0x9e8] sm:$0xff]  ;;  %v5757_v34 = vld [vmem:[%s10124_s10 + $0x860] sm:$0xff] }
0x1daa   :  { %7156 = vmatpush1.bf16.msra.mxu0 %v7155_v40  ;;  %7164 = vmatpush1.bf16.msra.mxu1 %v7163_v41  ;;  %v7221_v40 = vpack.c.bf16 %v5798_v45, %v5797_v35  ;;  %v5781_v41 = vld [vmem:[%s10124_s10 + $0x920] sm:$0xff] }
0x1dab   :  { %7166 = vmatprep.subr.bf16.mxu0 %v7165_v47  ;;  %7174 = vmatprep.subr.bf16.mxu1 %v7173_v48  ;;  %v5768_v47 = vld [vmem:[%s10124_s10 + $0x8b8] sm:$0xff]  ;;  %v5799_v48 = vld [vmem:[%s10124_s10 + $0x9b0] sm:$0xff]  ;;  %v7223_v53 = vpack.c.bf16 %v5782_v15, %v5781_v41 }
0x1dac   :  { %v7193_v56 = vpack.c.bf16 %v5768_v47, %v5767_v46  ;;  %v5776_v41 = vld [vmem:[%s10124_s10 + $0x8f8] sm:$0xff]  ;;  %v5807_v15 = vld [vmem:[%s10124_s10 + $0x9f0] sm:$0xff] }
0x1dad   :  { %5741 = vmatmul.mubr.msk.f32.vlgmr.msra.gmra.mrb[42].mxu0 %vm167_vm10, %v9104_v3  ;;  %5742 = vmatmul.mubr.msk.f32.vlgmr.msra.gmra.mrb[50].mxu1 %vm167_vm10, %v9104_v3  ;;  %v5808_v47 = vld [vmem:[%s10124_s10 + $0x9f8] sm:$0xff] }
0x1dae   :  { %7168 = vmatpush1.bf16.msra.mxu0 %v7167_v57  ;;  %7176 = vmatpush1.bf16.msra.mxu1 %v7175_v19  ;;  %v7225_v57 = vpack.c.bf16 %v5800_v49, %v5799_v48  ;;  %v5783_v19 = vld [vmem:[%s10124_s10 + $0x930] sm:$0xff]  ;;  %v5760_v49 = vld [vmem:[%s10124_s10 + $0x878] sm:$0xff] }
0x1daf   :  { %7170 = vmatprep.subr.bf16.mxu0 %v7169_v58  ;;  %7178 = vmatprep.subr.bf16.mxu1 %v7177_v61  ;;  %v5770_v58 = vld [vmem:[%s10124_s10 + $0x8c8] sm:$0xff]  ;;  %v5801_v61 = vld [vmem:[%s10124_s10 + $0x9c0] sm:$0xff]  ;;  %v7227_v2 = vpack.c.bf16 %v5784_v32, %v5783_v19  ;;  %v5759_v48 = vld [vmem:[%s10124_s10 + $0x870] sm:$0xff] }
0x1db0   :  { %4556 = vmatprep.mubr.f32.mxu0 %v7525_v22  ;;  %4627 = vmatprep.mubr.f32.mxu1 %v7525_v22  ;;  %v7197_v6 = vpack.c.bf16 %v5770_v58, %v5769_v25  ;;  %v5826_v19 = vld [vmem:[%s10124_s10 + $0xa88] sm:$0xff]  ;;  %v5857_v32 = vld [vmem:[%s10124_s10 + $0xb80] sm:$0xff] }
0x1db1   :  { %v5858_v58 = vld [vmem:[%s10124_s10 + $0xb88] sm:$0xff] }
0x1db2   :  { %7172 = vmatpush1.bf16.msra.mxu0 %v7171_v7  ;;  %7180 = vmatpush1.bf16.msra.mxu1 %v7179_v8  ;;  %v7229_v7 = vpack.c.bf16 %v5802_v62, %v5801_v61  ;;  %v5785_v8 = vld [vmem:[%s10124_s10 + $0x940] sm:$0xff]  ;;  %v7277_v61 = vpack.c.bf16 %v5858_v58, %v5857_v32  ;;  %v9437_v62 = vld [vmem:[%s10123_s9 + $0x10] sm:$0xff] }
0x1db3   :  { %7182 = vmatprep.subr.bf16.mxu0 %v7181_v1  ;;  %7214 = vmatprep.subr.bf16.mxu1 %v7213_v44  ;;  %v5772_v1 = vld [vmem:[%s10124_s10 + $0x8d8] sm:$0xff]  ;;  %v5803_v44 = vld [vmem:[%s10124_s10 + $0x9d0] sm:$0xff]  ;;  %v7231_v50 = vpack.c.bf16 %v5786_v13, %v5785_v8  ;;  %v3990_v4 = vrot.slane %v9437_v62, %v8220_v20  ;;  %v3998_v5 = vrot.slane %v9437_v62, %v8223_v21  ;;  %v5809_v8 = vld [vmem:[%s10124_s10 + $0xa00] sm:$0xff] }
0x1db4   :  { %v7201_v14 = vpack.c.bf16 %v5772_v1, %v5771_v0  ;;  %v5810_v13 = vld [vmem:[%s10124_s10 + $0xa08] sm:$0xff]  ;;  %v5845_v32 = vld [vmem:[%s10124_s10 + $0xb20] sm:$0xff]  ;;  %v5831_v58 = vld [vmem:[%s10124_s10 + $0xab0] sm:$0xff] }
0x1db5   :  { %5743 = vmatmul.mubr.msk.f32.vlgmr.msra.gmra.mrb[44].mxu0 %vm167_vm10, %v9104_v3  ;;  %5744 = vmatmul.mubr.msk.f32.vlgmr.msra.gmra.mrb[52].mxu1 %vm167_vm10, %v9104_v3 }
0x1db6   :  { %7184 = vmatpush3.bf16.msra.mxu0 %v7183_v23  ;;  %7216 = vmatpush3.bf16.msra.mxu1 %v7215_v24  ;;  %v7233_v23 = vpack.c.bf16 %v5804_v9, %v5803_v44  ;;  %v5787_v24 = vld [vmem:[%s10124_s10 + $0x950] sm:$0xff] }
0x1db7   :  { %7186 = vmatprep.subr.bf16.mxu0 %v7185_v27  ;;  %7218 = vmatprep.subr.bf16.mxu1 %v7217_v31  ;;  %v5774_v27 = vld [vmem:[%s10124_s10 + $0x8e8] sm:$0xff]  ;;  %v5805_v31 = vld [vmem:[%s10124_s10 + $0x9e0] sm:$0xff]  ;;  %v7235_v29 = vpack.c.bf16 %v5788_v51, %v5787_v24  ;;  %v5859_v24 = vld [vmem:[%s10124_s10 + $0xb90] sm:$0xff] }
0x1db8   :  { %v7205_v35 = vpack.c.bf16 %v5774_v27, %v5773_v26  ;;  %v7237_v45 = vpack.c.bf16 %v5806_v43, %v5805_v31  ;;  %v5860_v51 = vld [vmem:[%s10124_s10 + $0xb98] sm:$0xff]  ;;  %v7247_v31 = vpack.c.bf16 %v5810_v13, %v5809_v8 }
0x1dba   :  { %7188 = vmatpush3.bf16.msra.mxu0 %v7187_v36  ;;  %7220 = vmatpush3.bf16.msra.mxu1 %v7219_v37  ;;  %v5758_v36 = vld [vmem:[%s10124_s10 + $0x868] sm:$0xff]  ;;  %v5789_v37 = vld [vmem:[%s10124_s10 + $0x960] sm:$0xff] }
0x1dbb   :  { %7190 = vmatprep.subr.bf16.mxu0 %v7189_v39  ;;  %7222 = vmatprep.subr.bf16.mxu1 %v7221_v40  ;;  %v7207_v30 = vpack.c.bf16 %v5758_v36, %v5757_v34  ;;  %v7239_v39 = vpack.c.bf16 %v5790_v38, %v5789_v37  ;;  %v5775_v40 = vld [vmem:[%s10124_s10 + $0x8f0] sm:$0xff]  ;;  %v7281_v36 = vpack.c.bf16 %v5860_v51, %v5859_v24  ;;  %v5844_v38 = vld [vmem:[%s10124_s10 + $0xb18] sm:$0xff] }
0x1dbc   :  { %v7209_v46 = vpack.c.bf16 %v5776_v41, %v5775_v40  ;;  %v5843_v37 = vld [vmem:[%s10124_s10 + $0xb10] sm:$0xff]  ;;  %v4014_v40 = vrot.slane %v9437_v62, %v8252_v28  ;;  %v5830_v41 = vld [vmem:[%s10124_s10 + $0xaa8] sm:$0xff] }
0x1dbe   :  { %7192 = vmatpush3.bf16.msra.mxu0 %v7191_v52  ;;  %7224 = vmatpush3.bf16.msra.mxu1 %v7223_v53  ;;  %v7241_v52 = vpack.c.bf16 %v5808_v47, %v5807_v15  ;;  %v7211_v53 = vpack.c.bf16 %v5760_v49, %v5759_v48  ;;  %v5861_v15 = vld [vmem:[%s10124_s10 + $0xba0] sm:$0xff] }
0x1dbf   :  { %7194 = vmatprep.subr.bf16.mxu0 %v7193_v56  ;;  %7226 = vmatprep.subr.bf16.mxu1 %v7225_v57  ;;  %v7243_v56 = vpack.c.bf16 %v5792_v55, %v5791_v54  ;;  %v5825_v57 = vld [vmem:[%s10124_s10 + $0xa80] sm:$0xff]  ;;  %v5814_v54 = vld [vmem:[%s10124_s10 + $0xa28] sm:$0xff] }
0x1dc0   :  { %v7245_v25 = vpack.c.bf16 %v5826_v19, %v5825_v57 }
0x1dc2   :  { %7196 = vmatpush3.bf16.msra.mxu0 %v7195_v63  ;;  %7228 = vmatpush3.bf16.msra.mxu1 %v7227_v2  ;;  %v3986_v63 = vrot.slane %v9437_v62, %v8209_v16  ;;  %v3994_v2 = vrot.slane %v9437_v62, %v8212_v17 }
0x1dc3   :  { %7198 = vmatprep.subr.bf16.mxu0 %v7197_v6  ;;  %7230 = vmatprep.subr.bf16.mxu1 %v7229_v7 }
0x1dc6   :  { %7200 = vmatpush3.bf16.msra.mxu0 %v7199_v10  ;;  %7232 = vmatpush3.bf16.msra.mxu1 %v7231_v50  ;;  %v5841_v10 = vld [vmem:[%s10124_s10 + $0xb00] sm:$0xff]  ;;  %v5842_v50 = vld [vmem:[%s10124_s10 + $0xb08] sm:$0xff] }
0x1dc7   :  { %7202 = vmatprep.subr.bf16.mxu0 %v7201_v14  ;;  %7234 = vmatprep.subr.bf16.mxu1 %v7233_v23  ;;  %v5828_v23 = vld [vmem:[%s10124_s10 + $0xa98] sm:$0xff]  ;;  %v7279_v43 = vpack.c.bf16 %v5842_v50, %v5841_v10  ;;  %v5847_v10 = vld [vmem:[%s10124_s10 + $0xb30] sm:$0xff] }
0x1dc8   :  { %v5848_v50 = vld [vmem:[%s10124_s10 + $0xb38] sm:$0xff] }
0x1dca   :  { %7204 = vmatpush3.bf16.msra.mxu0 %v7203_v33  ;;  %7236 = vmatpush3.bf16.msra.mxu1 %v7235_v29  ;;  %v5811_v33 = vld [vmem:[%s10124_s10 + $0xa10] sm:$0xff]  ;;  %v5812_v29 = vld [vmem:[%s10124_s10 + $0xa18] sm:$0xff] }
0x1dcb   :  { %7206 = vmatprep.subr.bf16.mxu0 %v7205_v35  ;;  %7238 = vmatprep.subr.bf16.mxu1 %v7237_v45  ;;  %v7249_v45 = vpack.c.bf16 %v5828_v23, %v5827_v11  ;;  %v7251_v49 = vpack.c.bf16 %v5812_v29, %v5811_v33  ;;  %v5833_v11 = vld [vmem:[%s10124_s10 + $0xac0] sm:$0xff]  ;;  %v5866_v23 = vld [vmem:[%s10124_s10 + $0xbc8] sm:$0xff] }
0x1dce   :  { %7208 = vmatpush3.bf16.msra.mxu0 %v7207_v30  ;;  %7240 = vmatpush3.bf16.msra.mxu1 %v7239_v39  ;;  %v5829_v30 = vld [vmem:[%s10124_s10 + $0xaa0] sm:$0xff]  ;;  %v4006_v39 = vrot.slane %v9437_v62, %v8249_v42 }
0x1dcf   :  { %7210 = vmatprep.subr.bf16.mxu0 %v7209_v46  ;;  %7242 = vmatprep.subr.bf16.mxu1 %v7241_v52  ;;  %v5862_v46 = vld [vmem:[%s10124_s10 + $0xba8] sm:$0xff]  ;;  %v7283_v52 = vpack.c.bf16 %v5844_v38, %v5843_v37  ;;  %v7253_v57 = vpack.c.bf16 %v5830_v41, %v5829_v30  ;;  %v5835_v37 = vld [vmem:[%s10124_s10 + $0xad0] sm:$0xff]  ;;  %v5836_v38 = vld [vmem:[%s10124_s10 + $0xad8] sm:$0xff] }
0x1dd0   :  { %v7285_v19 = vpack.c.bf16 %v5862_v46, %v5861_v15  ;;  %v5867_v30 = vld [vmem:[%s10124_s10 + $0xbd0] sm:$0xff] }
0x1dd1   :  { %v5819_v46 = vld [vmem:[%s10124_s10 + $0xa50] sm:$0xff] }
0x1dd2   :  { %7212 = vmatpush3.bf16.msra.mxu0 %v7211_v53  ;;  %7244 = vmatpush3.bf16.msra.mxu1 %v7243_v56  ;;  %v5813_v53 = vld [vmem:[%s10124_s10 + $0xa20] sm:$0xff] }
0x1dd3   :  { %7246 = vmatprep.subr.bf16.mxu0 %v7245_v25  ;;  %7278 = vmatprep.subr.bf16.mxu1 %v7277_v61  ;;  %v5846_v25 = vld [vmem:[%s10124_s10 + $0xb28] sm:$0xff]  ;;  %v7255_v8 = vpack.c.bf16 %v5814_v54, %v5813_v53  ;;  %v7265_v53 = vpack.c.bf16 %v5836_v38, %v5835_v37 }
0x1dd4   :  { %v7287_v13 = vpack.c.bf16 %v5846_v25, %v5845_v32  ;;  %v5869_v32 = vld [vmem:[%s10124_s10 + $0xbe0] sm:$0xff]  ;;  %v5870_v25 = vld [vmem:[%s10124_s10 + $0xbe8] sm:$0xff] }
0x1dd5   :  { %v5890_v37 = vld [vmem:[%s10124_s10 + $0xc88] sm:$0xff] }
0x1e70   :  { %v4132_v6 = vpop.f32.mrb[38].mxu0  ;;  %v4203_v7 = vpop.f32.mrb[46].mxu1 }
0x1e71   :  { %v4133_v0 = vadd.f32 %v4132_v6, %v3986_v63  ;;  %v4204_v1 = vadd.f32 %v4203_v7, %v3994_v2  ;;  %v4134_v44 = vpop.f32.mrb[39].mxu0  ;;  %v4205_v9 = vpop.f32.mrb[47].mxu1  ;;  %v5832_v2 = vld [vmem:[%s10124_s10 + $0xab8] sm:$0xff] }
0x1e72   :  { %v4135_v60 = vadd.f32 %v4134_v44, %v3990_v4  ;;  %v4206_v14 = vadd.f32 %v4205_v9, %v3998_v5  ;;  %v5863_v4 = vld [vmem:[%s10124_s10 + $0xbb0] sm:$0xff]  ;;  %v5864_v5 = vld [vmem:[%s10124_s10 + $0xbb8] sm:$0xff]  ;;  %v7257_v44 = vpack.c.bf16 %v5832_v2, %v5831_v58 }
0x1e73   :  { %v4634_v34 = vmax.f32 %v4133_v0, 0.0  ;;  %v4636_v35 = vmax.f32 %v4204_v1, 0.0  ;;  %v5815_v0 = vld [vmem:[%s10124_s10 + $0xa30] sm:$0xff]  ;;  %v5816_v1 = vld [vmem:[%s10124_s10 + $0xa38] sm:$0xff]  ;;  %v7289_v9 = vpack.c.bf16 %v5864_v5, %v5863_v4  ;;  %v5821_v4 = vld [vmem:[%s10124_s10 + $0xa60] sm:$0xff] }
0x1e74   :  { %v4635_v26 = vmax.f32 %v4135_v60, 0.0  ;;  %v4637_v27 = vmax.f32 %v4206_v14, 0.0  ;;  %v5834_v60 = vld [vmem:[%s10124_s10 + $0xac8] sm:$0xff]  ;;  %v5865_v14 = vld [vmem:[%s10124_s10 + $0xbc0] sm:$0xff] }
0x1e75   :  { %v5822_v5 = vld [vmem:[%s10124_s10 + $0xa68] sm:$0xff] }
0x1e76   :  { %4979 = vmatprep.mubr.f32.mxu0 %v4635_v26  ;;  %5049 = vmatprep.mubr.f32.mxu1 %v4637_v27  ;;  %v7259_v26 = vpack.c.bf16 %v5816_v1, %v5815_v0  ;;  %v7291_v27 = vpack.c.bf16 %v5848_v50, %v5847_v10  ;;  %v7301_v0 = vpack.c.bf16 %v5870_v25, %v5869_v32  ;;  %v5853_v1 = vld [vmem:[%s10124_s10 + $0xb60] sm:$0xff]  ;;  %v5840_v10 = vld [vmem:[%s10124_s10 + $0xaf8] sm:$0xff]  ;;  %v5871_v50 = vld [vmem:[%s10124_s10 + $0xbf0] sm:$0xff] }
0x1e77   :  { %4980 = vmatmul.mubr.f32.vlgmr.msra.gmra.mrb[46].mxu0 %v4634_v34  ;;  %5050 = vmatmul.mubr.f32.vlgmr.msra.gmra.mrb[54].mxu1 %v4636_v35  ;;  %v7261_v34 = vpack.c.bf16 %v5834_v60, %v5833_v11  ;;  %v7293_v35 = vpack.c.bf16 %v5866_v23, %v5865_v14  ;;  %v5872_v11 = vld [vmem:[%s10124_s10 + $0xbf8] sm:$0xff]  ;;  %v4002_v60 = vrot.slane %v9437_v62, %v8410_v12 }
0x1e78   :  { %v9499_v47 = vpop.f32.mrb[40].mxu0  ;;  %v9501_v48 = vpop.f32.mrb[48].mxu1  ;;  %7248 = vmatpush3.bf16.msra.mxu0 %v7247_v31  ;;  %7280 = vmatpush3.bf16.msra.mxu1 %v7279_v43  ;;  %v5817_v31 = vld [vmem:[%s10124_s10 + $0xa40] sm:$0xff]  ;;  %v5818_v43 = vld [vmem:[%s10124_s10 + $0xa48] sm:$0xff]  ;;  %v7271_v14 = vpack.c.bf16 %v5822_v5, %v5821_v4 }
0x1e79   :  { %v4276_v55 = vpop.f32.mrb[41].mxu0  ;;  %v4347_v56 = vpop.f32.mrb[49].mxu1  ;;  %7250 = vmatprep.subr.bf16.mxu0 %v7249_v45  ;;  %7282 = vmatprep.subr.bf16.mxu1 %v7281_v36  ;;  %v5849_v45 = vld [vmem:[%s10124_s10 + $0xb40] sm:$0xff]  ;;  %v5850_v36 = vld [vmem:[%s10124_s10 + $0xb48] sm:$0xff]  ;;  %v7263_v41 = vpack.c.bf16 %v5818_v43, %v5817_v31  ;;  %v5855_v31 = vld [vmem:[%s10124_s10 + $0xb70] sm:$0xff]  ;;  %v4010_v43 = vrot.slane %v9437_v62, %v8376_v59 }
0x1e7a   :  { %v4277_v61 = vadd.f32 %v4276_v55, %v4006_v39  ;;  %v4348_v63 = vadd.f32 %v4347_v56, %v4014_v40  ;;  %v5868_v39 = vld [vmem:[%s10124_s10 + $0xbd8] sm:$0xff]  ;;  %v7295_v15 = vpack.c.bf16 %v5850_v36, %v5849_v45  ;;  %v5851_v55 = vld [vmem:[%s10124_s10 + $0xb50] sm:$0xff]  ;;  %v5889_v36 = vld [vmem:[%s10124_s10 + $0xc80] sm:$0xff] }
0x1e7b   :  { %v9586_v40 = vld [vmem:[%s10123_s9 + $0x18] sm:$0xff]  ;;  %v7297_v54 = vpack.c.bf16 %v5868_v39, %v5867_v30  ;;  %v5922_v62 = vld [vmem:[%s10124_s10 + $0xd88] sm:$0xff] }
0x1e7c   :  { %v4639_v6 = vmax.f32 %v4277_v61, 0.0  ;;  %v4641_v7 = vmax.f32 %v4348_v63, 0.0  ;;  %7252 = vmatpush3.bf16.msra.mxu0 %v7251_v49  ;;  %7284 = vmatpush3.bf16.msra.mxu1 %v7283_v52  ;;  %v5820_v49 = vld [vmem:[%s10124_s10 + $0xa58] sm:$0xff]  ;;  %v4042_v52 = vrot.slane %v9586_v40, %v8376_v59  ;;  %v4022_v38 = vrot.slane %v9586_v40, %v8220_v20  ;;  %v5921_v59 = vld [vmem:[%s10124_s10 + $0xd80] sm:$0xff] }
0x1e7d   :  { %7254 = vmatprep.subr.bf16.mxu0 %v7253_v57  ;;  %7286 = vmatprep.subr.bf16.mxu1 %v7285_v19  ;;  %v5852_v56 = vld [vmem:[%s10124_s10 + $0xb58] sm:$0xff]  ;;  %v5837_v57 = vld [vmem:[%s10124_s10 + $0xae0] sm:$0xff]  ;;  %v5838_v19 = vld [vmem:[%s10124_s10 + $0xae8] sm:$0xff]  ;;  %v7267_v63 = vpack.c.bf16 %v5820_v49, %v5819_v46  ;;  %v4030_v30 = vrot.slane %v9586_v40, %v8223_v21  ;;  %v4275_v46 = vadd.f32 %v9499_v47, %v4002_v60 }
0x1e7e   :  { %5119 = vmatprep.mubr.f32.mxu0 %v4639_v6  ;;  %5189 = vmatprep.mubr.f32.mxu1 %v4641_v7  ;;  %v7299_v2 = vpack.c.bf16 %v5852_v56, %v5851_v55  ;;  %v5856_v45 = vld [vmem:[%s10124_s10 + $0xb78] sm:$0xff]  ;;  %v4346_v20 = vadd.f32 %v9501_v48, %v4010_v43  ;;  %v7341_v49 = vpack.c.bf16 %v5922_v62, %v5921_v59  ;;  %v5874_v21 = vld [vmem:[%s10124_s10 + $0xc08] sm:$0xff]  ;;  %v5891_v48 = vld [vmem:[%s10124_s10 + $0xc90] sm:$0xff] }
0x1e7f   :  { %v5906_v47 = vld [vmem:[%s10124_s10 + $0xd08] sm:$0xff]  ;;  %v5892_v56 = vld [vmem:[%s10124_s10 + $0xc98] sm:$0xff]  ;;  %v4638_v32 = vmax.f32 %v4275_v46, 0.0  ;;  %v5879_v62 = vld [vmem:[%s10124_s10 + $0xc30] sm:$0xff] }
0x1e80   :  { %v9551_v24 = vpop.f32.mrb[42].mxu0  ;;  %v9553_v51 = vpop.f32.mrb[50].mxu1  ;;  %7256 = vmatpush3.bf16.msra.mxu0 %v7255_v8  ;;  %7288 = vmatpush3.bf16.msra.mxu1 %v7287_v13  ;;  %v7269_v13 = vpack.c.bf16 %v5838_v19, %v5837_v57  ;;  %v5924_v57 = vld [vmem:[%s10124_s10 + $0xd98] sm:$0xff]  ;;  %v4640_v25 = vmax.f32 %v4346_v20, 0.0  ;;  %v7313_v5 = vpack.c.bf16 %v5892_v56, %v5891_v48  ;;  %v5910_v43 = vld [vmem:[%s10124_s10 + $0xd28] sm:$0xff]  ;;  %v5897_v46 = vld [vmem:[%s10124_s10 + $0xcc0] sm:$0xff] }
0x1e81   :  { %v9561_v33 = vpop.f32.mrb[43].mxu0  ;;  %v9563_v29 = vpop.f32.mrb[51].mxu1  ;;  %7258 = vmatprep.subr.bf16.mxu0 %v7257_v44  ;;  %7290 = vmatprep.subr.bf16.mxu1 %v7289_v9  ;;  %v5854_v44 = vld [vmem:[%s10124_s10 + $0xb68] sm:$0xff]  ;;  %v5839_v9 = vld [vmem:[%s10124_s10 + $0xaf0] sm:$0xff] }
0x1e82   :  { %v7303_v23 = vpack.c.bf16 %v5854_v44, %v5853_v1  ;;  %v4490_v55 = vadd.f32 %v9563_v29, %v4030_v30  ;;  %v5893_v1 = vld [vmem:[%s10124_s10 + $0xca0] sm:$0xff]  ;;  %v5894_v44 = vld [vmem:[%s10124_s10 + $0xca8] sm:$0xff]  ;;  %v5880_v30 = vld [vmem:[%s10124_s10 + $0xc38] sm:$0xff] }
0x1e83   :  { %v5898_v20 = vld [vmem:[%s10124_s10 + $0xcc8] sm:$0xff] }
0x1e84   :  { %7260 = vmatpush3.bf16.msra.mxu0 %v7259_v26  ;;  %7292 = vmatpush3.bf16.msra.mxu1 %v7291_v27  ;;  %v5823_v26 = vld [vmem:[%s10124_s10 + $0xa70] sm:$0xff]  ;;  %v5824_v27 = vld [vmem:[%s10124_s10 + $0xa78] sm:$0xff]  ;;  %v5882_v48 = vld [vmem:[%s10124_s10 + $0xc48] sm:$0xff] }
0x1e85   :  { %7262 = vmatprep.subr.bf16.mxu0 %v7261_v34  ;;  %7294 = vmatprep.subr.bf16.mxu1 %v7293_v35  ;;  %v7273_v34 = vpack.c.bf16 %v5840_v10, %v5839_v9  ;;  %v7305_v35 = vpack.c.bf16 %v5872_v11, %v5871_v50  ;;  %v7275_v39 = vpack.c.bf16 %v5824_v27, %v5823_v26  ;;  %v4645_v9 = vmax.f32 %v4490_v55, 0.0  ;;  %v5925_v10 = vld [vmem:[%s10124_s10 + $0xda0] sm:$0xff]  ;;  %v5926_v50 = vld [vmem:[%s10124_s10 + $0xda8] sm:$0xff] }
0x1e86   :  { %v5878_v26 = vld [vmem:[%s10124_s10 + $0xc28] sm:$0xff]  ;;  %v5909_v27 = vld [vmem:[%s10124_s10 + $0xd20] sm:$0xff] }
0x1e87   :  { %v5913_v55 = vld [vmem:[%s10124_s10 + $0xd40] sm:$0xff] }
0x1e88   :  { %v9614_v58 = vpop.f32.mrb[44].mxu0  ;;  %v4629_v61 = vpop.f32.mrb[52].mxu1  ;;  %7264 = vmatpush3.bf16.msra.mxu0 %v7263_v41  ;;  %7296 = vmatpush3.bf16.msra.mxu1 %v7295_v15  ;;  %v7307_v41 = vpack.c.bf16 %v5856_v45, %v5855_v31  ;;  %v7309_v15 = vpack.c.bf16 %v5890_v37, %v5889_v36  ;;  %v7349_v31 = vpack.c.bf16 %v5926_v50, %v5925_v10  ;;  %v5927_v45 = vld [vmem:[%s10124_s10 + $0xdb0] sm:$0xff]  ;;  %v5928_v36 = vld [vmem:[%s10124_s10 + $0xdb8] sm:$0xff]  ;;  %v5934_v10 = vld [vmem:[%s10124_s10 + $0xde8] sm:$0xff] }
0x1e89   :  { %v9622_v6 = vadd.f32 %v4629_v61, %v4042_v52  ;;  %v9624_v7 = vpop.f32.mrb[45].mxu0  ;;  %v9626_v8 = vpop.f32.mrb[53].mxu1  ;;  %7266 = vmatprep.subr.bf16.mxu0 %v7265_v53  ;;  %7298 = vmatprep.subr.bf16.mxu1 %v7297_v54  ;;  %v5873_v52 = vld [vmem:[%s10124_s10 + $0xc00] sm:$0xff]  ;;  %v4419_v53 = vadd.f32 %v9561_v33, %v4022_v38  ;;  %v5923_v33 = vld [vmem:[%s10124_s10 + $0xd90] sm:$0xff]  ;;  %v7351_v38 = vpack.c.bf16 %v5910_v43, %v5909_v27 }
0x1e8a   :  { %v5905_v54 = vld [vmem:[%s10124_s10 + $0xd00] sm:$0xff]  ;;  %v7311_v19 = vpack.c.bf16 %v5874_v21, %v5873_v52  ;;  %v5875_v61 = vld [vmem:[%s10124_s10 + $0xc10] sm:$0xff]  ;;  %v5930_v52 = vld [vmem:[%s10124_s10 + $0xdc8] sm:$0xff]  ;;  %v7323_v21 = vpack.c.bf16 %v5880_v30, %v5879_v62 }
0x1e8b   :  { %v7343_v29 = vpack.c.bf16 %v5906_v47, %v5905_v54  ;;  %v4643_v4 = vmax.f32 %v4419_v53, 0.0  ;;  %v7325_v54 = vpack.c.bf16 %v5898_v20, %v5897_v46  ;;  %v5881_v47 = vld [vmem:[%s10124_s10 + $0xc40] sm:$0xff]  ;;  %v5903_v43 = vld [vmem:[%s10124_s10 + $0xcf0] sm:$0xff]  ;;  %v5888_v30 = vld [vmem:[%s10124_s10 + $0xc78] sm:$0xff] }
0x1e8c   :  { %7268 = vmatpush3.bf16.msra.mxu0 %v7267_v63  ;;  %7300 = vmatpush3.bf16.msra.mxu1 %v7299_v2  ;;  %v5876_v63 = vld [vmem:[%s10124_s10 + $0xc18] sm:$0xff]  ;;  %v5907_v2 = vld [vmem:[%s10124_s10 + $0xd10] sm:$0xff]  ;;  %v5953_v46 = vld [vmem:[%s10124_s10 + $0xe80] sm:$0xff] }
0x1e8d   :  { %7270 = vmatprep.subr.bf16.mxu0 %v7269_v13  ;;  %7302 = vmatprep.subr.bf16.mxu1 %v7301_v0  ;;  %v7345_v13 = vpack.c.bf16 %v5924_v57, %v5923_v33  ;;  %v5908_v0 = vld [vmem:[%s10124_s10 + $0xd18] sm:$0xff]  ;;  %v7315_v11 = vpack.c.bf16 %v5876_v63, %v5875_v61  ;;  %v5914_v33 = vld [vmem:[%s10124_s10 + $0xd48] sm:$0xff]  ;;  %v5899_v57 = vld [vmem:[%s10124_s10 + $0xcd0] sm:$0xff] }
0x1e8e   :  { %v7347_v60 = vpack.c.bf16 %v5908_v0, %v5907_v2  ;;  %v7359_v61 = vpack.c.bf16 %v5914_v33, %v5913_v55  ;;  %v5883_v2 = vld [vmem:[%s10124_s10 + $0xc50] sm:$0xff]  ;;  %v5916_v0 = vld [vmem:[%s10124_s10 + $0xd58] sm:$0xff]  ;;  %v5954_v20 = vld [vmem:[%s10124_s10 + $0xe88] sm:$0xff] }
0x1e8f   :  { %v5887_v62 = vld [vmem:[%s10124_s10 + $0xc70] sm:$0xff]  ;;  %v5938_v55 = vld [vmem:[%s10124_s10 + $0xe08] sm:$0xff] }
0x1e90   :  { %7272 = vmatpush3.bf16.msra.mxu0 %v7271_v14  ;;  %7304 = vmatpush3.bf16.msra.mxu1 %v7303_v23  ;;  %v7317_v14 = vpack.c.bf16 %v5894_v44, %v5893_v1  ;;  %v5877_v23 = vld [vmem:[%s10124_s10 + $0xc20] sm:$0xff]  ;;  %v5902_v44 = vld [vmem:[%s10124_s10 + $0xce8] sm:$0xff] }
0x1e91   :  { %7274 = vmatprep.subr.bf16.mxu0 %v7273_v34  ;;  %7306 = vmatprep.subr.bf16.mxu1 %v7305_v35  ;;  %v5895_v34 = vld [vmem:[%s10124_s10 + $0xcb0] sm:$0xff]  ;;  %v5896_v35 = vld [vmem:[%s10124_s10 + $0xcb8] sm:$0xff]  ;;  %v7319_v37 = vpack.c.bf16 %v5878_v26, %v5877_v23  ;;  %v5901_v1 = vld [vmem:[%s10124_s10 + $0xce0] sm:$0xff] }
0x1e92   :  { %v7321_v59 = vpack.c.bf16 %v5896_v35, %v5895_v34  ;;  %v5886_v23 = vld [vmem:[%s10124_s10 + $0xc68] sm:$0xff]  ;;  %v5917_v26 = vld [vmem:[%s10124_s10 + $0xd60] sm:$0xff]  ;;  %v5904_v34 = vld [vmem:[%s10124_s10 + $0xcf8] sm:$0xff] }
0x1e93   :  { %v5935_v35 = vld [vmem:[%s10124_s10 + $0xdf0] sm:$0xff]  ;;  %v5970_v33 = vld [vmem:[%s10124_s10 + $0xf08] sm:$0xff] }
0x1e94   :  { %7276 = vmatpush3.bf16.msra.mxu0 %v7275_v39  ;;  %7308 = vmatpush3.bf16.msra.mxu1 %v7307_v41  ;;  %v5911_v39 = vld [vmem:[%s10124_s10 + $0xd30] sm:$0xff]  ;;  %v7353_v41 = vpack.c.bf16 %v5928_v36, %v5927_v45  ;;  %v5936_v45 = vld [vmem:[%s10124_s10 + $0xdf8] sm:$0xff] }
0x1e95   :  { %7310 = vmatprep.subr.bf16.mxu0 %v7309_v15  ;;  %7342 = vmatprep.subr.bf16.mxu1 %v7341_v49  ;;  %v5912_v15 = vld [vmem:[%s10124_s10 + $0xd38] sm:$0xff]  ;;  %v5929_v49 = vld [vmem:[%s10124_s10 + $0xdc0] sm:$0xff] }
0x1e96   :  { %v7355_v53 = vpack.c.bf16 %v5912_v15, %v5911_v39  ;;  %v7357_v56 = vpack.c.bf16 %v5930_v52, %v5929_v49  ;;  %v5919_v39 = vld [vmem:[%s10124_s10 + $0xd70] sm:$0xff]  ;;  %v5920_v15 = vld [vmem:[%s10124_s10 + $0xd78] sm:$0xff]  ;;  %v4038_v49 = vrot.slane %v9586_v40, %v8249_v42  ;;  %v5986_v52 = vld [vmem:[%s10124_s10 + $0xf88] sm:$0xff] }
0x1e97   :  { %5120 = vmatmul.mubr.f32.vlgmr.msra.gmra.mrb[48].mxu0 %v4638_v32  ;;  %5190 = vmatmul.mubr.f32.vlgmr.msra.gmra.mrb[56].mxu1 %v4640_v25  ;;  %v5931_v32 = vld [vmem:[%s10124_s10 + $0xdd0] sm:$0xff]  ;;  %v5932_v25 = vld [vmem:[%s10124_s10 + $0xdd8] sm:$0xff]  ;;  %v5937_v42 = vld [vmem:[%s10124_s10 + $0xe00] sm:$0xff] }
0x1e98   :  { %7312 = vmatpush3.bf16.msra.mxu0 %v7311_v19  ;;  %5259 = vmatprep.mubr.f32.mxu0 %v4643_v4  ;;  %v5900_v19 = vld [vmem:[%s10124_s10 + $0xcd8] sm:$0xff] }
0x1e99   :  { %7344 = vmatpush3.bf16.msra.mxu1 %v7343_v29  ;;  %5329 = vmatprep.mubr.f32.mxu1 %v4645_v9  ;;  %v7327_v29 = vpack.c.bf16 %v5882_v48, %v5881_v47  ;;  %v7329_v63 = vpack.c.bf16 %v5900_v19, %v5899_v57  ;;  %v5884_v4 = vld [vmem:[%s10124_s10 + $0xc58] sm:$0xff]  ;;  %v5933_v9 = vld [vmem:[%s10124_s10 + $0xde0] sm:$0xff]  ;;  %v7371_v47 = vpack.c.bf16 %v5920_v15, %v5919_v39  ;;  %v5955_v19 = vld [vmem:[%s10124_s10 + $0xe90] sm:$0xff] }
0x1e9a   :  { %7314 = vmatprep.subr.bf16.mxu0 %v7313_v5  ;;  %7346 = vmatprep.subr.bf16.mxu1 %v7345_v13  ;;  %v5915_v5 = vld [vmem:[%s10124_s10 + $0xd50] sm:$0xff]  ;;  %v7361_v13 = vpack.c.bf16 %v5932_v25, %v5931_v32  ;;  %v7331_v50 = vpack.c.bf16 %v5884_v4, %v5883_v2  ;;  %v7365_v27 = vpack.c.bf16 %v5934_v10, %v5933_v9 }
0x1e9b   :  { %v7373_v48 = vpack.c.bf16 %v5954_v20, %v5953_v46  ;;  %v4561_v57 = vadd.f32 %v9624_v7, %v4038_v49  ;;  %v7375_v25 = vpack.c.bf16 %v5938_v55, %v5937_v42  ;;  %v5988_v7 = vld [vmem:[%s10124_s10 + $0xf98] sm:$0xff]  ;;  %v5939_v2 = vld [vmem:[%s10124_s10 + $0xe10] sm:$0xff]  ;;  %v5961_v20 = vld [vmem:[%s10124_s10 + $0xec0] sm:$0xff] }
0x1e9c   :  { %7316 = vmatpush3.bf16.msra.mxu0 %v7315_v11  ;;  %v7363_v11 = vpack.c.bf16 %v5916_v0, %v5915_v5  ;;  %v5971_v4 = vld [vmem:[%s10124_s10 + $0xf10] sm:$0xff]  ;;  %v5972_v0 = vld [vmem:[%s10124_s10 + $0xf18] sm:$0xff]  ;;  %v5962_v49 = vld [vmem:[%s10124_s10 + $0xec8] sm:$0xff] }
0x1e9d   :  { %7348 = vmatpush3.bf16.msra.mxu1 %v7347_v60  ;;  %7318 = vmatprep.subr.bf16.mxu0 %v7317_v14  ;;  %v7333_v60 = vpack.c.bf16 %v5902_v44, %v5901_v1  ;;  %v5885_v14 = vld [vmem:[%s10124_s10 + $0xc60] sm:$0xff]  ;;  %v5958_v44 = vld [vmem:[%s10124_s10 + $0xea8] sm:$0xff]  ;;  %v4647_v9 = vmax.f32 %v4561_v57, 0.0  ;;  %v5943_v39 = vld [vmem:[%s10124_s10 + $0xe30] sm:$0xff] }
0x1e9e   :  { %7350 = vmatprep.subr.bf16.mxu1 %v7349_v31  ;;  %v5918_v31 = vld [vmem:[%s10124_s10 + $0xd68] sm:$0xff]  ;;  %v7335_v36 = vpack.c.bf16 %v5886_v23, %v5885_v14  ;;  %v5957_v1 = vld [vmem:[%s10124_s10 + $0xea0] sm:$0xff]  ;;  %v7411_v23 = vpack.c.bf16 %v5972_v0, %v5971_v4  ;;  %v5976_v46 = vld [vmem:[%s10124_s10 + $0xf38] sm:$0xff] }
0x1e9f   :  { %v5977_v42 = vld [vmem:[%s10124_s10 + $0xf40] sm:$0xff]  ;;  %v5996_v57 = vld [vmem:[%s10124_s10 + $0xfd8] sm:$0xff] }
0x1ea0   :  { %7320 = vmatpush3.bf16.msra.mxu0 %v7319_v37  ;;  %v4018_v37 = vrot.slane %v9586_v40, %v8209_v16  ;;  %v7369_v16 = vpack.c.bf16 %v5936_v45, %v5935_v35  ;;  %v5974_v35 = vld [vmem:[%s10124_s10 + $0xf28] sm:$0xff]  ;;  %v5959_v45 = vld [vmem:[%s10124_s10 + $0xeb0] sm:$0xff]  ;;  %v5997_v4 = vld [vmem:[%s10124_s10 + $0xfe0] sm:$0xff] }
0x1ea1   :  { %7352 = vmatpush3.bf16.msra.mxu1 %v7351_v38  ;;  %7322 = vmatprep.subr.bf16.mxu0 %v7321_v59  ;;  %v7367_v38 = vpack.c.bf16 %v5918_v31, %v5917_v26  ;;  %v7337_v59 = vpack.c.bf16 %v5904_v34, %v5903_v43  ;;  %v7381_v26 = vpack.c.bf16 %v5958_v44, %v5957_v1  ;;  %v5942_v31 = vld [vmem:[%s10124_s10 + $0xe28] sm:$0xff]  ;;  %v5973_v43 = vld [vmem:[%s10124_s10 + $0xf20] sm:$0xff] }
0x1ea2   :  { %7354 = vmatprep.subr.bf16.mxu1 %v7353_v41  ;;  %v4026_v41 = vrot.slane %v9586_v40, %v8212_v17  ;;  %v5985_v17 = vld [vmem:[%s10124_s10 + $0xf80] sm:$0xff] }
0x1ea3   :  { %v5949_v44 = vld [vmem:[%s10124_s10 + $0xe60] sm:$0xff] }
0x1ea4   :  { %7324 = vmatpush3.bf16.msra.mxu0 %v7323_v21  ;;  %v4046_v21 = vrot.slane %v9586_v40, %v8252_v28  ;;  %v7405_v28 = vpack.c.bf16 %v5986_v52, %v5985_v17  ;;  %v5993_v17 = vld [vmem:[%s10124_s10 + $0xfc0] sm:$0xff]  ;;  %v5994_v52 = vld [vmem:[%s10124_s10 + $0xfc8] sm:$0xff] }
0x1ea5   :  { %7356 = vmatpush3.bf16.msra.mxu1 %v7355_v53  ;;  %7326 = vmatprep.subr.bf16.mxu0 %v7325_v54  ;;  %v7339_v53 = vpack.c.bf16 %v5888_v30, %v5887_v62  ;;  %v4417_v54 = vadd.f32 %v9551_v24, %v4018_v37  ;;  %v5969_v24 = vld [vmem:[%s10124_s10 + $0xf00] sm:$0xff]  ;;  %v5991_v37 = vld [vmem:[%s10124_s10 + $0xfb0] sm:$0xff]  ;;  %v7415_v62 = vpack.c.bf16 %v5974_v35, %v5973_v43 }
0x1ea6   :  { %7358 = vmatprep.subr.bf16.mxu1 %v7357_v56  ;;  %v4488_v56 = vadd.f32 %v9553_v51, %v4026_v41  ;;  %v5956_v51 = vld [vmem:[%s10124_s10 + $0xe98] sm:$0xff]  ;;  %v4632_v32 = vadd.f32 %v9626_v8, %v4046_v21  ;;  %v7421_v55 = vpack.c.bf16 %v5994_v52, %v5993_v17  ;;  %v5951_v35 = vld [vmem:[%s10124_s10 + $0xe70] sm:$0xff] }
0x1ea7   :  { %v5940_v8 = vld [vmem:[%s10124_s10 + $0xe18] sm:$0xff] }
0x1ea8   :  { %7328 = vmatpush3.bf16.msra.mxu0 %v7327_v29  ;;  %v5987_v29 = vld [vmem:[%s10124_s10 + $0xf90] sm:$0xff]  ;;  %v4644_v5 = vmax.f32 %v4488_v56, 0.0  ;;  %v7379_v14 = vpack.c.bf16 %v5940_v8, %v5939_v2  ;;  %v5944_v41 = vld [vmem:[%s10124_s10 + $0xe38] sm:$0xff]  ;;  %v5978_v56 = vld [vmem:[%s10124_s10 + $0xf48] sm:$0xff] }
0x1ea9   :  { %7360 = vmatpush3.bf16.msra.mxu1 %v7359_v61  ;;  %7330 = vmatprep.subr.bf16.mxu0 %v7329_v63  ;;  %v4642_v61 = vmax.f32 %v4417_v54, 0.0  ;;  %v7407_v63 = vpack.c.bf16 %v5970_v33, %v5969_v24  ;;  %v7409_v10 = vpack.c.bf16 %v5988_v7, %v5987_v29  ;;  %v7387_v21 = vpack.c.bf16 %v5944_v41, %v5943_v39  ;;  %v5964_v24 = vld [vmem:[%s10124_s10 + $0xed8] sm:$0xff]  ;;  %v5995_v33 = vld [vmem:[%s10124_s10 + $0xfd0] sm:$0xff]  ;;  %v5965_v2 = vld [vmem:[%s10124_s10 + $0xee0] sm:$0xff] }
0x1eaa   :  { %7362 = vmatprep.subr.bf16.mxu1 %v7361_v13  ;;  %v7377_v13 = vpack.c.bf16 %v5956_v51, %v5955_v19  ;;  %v7389_v54 = vpack.c.bf16 %v5962_v49, %v5961_v20  ;;  %v7423_v51 = vpack.c.bf16 %v5978_v56, %v5977_v42  ;;  %v5948_v29 = vld [vmem:[%s10124_s10 + $0xe58] sm:$0xff]  ;;  %v5979_v7 = vld [vmem:[%s10124_s10 + $0xf50] sm:$0xff]  ;;  %v5966_v8 = vld [vmem:[%s10124_s10 + $0xee8] sm:$0xff] }
0x1eab   :  { %v7397_v1 = vpack.c.bf16 %v5966_v8, %v5965_v2 }
0x1eac   :  { %7332 = vmatpush3.bf16.msra.mxu0 %v7331_v50  ;;  %v5989_v50 = vld [vmem:[%s10124_s10 + $0xfa0] sm:$0xff] }
0x1ead   :  { %7364 = vmatpush3.bf16.msra.mxu1 %v7363_v11  ;;  %7334 = vmatprep.subr.bf16.mxu0 %v7333_v60  ;;  %v5990_v11 = vld [vmem:[%s10124_s10 + $0xfa8] sm:$0xff]  ;;  %v4649_v60 = vmax.f32 %v4632_v32, 0.0 }
0x1eae   :  { %7366 = vmatprep.subr.bf16.mxu1 %v7365_v27  ;;  %v5941_v27 = vld [vmem:[%s10124_s10 + $0xe20] sm:$0xff]  ;;  %v7413_v34 = vpack.c.bf16 %v5990_v11, %v5989_v50  ;;  %v5982_v11 = vld [vmem:[%s10124_s10 + $0xf68] sm:$0xff] }
0x1eb0   :  { %7336 = vmatpush3.bf16.msra.mxu0 %v7335_v36  ;;  %v5960_v36 = vld [vmem:[%s10124_s10 + $0xeb8] sm:$0xff] }
0x1eb1   :  { %7368 = vmatpush3.bf16.msra.mxu1 %v7367_v38  ;;  %7338 = vmatprep.subr.bf16.mxu0 %v7337_v59  ;;  %v5992_v38 = vld [vmem:[%s10124_s10 + $0xfb8] sm:$0xff]  ;;  %v7383_v59 = vpack.c.bf16 %v5942_v31, %v5941_v27  ;;  %v7385_v30 = vpack.c.bf16 %v5960_v36, %v5959_v45  ;;  %v4034_v31 = vrot.slane %v9586_v40, %v8410_v12 }
0x1eb2   :  { %7370 = vmatprep.subr.bf16.mxu1 %v7369_v16  ;;  %v5975_v16 = vld [vmem:[%s10124_s10 + $0xf30] sm:$0xff]  ;;  %v7417_v15 = vpack.c.bf16 %v5992_v38, %v5991_v37  ;;  %v5952_v45 = vld [vmem:[%s10124_s10 + $0xe78] sm:$0xff] }
0x1eb3   :  { %v5983_v37 = vld [vmem:[%s10124_s10 + $0xf70] sm:$0xff]  ;;  %v5984_v12 = vld [vmem:[%s10124_s10 + $0xf78] sm:$0xff]  ;;  %v7403_v40 = vpack.c.bf16 %v5952_v45, %v5951_v35  ;;  %v4559_v38 = vadd.f32 %v9614_v58, %v4034_v31  ;;  %v6002_v58 = vld [vmem:[%s10125_s11 + $0x1] ss:$0 sm:$0xff] }
0x1eb4   :  { %7340 = vmatpush3.bf16.msra.mxu0 %v7339_v53  ;;  %v7419_v53 = vpack.c.bf16 %v5976_v46, %v5975_v16  ;;  %v6004_v31 = vld [vmem:[%s10126_s12 + $0x1] ss:$0 sm:$0xff]  ;;  %v6007_v45 = vld [vmem:[%s10129_s15] ss:$0 sm:$0xff]  ;;  %s7499_s12 = scalar_lea.vmem %s5599_s7, 128 }
0x1eb5   :  { %7372 = vmatpush3.bf16.msra.mxu1 %v7371_v47  ;;  %7374 = vmatprep.subr.bf16.mxu0 %v7373_v48  ;;  %v5945_v47 = vld [vmem:[%s10124_s10 + $0xe40] sm:$0xff]  ;;  %v5946_v48 = vld [vmem:[%s10124_s10 + $0xe48] sm:$0xff]  ;;  %p7500_p0 = scmp.ne.s32.totalorder %s5599_s7, %s7499_s12  ;;  %p7505_p2 = scmp.lt.s32.totalorder %s7499_s12, %s7499_s12 }
0x1eb6   :  { %7406 = vmatprep.subr.bf16.mxu1 %v7405_v28  ;;  %v5963_v28 = vld [vmem:[%s10124_s10 + $0xed0] sm:$0xff]  ;;  %v7391_v19 = vpack.c.bf16 %v5946_v48, %v5945_v47 }
0x1eb7   :  { %5260 = vmatmul.mubr.f32.vlgmr.msra.gmra.mrb[50].mxu0 %v4642_v61  ;;  %v7393_v32 = vpack.c.bf16 %v5964_v24, %v5963_v28  ;;  %v7425_v61 = vpack.c.bf16 %v5996_v57, %v5995_v33  ;;  %p7506_p3 = por %p7505_p2, %p7504_p1 }
0x1eb8   :  { %5330 = vmatmul.mubr.f32.vlgmr.msra.gmra.mrb[58].mxu1 %v4644_v5  ;;  %7376 = vmatpush3.bf16.msra.mxu0 %v7375_v25  ;;  %v5947_v25 = vld [vmem:[%s10124_s10 + $0xe50] sm:$0xff]  ;;  %v5998_v5 = vld [vmem:[%s10124_s10 + $0xfe8] sm:$0xff] }
0x1eb9   :  { %5399 = vmatprep.mubr.f32.mxu0 %v4647_v9  ;;  %7408 = vmatpush3.bf16.msra.mxu1 %v7407_v63  ;;  %v5980_v63 = vld [vmem:[%s10124_s10 + $0xf58] sm:$0xff]  ;;  %v5950_v9 = vld [vmem:[%s10124_s10 + $0xe68] sm:$0xff]  ;;  %v7429_v50 = vpack.c.bf16 %v5998_v5, %v5997_v4  ;;  %p7507_p4 = pnand %p7506_p3, %p7500_p0 }
0x1eba   :  { %5469 = vmatprep.mubr.f32.mxu1 %v4649_v60  ;;  %7378 = vmatprep.subr.bf16.mxu0 %v7377_v13  ;;  %v7395_v13 = vpack.c.bf16 %v5948_v29, %v5947_v25  ;;  %v7427_v0 = vpack.c.bf16 %v5980_v63, %v5979_v7  ;;  %v5967_v60 = vld [vmem:[%s10124_s10 + $0xef0] sm:$0xff]  ;;  %v7399_v27 = vpack.c.bf16 %v5950_v9, %v5949_v44  ;;  %v5507_v9 = vld [vmem:[%s10128_s14] sm:$0xff] }
0x1ebb   :  { %7410 = vmatprep.subr.bf16.mxu1 %v7409_v10  ;;  %v5981_v10 = vld [vmem:[%s10124_s10 + $0xf60] sm:$0xff] }
0x1ebc   :  { %7380 = vmatpush3.bf16.msra.mxu0 %v7379_v14  ;;  %v5968_v14 = vld [vmem:[%s10124_s10 + $0xef8] sm:$0xff]  ;;  %v7431_v43 = vpack.c.bf16 %v5982_v11, %v5981_v10  ;;  %v5508_v10 = vld [vmem:[%s10128_s14 + $0x8] sm:$0xff] }
0x1ebd   :  { %7412 = vmatpush3.bf16.msra.mxu1 %v7411_v23  ;;  %7382 = vmatprep.subr.bf16.mxu0 %v7381_v26  ;;  %v5999_v23 = vld [vmem:[%s10124_s10 + $0xff0] sm:$0xff]  ;;  %v6000_v26 = vld [vmem:[%s10124_s10 + $0xff8] sm:$0xff] }
0x1ebe   :  { %7414 = vmatprep.subr.bf16.mxu1 %v7413_v34  ;;  %v7401_v34 = vpack.c.bf16 %v5968_v14, %v5967_v60  ;;  %v7433_v36 = vpack.c.bf16 %v6000_v26, %v5999_v23  ;;  %v5510_v11 = vld [vmem:[%s10128_s14 + $0x18] sm:$0xff] }
0x1ec0   :  { %7384 = vmatpush3.bf16.msra.mxu0 %v7383_v59  ;;  %v7435_v59 = vpack.c.bf16 %v5984_v12, %v5983_v37 }
0x1ec1   :  { %7416 = vmatpush3.bf16.msra.mxu1 %v7415_v62  ;;  %7386 = vmatprep.subr.bf16.mxu0 %v7385_v30  ;;  %v4646_v62 = vmax.f32 %v4559_v38, 0.0  ;;  %v4648_v30 = vmax.f32 %v9622_v6, 0.0 }
0x1ec2   :  { %7418 = vmatprep.subr.bf16.mxu1 %v7417_v15 }
0x1ec4   :  { %7388 = vmatpush3.bf16.msra.mxu0 %v7387_v21 }
0x1ec5   :  { %7420 = vmatpush3.bf16.msra.mxu1 %v7419_v53  ;;  %7390 = vmatprep.subr.bf16.mxu0 %v7389_v54 }
0x1ec6   :  { %7422 = vmatprep.subr.bf16.mxu1 %v7421_v55 }
0x1ec8   :  { %7392 = vmatpush3.bf16.msra.mxu0 %v7391_v19 }
0x1ec9   :  { %7424 = vmatpush3.bf16.msra.mxu1 %v7423_v51  ;;  %7394 = vmatprep.subr.bf16.mxu0 %v7393_v32 }
0x1eca   :  { %7426 = vmatprep.subr.bf16.mxu1 %v7425_v61 }
0x1ecc   :  { %7396 = vmatpush3.bf16.msra.mxu0 %v7395_v13 }
0x1ecd   :  { %7428 = vmatpush3.bf16.msra.mxu1 %v7427_v0  ;;  %7398 = vmatprep.subr.bf16.mxu0 %v7397_v1 }
0x1ece   :  { %7430 = vmatprep.subr.bf16.mxu1 %v7429_v50  ;;  %v7438_v50 = vpack.c.bf16 %v5508_v10, %v5507_v9 }
0x1ed0   :  { %7400 = vmatpush3.bf16.msra.mxu0 %v7399_v27 }
0x1ed1   :  { %7432 = vmatpush3.bf16.msra.mxu1 %v7431_v43  ;;  %7402 = vmatprep.subr.bf16.mxu0 %v7401_v34  ;;  %v6006_v43 = vld [vmem:[%s10127_s13 + $0x1] ss:$0 sm:$0xff] }
0x1ed2   :  { %7434 = vmatprep.subr.bf16.mxu1 %v7433_v36 }
0x1ed4   :  { %7404 = vmatpush3.bf16.msra.mxu0 %v7403_v40 }
0x1ed5   :  { %7436 = vmatpush3.bf16.msra.mxu1 %v7435_v59  ;;  %7437 = vmatprep.subr.bf16.mxu0 %v7523_v18 }
0x1ed7   :  { %5400 = vmatmul.mubr.f32.vlgmr.msra.gmra.mrb[52].mxu0 %v4646_v62 }
0x1ed8   :  { %5470 = vmatmul.mubr.f32.vlgmr.msra.gmra.mrb[60].mxu1 %v4648_v30  ;;  %6782 = vmatprep.mubr.msk.f32.mxu0 %vm7524_vm8, %v7525_v22 }
0x1ed9   :  { %7439 = vmatpush3.bf16.msra.mxu0 %v7438_v50 }
0x1eda   :  { %7440 = vmatprep.subr.bf16.mxu0 %v7523_v18 }
0x1f4a   :  { %v6379_v39 = vpop.f32.mrb[46].mxu0  ;;  %v6414_v41 = vpop.f32.mrb[54].mxu1 }
0x1f4b   :  { %v6380_v16 = vpop.f32.mrb[47].mxu0  ;;  %v6415_v15 = vpop.f32.mrb[55].mxu1 }
0x1f4c   :  { %v6381_v46 = vadd.f32 %v6380_v16, %v6379_v39  ;;  %v6416_v20 = vadd.f32 %v6415_v15, %v6414_v41 }
0x1f4e   :  { %v4982_v49 = vadd.f32 %v6381_v46, %v6002_v58 }
0x1f50   :  { %v5052_v17 = vadd.f32 %v6416_v20, %v4982_v49 }
0x1f6a   :  { %v6449_v52 = vpop.f32.mrb[48].mxu0  ;;  %v6484_v21 = vpop.f32.mrb[56].mxu1 }
0x1f6b   :  { %v6450_v6 = vpop.f32.mrb[49].mxu0  ;;  %v6485_v53 = vpop.f32.mrb[57].mxu1 }
0x1f6c   :  { %v6451_v54 = vadd.f32 %v6450_v6, %v6449_v52  ;;  %v6486_v47 = vadd.f32 %v6485_v53, %v6484_v21 }
0x1f6e   :  { %v5122_v48 = vadd.f32 %v6451_v54, %v5052_v17 }
0x1f70   :  { %v5192_v22 = vadd.f32 %v6486_v47, %v5122_v48 }
0x1f8a   :  { %v6519_v42 = vpop.f32.mrb[50].mxu0 }
0x1f8b   :  { %v6554_v55 = vpop.f32.mrb[58].mxu1  ;;  %v6520_v56 = vpop.f32.mrb[51].mxu0 }
0x1f8c   :  { %v6521_v28 = vadd.f32 %v6520_v56, %v6519_v42  ;;  %v6555_v24 = vpop.f32.mrb[59].mxu1 }
0x1f8d   :  { %v6556_v33 = vadd.f32 %v6555_v24, %v6554_v55 }
0x1f8e   :  { %v5262_v57 = vadd.f32 %v6521_v28, %v5192_v22 }
0x1f90   :  { %v5332_v19 = vadd.f32 %v6556_v33, %v5262_v57 }
0x1faa   :  { %v6589_v51 = vpop.f32.mrb[52].mxu0 }
0x1fab   :  { %v6624_v32 = vpop.f32.mrb[60].mxu1  ;;  %v6590_v25 = vpop.f32.mrb[53].mxu0 }
0x1fac   :  { %v6591_v29 = vadd.f32 %v6590_v25, %v6589_v51  ;;  %v6625_v7 = vpop.f32.mrb[61].mxu1 }
0x1fad   :  { %v6626_v61 = vadd.f32 %v6625_v7, %v6624_v32 }
0x1fae   :  { %v5402_v63 = vadd.f32 %v6591_v29, %v5332_v19 }
0x1fb0   :  { %v5472_v2 = vadd.f32 %v6626_v61, %v5402_v63 }
0x1fb2   :  { %v5475_v8 = vadd.f32 %v5472_v2, %v9104_v3  ;;  %v5509_v3 = vld [vmem:[%s10128_s14 + $0x10] sm:$0xff] }
0x1fb3   :  { %v7441_v60 = vpack.c.bf16 %v5510_v11, %v5509_v3 }
0x1fb4   :  { %v5476_v4 = vsel %vm167_vm10, %v5475_v8, 0.0 }
0x1fb5   :  { %5477 = vadd.xlane.f32.xlu1 %v5476_v4  ;;  %7442 = vmatpush3.bf16.msra.mxu0 %v7441_v60 }
0x2042   :  { %v5478_v5 = vpop.xlane.xlu1 %5477 }
0x2043   :  { %v5479_v13 = vmul.f32 0.03125, %v5478_v5 }
0x2045   :  { %v5480_v0 = vsub.f32 %v5475_v8, %v5479_v13 }
0x2047   :  { %v5481_v1 = vmul.f32 %v5480_v0, %v5480_v0 }
0x2049   :  { %v5482_v44 = vsel %vm167_vm10, %v5481_v1, 0.0 }
0x204a   :  { %5483 = vadd.xlane.f32.xlu1 %v5482_v44 }
0x20d7   :  { %v5484_v14 = vpop.xlane.xlu1 %5483 }
0x20d8   :  { %v5485_v23 = vmul.f32 0.03125, %v5484_v14 }
0x20da   :  { %v5486_v26 = vadd.f32 1e-05, %v5485_v23 }
0x20dc   :  { %7497 = vrsqrt.f32 %v5486_v26 }
0x20e6   :  { %v7498_v27 = vpop.eup %7497 }
0x20e7   :  { %v5488_v18 = vmul.f32 %v7498_v27, %v5480_v0 }
0x20e9   :  { %v5497_v34 = vmul.f32 %v6004_v31, %v5488_v18 }
0x20eb   :  { %v5506_v35 = vadd.f32 %v6006_v43, %v5497_v34 }
0x20ed   :  { %6783 = vmatmul.mubr.msk.f32.vlgmr.msra.gmra.mrb[54].mxu0 %vm167_vm10, %v5506_v35 }
0x21c0   :  { %v5587_v36 = vpop.f32.mrb[54].mxu0 }
0x21c1   :  { %v5588_v37 = vadd.f32 %v6007_v45, %v5587_v36  ;;  %v6784_v12 = vpop.f32.mrb[55].mxu0 }
0x21c3   :  { %5591 = vst [vmem:[#allocation2] sm:$0xff] %v5588_v37 }
0x21c4   :  { %7510 = shalt.err (!%p7507_p4)
}
0x21c5   :  { %s7511_s23 = scalar_lea.hbm %s10130_s16, 128 }
0x21c6   :  { %p7512_p5 = scmp.ne.s32.totalorder %s10130_s16, %s7511_s23  ;;  %p7515_p6 = scmp.lt.u32.totalorder %s7511_s23, %s10130_s16 }
0x21c8   :  { %p7517_p7 = pnand %p7515_p6, %p7512_p5 }
0x21ca   :  { %7520 = shalt.err (!%p7517_p7)
}
0x21cb   :  { %5601 = dma.vmem_to_hbm [thread:$0]  %s5599_s7, 128, %s10130_s16, [#allocation3]  }
0x21cc   :  { %7521 = dma.done.wait [#allocation3], 128  }
0x21cd   :  { %7522 = vsyncadd [#allocation3], 4294967168 }
0x21ce   :  { %5605 = vsyncpa [#allocation3], 1 }

</bundles_post_ra>
